<compile_context>
chip_gen: v7x
topology: tpu7x:2x2x1
jax: 0.10.0
libtpu: 0.0.40
codegen_flags: <defaults>
</compile_context>

<pallas_src>
import functools

import numpy as np
import jax
import jax.numpy as jnp
from jax.experimental import pallas as pl
from jax.experimental.pallas import tpu as pltpu


# -----------------------------------------------------------------------------
# Kernel 1: full Siamese encoder.
# One grid step per *pair* of images (A and B of one batch element), stacked
# vertically in the matmul M dimension.  Each ConvBlockNested level =
# conv1+BN+ReLU, conv2+BN+residual+ReLU, fused; each 3x3 conv = 3 aligned
# banded matmuls whose results are row-shifted with pltpu.roll + edge masks.
# -----------------------------------------------------------------------------
def _encoder_kernel(x_ref, wb_ref, s_ref, b_ref, saved_ref, *, depth, H, M, WC):
    # edge masks: zero the row tap that would bleed across stacked images
    row = jax.lax.broadcasted_iota(jnp.int32, (M, 1), 0)
    m_top = (row % H != 0).astype(jnp.float32)        # first row of each image
    m_bot = (row % H != H - 1).astype(jnp.float32)    # last row of each image

    cur = x_ref[...]                                  # (M, W*C) f32
    for lvl in range(depth):
        for j in range(2):
            cb = cur.astype(jnp.bfloat16)             # single cast per conv
            d0 = jnp.dot(cb, wb_ref[lvl, j, 0], preferred_element_type=jnp.float32)
            d1 = jnp.dot(cb, wb_ref[lvl, j, 1], preferred_element_type=jnp.float32)
            d2 = jnp.dot(cb, wb_ref[lvl, j, 2], preferred_element_type=jnp.float32)
            # out[h] = d0[h-1] + d1[h] + d2[h+1]   (zero outside each image)
            acc = (pltpu.roll(d0, shift=1, axis=0) * m_top
                   + d1
                   + pltpu.roll(d2, shift=M - 1, axis=0) * m_bot)
            y = acc * s_ref[lvl, j] + b_ref[lvl, j]   # folded BN (+conv bias)
            if j == 1:
                y = y + cur                           # residual with x1
            cur = jnp.maximum(y, 0.0)
        saved_ref[lvl] = cur


def encoder(x, params, *, depth, H, W, C, n_img, imgs_per_step=2):
    WC = W * C
    assert n_img % imgs_per_step == 0
    M = imgs_per_step * H
    steps = n_img // imgs_per_step
    kern = functools.partial(_encoder_kernel, depth=depth, H=H, M=M, WC=WC)
    return pl.pallas_call(
        kern,
        out_shape=jax.ShapeDtypeStruct((depth, n_img * H, WC), jnp.float32),
        grid=(steps,),
        in_specs=[
            pl.BlockSpec((M, WC), lambda n: (n, 0)),
            pl.BlockSpec((depth, 2, 3, WC, WC), lambda n: (0, 0, 0, 0, 0)),
            pl.BlockSpec((depth, 2, 1, WC), lambda n: (0, 0, 0, 0)),
            pl.BlockSpec((depth, 2, 1, WC), lambda n: (0, 0, 0, 0)),
        ],
        out_specs=pl.BlockSpec((depth, M, WC), lambda n: (0, n, 0)),
        compiler_params=pltpu.CompilerParams(
            dimension_semantics=("parallel",),
            vmem_limit_bytes=32 * 1024 * 1024),
    )(x, params["wband"], params["scale"], params["bias"])


# -----------------------------------------------------------------------------
# Kernel 2: fused ECAM epilogue (lane-dense).
# One grid step per batch element.  Input is the per-pixel channel-packed slab
# ep_in (HW, 128) whose 4C-wide groups are [A_direct, B_direct, A_upin, B_upin]
# per concat level.  The 4 (ConvTranspose2d+MaxPool2d) taps are 4 block-diagonal
# (128,128) dots + max; the direct columns pass through in f32; then intra-sum,
# both channel attentions, gating and conv_final (classes padded to 128 lanes).
# -----------------------------------------------------------------------------
def _epilogue_kernel(ep_ref, upw_ref, upb_ref, fold_ref, caw1_ref, caw2_ref,
                     ca1w1_ref, ca1w2_ref, wf_ref, bf_ref, y_ref, *,
                     HW, CC, cint, nlev):
    ep = ep_ref[0]                                    # (HW, CC) f32
    ep_bf = ep.astype(jnp.bfloat16)

    # fused ConvTranspose2d(2, stride=2) + MaxPool2d(2,2): max over 4 taps,
    # every (level, stream) channel block handled by one K=CC dot per tap.
    u = jnp.dot(ep_bf, upw_ref[0], preferred_element_type=jnp.float32)
    for t in range(1, 4):
        u = jnp.maximum(
            u, jnp.dot(ep_bf, upw_ref[t], preferred_element_type=jnp.float32))

    # assemble `out` = torch.cat(output_features, 1): per 4C group the layout is
    # [A_direct, B_direct, upA, upB]; direct columns pass through untouched.
    lane = jax.lax.broadcasted_iota(jnp.int32, (1, CC), 1)
    is_direct = (lane % cint) < (cint // 2)
    out = jnp.where(is_direct, ep, u + upb_ref[...])  # bias once, after the max

    # intra = sum(torch.stack(output_features), 0) as a fold matmul (idle MXU)
    intra = jnp.dot(out.astype(jnp.bfloat16), fold_ref[...],
                    preferred_element_type=jnp.float32)        # (HW, cint)

    inv_hw = 1.0 / HW

    def channel_attention(x2d, w1, w2):
        pooled = jnp.concatenate(
            [jnp.sum(x2d, axis=0, keepdims=True) * inv_hw,
             jnp.max(x2d, axis=0, keepdims=True)], axis=0)     # (2, ch)
        h = jnp.maximum(
            jnp.dot(pooled, w1, preferred_element_type=jnp.float32), 0.0)
        z = jnp.dot(h, w2, preferred_element_type=jnp.float32)
        return jax.nn.sigmoid(z[0:1] + z[1:2])                 # (1, ch)

    ca = channel_attention(out, caw1_ref[...], caw2_ref[...])        # (1, CC)
    ca1 = channel_attention(intra, ca1w1_ref[...], ca1w2_ref[...])   # (1, cint)
    ca1_rep = jnp.concatenate([ca1] * nlev, axis=1)                  # repeat(1,4,1,1)

    g = ca * (out + ca1_rep)
    y = jnp.dot(g, wf_ref[...], preferred_element_type=jnp.float32) + bf_ref[...]
    y_ref[0] = y                                       # lane-dense full-width store


def epilogue(ep_in, p, *, N, HW, CC, cint, nlev, ncls_pad):
    kern = functools.partial(_epilogue_kernel, HW=HW, CC=CC, cint=cint,
                             nlev=nlev)

    def full(arr):
        shape = tuple(arr.shape)
        nd = len(shape)
        return pl.BlockSpec(shape, lambda n, _nd=nd: (0,) * _nd)

    return pl.pallas_call(
        kern,
        out_shape=jax.ShapeDtypeStruct((N, HW, ncls_pad), jnp.float32),
        grid=(N,),
        in_specs=[
            pl.BlockSpec((1, HW, CC), lambda n: (n, 0, 0)),   # A+B in one block
            full(p["up_w_pack"]),
            full(p["up_b_placed"]),
            full(p["fold"]),
            full(p["ca_w1"]),
            full(p["ca_w2"]),
            full(p["ca1_w1"]),
            full(p["ca1_w2"]),
            full(p["wf_pad"]),
            full(p["bf_pad"]),
        ],
        out_specs=pl.BlockSpec((1, HW, ncls_pad), lambda n: (n, 0, 0)),
        compiler_params=pltpu.CompilerParams(
            dimension_semantics=("parallel",),
            vmem_limit_bytes=32 * 1024 * 1024),
    )(ep_in, p["up_w_pack"], p["up_b_placed"], p["fold"], p["ca_w1"],
      p["ca_w2"], p["ca1_w1"], p["ca1_w2"], p["wf_pad"], p["bf_pad"])


# -----------------------------------------------------------------------------
# Parameters (deterministic, synthetic).  3x3 conv weights are pre-expanded to
# banded (W*C, W*C) matrices so one lane-dense matmul per dy row-tap realizes
# the whole same-padded conv; BN is folded to per-channel scale/bias.  The up
# weights / biases / fold matrix are packed block-diagonally into the epilogue's
# lane-dense channel layout; conv_final is padded to 128 output lanes.
# -----------------------------------------------------------------------------
def init_params(key, in_channels, num_classes, base_channel, depth, H, W):
    C = base_channel
    assert in_channels <= C, "input channels are zero-padded up to base_channel"
    WC = W * C
    nlev = depth - 1
    cint = 4 * C                       # channels per concat group / intra
    cout = cint * nlev                 # total concat channels (=128 here)
    ncls_pad = max(128, ((num_classes + 127) // 128) * 128)
    eps = 1e-5
    keys = jax.random.split(key, 128)
    it = iter(range(128))

    def nrm(shape, s):
        return s * jax.random.normal(keys[next(it)], shape, jnp.float32)

    def make_band(w_np):                                  # w_np: (3, 3, C, C)
        band = np.zeros((3, WC, WC), np.float32)
        for dx in range(3):
            for x in range(W):
                src = x + dx - 1                          # same-padding along W
                if 0 <= src < W:
                    band[:, src * C:(src + 1) * C, x * C:(x + 1) * C] = w_np[:, dx]
        return band

    wbands, scales, biases = [], [], []
    for lvl in range(depth):
        wb_l, sc_l, bi_l = [], [], []
        for j in range(2):
            cin = in_channels if (lvl == 0 and j == 0) else C
            w = np.zeros((3, 3, C, C), np.float32)        # zero-pad extra cin
            w[:, :, :cin, :] = np.asarray(nrm((3, 3, cin, C), 0.15))
            cb = np.asarray(nrm((C,), 0.05))
            gamma = 1.0 + np.asarray(nrm((C,), 0.05))
            beta = np.asarray(nrm((C,), 0.05))
            mean = np.asarray(nrm((C,), 0.05))
            var = np.ones((C,), np.float32)
            s = gamma / np.sqrt(var + eps)                # folded BN (eval mode)
            b = beta + (cb - mean) * s
            wb_l.append(make_band(w))
            sc_l.append(np.tile(s, W).reshape(1, WC))
            bi_l.append(np.tile(b, W).reshape(1, WC))
        wbands.append(np.stack(wb_l))
        scales.append(np.stack(sc_l))
        biases.append(np.stack(bi_l))

    # up layers (canonical (level, ky, kx, cin, cout) weights) packed
    # block-diagonally into the epilogue channel layout; bias placed on the
    # up columns only.
    up_w = np.asarray(nrm((nlev, 2, 2, C, C), 0.15))
    up_b = np.asarray(nrm((nlev, C), 0.05))
    up_w_pack = np.zeros((4, cout, cout), np.float32)
    up_b_placed = np.zeros((1, cout), np.float32)
    taps = ((0, 0), (0, 1), (1, 0), (1, 1))
    for i in range(nlev):
        for t, (ky, kx) in enumerate(taps):
            for s in range(2):                            # stream A / B
                r0 = i * cint + 2 * C + s * C             # up columns of group i
                up_w_pack[t, r0:r0 + C, r0:r0 + C] = up_w[i, ky, kx]
        for s in range(2):
            r0 = i * cint + 2 * C + s * C
            up_b_placed[0, r0:r0 + C] = up_b[i]

    # fold matrix: intra = sum over concat groups of `out`
    fold = np.zeros((cout, cint), np.float32)
    for i in range(nlev):
        fold[i * cint:(i + 1) * cint, :] = np.eye(cint, dtype=np.float32)

    # conv_final, padded to a lane-dense class dimension
    wf = np.asarray(nrm((cout, num_classes), 0.15))
    bf = np.asarray(nrm((num_classes,), 0.05))
    wf_pad = np.zeros((cout, ncls_pad), np.float32)
    wf_pad[:, :num_classes] = wf
    bf_pad = np.zeros((1, ncls_pad), np.float32)
    bf_pad[0, :num_classes] = bf

    return {
        "wband": jnp.asarray(np.stack(wbands), jnp.bfloat16),  # (d,2,3,WC,WC)
        "scale": jnp.asarray(np.stack(scales)),                # (d,2,1,WC)
        "bias": jnp.asarray(np.stack(biases)),                 # (d,2,1,WC)
        "up_w_pack": jnp.asarray(up_w_pack, jnp.bfloat16),     # (4,cout,cout)
        "up_b_placed": jnp.asarray(up_b_placed),               # (1,cout)
        "fold": jnp.asarray(fold, jnp.bfloat16),               # (cout,cint)
        "ca_w1": nrm((cout, cout // 16), 0.2),
        "ca_w2": nrm((cout // 16, cout), 0.2),
        "ca1_w1": nrm((cint, cint // 4), 0.2),
        "ca1_w2": nrm((cint // 4, cint), 0.2),
        "wf_pad": jnp.asarray(wf_pad),                         # (cout,ncls_pad)
        "bf_pad": jnp.asarray(bf_pad),                         # (1,ncls_pad)
        "ncls_pad": ncls_pad,
    }


# -----------------------------------------------------------------------------
# Forward pass (mirrors SNUNet_ECAM.forward control flow).
# -----------------------------------------------------------------------------
def snunet_ecam_forward(params, xA, xB, *, base_channel, depth, num_classes):
    N, cin, H, W = xA.shape
    C = base_channel
    nlev = depth - 1
    cint = 4 * C
    cout = cint * nlev

    # interleave A/B streams -> image order [A0, B0, A1, B1, ...]
    x = jnp.stack([xA, xB], axis=1)                    # (N, 2, cin, H, W)
    x = jnp.transpose(x, (0, 1, 3, 4, 2))              # (N, 2, H, W, cin)
    if cin < C:
        x = jnp.pad(x, ((0, 0), (0, 0), (0, 0), (0, 0), (0, C - cin)))
    x = x.reshape(2 * N * H, W * C)                    # stacked lane-dense LHS

    saved = encoder(x, params, depth=depth, H=H, W=W, C=C, n_img=2 * N)
    # saved: (depth, 2N*H, W*C)

    # layout plumbing (HBM transpose by XLA): build the per-pixel channel-packed
    # epilogue input; per concat group i the 4C columns are
    # [A_{d-1-i}, B_{d-1-i}, A_{d-2-i}, B_{d-2-i}]  (direct, direct, up-in, up-in).
    s = saved.reshape(depth, N, 2, H, W, C)
    groups = []
    for i in range(nlev):
        groups.append(jnp.concatenate(
            [s[depth - 1 - i, :, 0], s[depth - 1 - i, :, 1],
             s[depth - 2 - i, :, 0], s[depth - 2 - i, :, 1]], axis=-1))
    ep_in = jnp.concatenate(groups, axis=-1).reshape(N, H * W, cout)

    y = epilogue(ep_in, params, N=N, HW=H * W, CC=cout, cint=cint, nlev=nlev,
                 ncls_pad=params["ncls_pad"])          # (N, HW, ncls_pad)
    y = y[:, :, :num_classes].reshape(N, H, W, num_classes)
    return jnp.transpose(y, (0, 3, 1, 2))              # NHWC -> NCHW


# -----------------------------------------------------------------------------
if __name__ == "__main__":
    N, IN_CH, H, W = 2, 4, 16, 16
    NUM_CLASSES, BASE, DEPTH = 2, 8, 5

    key = jax.random.PRNGKey(0)
    kp, ka, kb = jax.random.split(key, 3)
    params = init_params(kp, IN_CH, NUM_CLASSES, BASE, DEPTH, H, W)
    xA = jax.random.normal(ka, (N, IN_CH, H, W), jnp.float32)
    xB = jax.random.normal(kb, (N, IN_CH, H, W), jnp.float32)

    fwd = jax.jit(functools.partial(snunet_ecam_forward, params,
                                    base_channel=BASE, depth=DEPTH,
                                    num_classes=NUM_CLASSES))
    y = fwd(xA, xB)
    jax.block_until_ready(y)
    assert y.shape == (N, NUM_CLASSES, H, W) and y.dtype == jnp.float32
    assert bool(jnp.isfinite(y).all())
    print("KERNEL_OK")
</pallas_src>

<mosaic_0001>
module attributes {stable_mosaic.version = 11 : i64} {
  func.func @_encoder_kernel(%arg0: i32, %arg1: memref<32x128xf32, #tpu.memory_space<vmem>>, %arg2: memref<5x2x3x128x128xbf16, #tpu.memory_space<vmem>>, %arg3: memref<5x2x1x128xf32, #tpu.memory_space<vmem>>, %arg4: memref<5x2x1x128xf32, #tpu.memory_space<vmem>>, %arg5: memref<5x32x128xf32, #tpu.memory_space<vmem>>) attributes {dimension_semantics = [#tpu.dimension_semantics<parallel>], iteration_bounds = array<i64: 2>, scalar_prefetch = 0 : i64, scratch_operands = 0 : i64, tpu.core_type = #tpu.core_type<tc>, window_params = [{transform_indices = @transform_0, window_bounds = array<i64: 32, 128>}, {pipeline_mode = #tpu.pipeline_mode<synchronous>, transform_indices = @transform_1, window_bounds = array<i64: 5, 2, 3, 128, 128>}, {pipeline_mode = #tpu.pipeline_mode<synchronous>, transform_indices = @transform_2, window_bounds = array<i64: 5, 2, 1, 128>}, {pipeline_mode = #tpu.pipeline_mode<synchronous>, transform_indices = @transform_3, window_bounds = array<i64: 5, 2, 1, 128>}, {transform_indices = @transform_4, window_bounds = array<i64: 5, 32, 128>}]} {
    %0 = tpu.iota {dimensions = array<i32: 0>} : vector<32x1xi32>
    %c16_i32 = arith.constant 16 : i32
    %c0_i32 = arith.constant 0 : i32
    %1 = arith.cmpi eq, %c16_i32, %c0_i32 : i32
    %c1_i32 = arith.constant 1 : i32
    %2 = arith.select %1, %c1_i32, %c16_i32 : i32
    %3 = vector.broadcast %2 : i32 to vector<32x1xi32>
    %4 = arith.remsi %0, %3 : vector<32x1xi32>
    %c0_i32_0 = arith.constant 0 : i32
    %5 = vector.broadcast %c0_i32_0 : i32 to vector<32x1xi32>
    %6 = arith.cmpi ne, %4, %5 : vector<32x1xi32>
    %c0_i32_1 = arith.constant 0 : i32
    %7 = vector.broadcast %c0_i32_1 : i32 to vector<32x1xi32>
    %8 = arith.cmpi slt, %4, %7 : vector<32x1xi32>
    %c0_i32_2 = arith.constant 0 : i32
    %9 = arith.cmpi slt, %2, %c0_i32_2 : i32
    %10 = vector.broadcast %9 : i1 to vector<32x1xi1>
    %11 = vector.broadcast %10 : vector<32x1xi1> to vector<32x1xi1>
    %12 = arith.xori %8, %11 : vector<32x1xi1>
    %13 = arith.andi %12, %6 : vector<32x1xi1>
    %14 = vector.broadcast %2 : i32 to vector<32x1xi32>
    %15 = arith.addi %4, %14 : vector<32x1xi32>
    %16 = arith.select %13, %15, %4 : vector<32x1xi1>, vector<32x1xi32>
    %c0_i32_3 = arith.constant 0 : i32
    %17 = vector.broadcast %c0_i32_3 : i32 to vector<32x1xi32>
    %18 = arith.cmpi ne, %16, %17 : vector<32x1xi32>
    %19 = arith.extui %18 : vector<32x1xi1> to vector<32x1xi32>
    %20 = arith.sitofp %19 : vector<32x1xi32> to vector<32x1xf32>
    %c16_i32_4 = arith.constant 16 : i32
    %c0_i32_5 = arith.constant 0 : i32
    %21 = arith.cmpi eq, %c16_i32_4, %c0_i32_5 : i32
    %c1_i32_6 = arith.constant 1 : i32
    %22 = arith.select %21, %c1_i32_6, %c16_i32_4 : i32
    %23 = vector.broadcast %22 : i32 to vector<32x1xi32>
    %24 = arith.remsi %0, %23 : vector<32x1xi32>
    %c0_i32_7 = arith.constant 0 : i32
    %25 = vector.broadcast %c0_i32_7 : i32 to vector<32x1xi32>
    %26 = arith.cmpi ne, %24, %25 : vector<32x1xi32>
    %c0_i32_8 = arith.constant 0 : i32
    %27 = vector.broadcast %c0_i32_8 : i32 to vector<32x1xi32>
    %28 = arith.cmpi slt, %24, %27 : vector<32x1xi32>
    %c0_i32_9 = arith.constant 0 : i32
    %29 = arith.cmpi slt, %22, %c0_i32_9 : i32
    %30 = vector.broadcast %29 : i1 to vector<32x1xi1>
    %31 = vector.broadcast %30 : vector<32x1xi1> to vector<32x1xi1>
    %32 = arith.xori %28, %31 : vector<32x1xi1>
    %33 = arith.andi %32, %26 : vector<32x1xi1>
    %34 = vector.broadcast %22 : i32 to vector<32x1xi32>
    %35 = arith.addi %24, %34 : vector<32x1xi32>
    %36 = arith.select %33, %35, %24 : vector<32x1xi1>, vector<32x1xi32>
    %c15_i32 = arith.constant 15 : i32
    %37 = vector.broadcast %c15_i32 : i32 to vector<32x1xi32>
    %38 = arith.cmpi ne, %36, %37 : vector<32x1xi32>
    %39 = arith.extui %38 : vector<32x1xi1> to vector<32x1xi32>
    %40 = arith.sitofp %39 : vector<32x1xi32> to vector<32x1xf32>
    %c0 = arith.constant 0 : index
    %c0_10 = arith.constant 0 : index
    %41 = vector.load %arg1[%c0, %c0_10] : memref<32x128xf32, #tpu.memory_space<vmem>>, vector<32x128xf32>
    %42 = arith.truncf %41 : vector<32x128xf32> to vector<32x128xbf16>
    %c0_11 = arith.constant 0 : index
    %c0_12 = arith.constant 0 : index
    %c0_13 = arith.constant 0 : index
    %c0_14 = arith.constant 0 : index
    %c0_15 = arith.constant 0 : index
    %43 = vector.load %arg2[%c0_11, %c0_12, %c0_13, %c0_14, %c0_15] : memref<5x2x3x128x128xbf16, #tpu.memory_space<vmem>>, vector<1x1x1x128x128xbf16>
    %44 = vector.shape_cast %43 : vector<1x1x1x128x128xbf16> to vector<128x128xbf16>
    %cst = arith.constant dense<0.000000e+00> : vector<32x128xf32>
    %45 = tpu.matmul %42, %44, %cst {dimension_numbers = #tpu.dot_dimension_numbers<[1], [0], [0], [1], [0, 0, 1, 1], [], []>} : vector<32x128xbf16>, vector<128x128xbf16>, vector<32x128xf32> -> vector<32x128xf32>
    %c0_16 = arith.constant 0 : index
    %c0_17 = arith.constant 0 : index
    %c1 = arith.constant 1 : index
    %c0_18 = arith.constant 0 : index
    %c0_19 = arith.constant 0 : index
    %46 = vector.load %arg2[%c0_16, %c0_17, %c1, %c0_18, %c0_19] : memref<5x2x3x128x128xbf16, #tpu.memory_space<vmem>>, vector<1x1x1x128x128xbf16>
    %47 = vector.shape_cast %46 : vector<1x1x1x128x128xbf16> to vector<128x128xbf16>
    %cst_20 = arith.constant dense<0.000000e+00> : vector<32x128xf32>
    %48 = tpu.matmul %42, %47, %cst_20 {dimension_numbers = #tpu.dot_dimension_numbers<[1], [0], [0], [1], [0, 0, 1, 1], [], []>} : vector<32x128xbf16>, vector<128x128xbf16>, vector<32x128xf32> -> vector<32x128xf32>
    %c0_21 = arith.constant 0 : index
    %c0_22 = arith.constant 0 : index
    %c2 = arith.constant 2 : index
    %c0_23 = arith.constant 0 : index
    %c0_24 = arith.constant 0 : index
    %49 = vector.load %arg2[%c0_21, %c0_22, %c2, %c0_23, %c0_24] : memref<5x2x3x128x128xbf16, #tpu.memory_space<vmem>>, vector<1x1x1x128x128xbf16>
    %50 = vector.shape_cast %49 : vector<1x1x1x128x128xbf16> to vector<128x128xbf16>
    %cst_25 = arith.constant dense<0.000000e+00> : vector<32x128xf32>
    %51 = tpu.matmul %42, %50, %cst_25 {dimension_numbers = #tpu.dot_dimension_numbers<[1], [0], [0], [1], [0, 0, 1, 1], [], []>} : vector<32x128xbf16>, vector<128x128xbf16>, vector<32x128xf32> -> vector<32x128xf32>
    %c1_i32_26 = arith.constant 1 : i32
    %52 = tpu.dynamic_rotate %45 by %c1_i32_26 dim 0 : vector<32x128xf32>, i32 -> vector<32x128xf32>
    %53 = vector.broadcast %20 : vector<32x1xf32> to vector<32x128xf32>
    %54 = arith.mulf %52, %53 : vector<32x128xf32>
    %55 = arith.addf %54, %48 : vector<32x128xf32>
    %c31_i32 = arith.constant 31 : i32
    %56 = tpu.dynamic_rotate %51 by %c31_i32 dim 0 : vector<32x128xf32>, i32 -> vector<32x128xf32>
    %57 = vector.broadcast %40 : vector<32x1xf32> to vector<32x128xf32>
    %58 = arith.mulf %56, %57 : vector<32x128xf32>
    %59 = arith.addf %55, %58 : vector<32x128xf32>
    %c0_27 = arith.constant 0 : index
    %c0_28 = arith.constant 0 : index
    %c0_29 = arith.constant 0 : index
    %c0_30 = arith.constant 0 : index
    %60 = vector.load %arg3[%c0_27, %c0_28, %c0_29, %c0_30] : memref<5x2x1x128xf32, #tpu.memory_space<vmem>>, vector<1x1x1x128xf32>
    %61 = vector.shape_cast %60 : vector<1x1x1x128xf32> to vector<1x128xf32>
    %62 = vector.broadcast %61 : vector<1x128xf32> to vector<32x128xf32>
    %63 = arith.mulf %59, %62 : vector<32x128xf32>
    %c0_31 = arith.constant 0 : index
    %c0_32 = arith.constant 0 : index
    %c0_33 = arith.constant 0 : index
    %c0_34 = arith.constant 0 : index
    %64 = vector.load %arg4[%c0_31, %c0_32, %c0_33, %c0_34] : memref<5x2x1x128xf32, #tpu.memory_space<vmem>>, vector<1x1x1x128xf32>
    %65 = vector.shape_cast %64 : vector<1x1x1x128xf32> to vector<1x128xf32>
    %66 = vector.broadcast %65 : vector<1x128xf32> to vector<32x128xf32>
    %67 = arith.addf %63, %66 : vector<32x128xf32>
    %cst_35 = arith.constant 0.000000e+00 : f32
    %68 = vector.broadcast %cst_35 : f32 to vector<32x128xf32>
    %69 = arith.maximumf %67, %68 : vector<32x128xf32>
    %70 = arith.truncf %69 : vector<32x128xf32> to vector<32x128xbf16>
    %c0_36 = arith.constant 0 : index
    %c1_37 = arith.constant 1 : index
    %c0_38 = arith.constant 0 : index
    %c0_39 = arith.constant 0 : index
    %c0_40 = arith.constant 0 : index
    %71 = vector.load %arg2[%c0_36, %c1_37, %c0_38, %c0_39, %c0_40] : memref<5x2x3x128x128xbf16, #tpu.memory_space<vmem>>, vector<1x1x1x128x128xbf16>
    %72 = vector.shape_cast %71 : vector<1x1x1x128x128xbf16> to vector<128x128xbf16>
    %cst_41 = arith.constant dense<0.000000e+00> : vector<32x128xf32>
    %73 = tpu.matmul %70, %72, %cst_41 {dimension_numbers = #tpu.dot_dimension_numbers<[1], [0], [0], [1], [0, 0, 1, 1], [], []>} : vector<32x128xbf16>, vector<128x128xbf16>, vector<32x128xf32> -> vector<32x128xf32>
    %c0_42 = arith.constant 0 : index
    %c1_43 = arith.constant 1 : index
    %c1_44 = arith.constant 1 : index
    %c0_45 = arith.constant 0 : index
    %c0_46 = arith.constant 0 : index
    %74 = vector.load %arg2[%c0_42, %c1_43, %c1_44, %c0_45, %c0_46] : memref<5x2x3x128x128xbf16, #tpu.memory_space<vmem>>, vector<1x1x1x128x128xbf16>
    %75 = vector.shape_cast %74 : vector<1x1x1x128x128xbf16> to vector<128x128xbf16>
    %cst_47 = arith.constant dense<0.000000e+00> : vector<32x128xf32>
    %76 = tpu.matmul %70, %75, %cst_47 {dimension_numbers = #tpu.dot_dimension_numbers<[1], [0], [0], [1], [0, 0, 1, 1], [], []>} : vector<32x128xbf16>, vector<128x128xbf16>, vector<32x128xf32> -> vector<32x128xf32>
    %c0_48 = arith.constant 0 : index
    %c1_49 = arith.constant 1 : index
    %c2_50 = arith.constant 2 : index
    %c0_51 = arith.constant 0 : index
    %c0_52 = arith.constant 0 : index
    %77 = vector.load %arg2[%c0_48, %c1_49, %c2_50, %c0_51, %c0_52] : memref<5x2x3x128x128xbf16, #tpu.memory_space<vmem>>, vector<1x1x1x128x128xbf16>
    %78 = vector.shape_cast %77 : vector<1x1x1x128x128xbf16> to vector<128x128xbf16>
    %cst_53 = arith.constant dense<0.000000e+00> : vector<32x128xf32>
    %79 = tpu.matmul %70, %78, %cst_53 {dimension_numbers = #tpu.dot_dimension_numbers<[1], [0], [0], [1], [0, 0, 1, 1], [], []>} : vector<32x128xbf16>, vector<128x128xbf16>, vector<32x128xf32> -> vector<32x128xf32>
    %c1_i32_54 = arith.constant 1 : i32
    %80 = tpu.dynamic_rotate %73 by %c1_i32_54 dim 0 : vector<32x128xf32>, i32 -> vector<32x128xf32>
    %81 = vector.broadcast %20 : vector<32x1xf32> to vector<32x128xf32>
    %82 = arith.mulf %80, %81 : vector<32x128xf32>
    %83 = arith.addf %82, %76 : vector<32x128xf32>
    %c31_i32_55 = arith.constant 31 : i32
    %84 = tpu.dynamic_rotate %79 by %c31_i32_55 dim 0 : vector<32x128xf32>, i32 -> vector<32x128xf32>
    %85 = vector.broadcast %40 : vector<32x1xf32> to vector<32x128xf32>
    %86 = arith.mulf %84, %85 : vector<32x128xf32>
    %87 = arith.addf %83, %86 : vector<32x128xf32>
    %c0_56 = arith.constant 0 : index
    %c1_57 = arith.constant 1 : index
    %c0_58 = arith.constant 0 : index
    %c0_59 = arith.constant 0 : index
    %88 = vector.load %arg3[%c0_56, %c1_57, %c0_58, %c0_59] : memref<5x2x1x128xf32, #tpu.memory_space<vmem>>, vector<1x1x1x128xf32>
    %89 = vector.shape_cast %88 : vector<1x1x1x128xf32> to vector<1x128xf32>
    %90 = vector.broadcast %89 : vector<1x128xf32> to vector<32x128xf32>
    %91 = arith.mulf %87, %90 : vector<32x128xf32>
    %c0_60 = arith.constant 0 : index
    %c1_61 = arith.constant 1 : index
    %c0_62 = arith.constant 0 : index
    %c0_63 = arith.constant 0 : index
    %92 = vector.load %arg4[%c0_60, %c1_61, %c0_62, %c0_63] : memref<5x2x1x128xf32, #tpu.memory_space<vmem>>, vector<1x1x1x128xf32>
    %93 = vector.shape_cast %92 : vector<1x1x1x128xf32> to vector<1x128xf32>
    %94 = vector.broadcast %93 : vector<1x128xf32> to vector<32x128xf32>
    %95 = arith.addf %91, %94 : vector<32x128xf32>
    %96 = arith.addf %95, %69 : vector<32x128xf32>
    %cst_64 = arith.constant 0.000000e+00 : f32
    %97 = vector.broadcast %cst_64 : f32 to vector<32x128xf32>
    %98 = arith.maximumf %96, %97 : vector<32x128xf32>
    %c0_65 = arith.constant 0 : index
    %c0_66 = arith.constant 0 : index
    %c0_67 = arith.constant 0 : index
    %99 = vector.load %arg5[%c0_65, %c0_66, %c0_67] : memref<5x32x128xf32, #tpu.memory_space<vmem>>, vector<1x32x128xf32>
    %100 = vector.shape_cast %99 : vector<1x32x128xf32> to vector<32x128xf32>
    %101 = vector.shape_cast %98 : vector<32x128xf32> to vector<1x32x128xf32>
    tpu.vector_store %arg5[%c0_65, %c0_66, %c0_67], %101 {strides = array<i32>} : memref<5x32x128xf32, #tpu.memory_space<vmem>>, vector<1x32x128xf32>,
    %102 = arith.truncf %98 : vector<32x128xf32> to vector<32x128xbf16>
    %c1_68 = arith.constant 1 : index
    %c0_69 = arith.constant 0 : index
    %c0_70 = arith.constant 0 : index
    %c0_71 = arith.constant 0 : index
    %c0_72 = arith.constant 0 : index
    %103 = vector.load %arg2[%c1_68, %c0_69, %c0_70, %c0_71, %c0_72] : memref<5x2x3x128x128xbf16, #tpu.memory_space<vmem>>, vector<1x1x1x128x128xbf16>
    %104 = vector.shape_cast %103 : vector<1x1x1x128x128xbf16> to vector<128x128xbf16>
    %cst_73 = arith.constant dense<0.000000e+00> : vector<32x128xf32>
    %105 = tpu.matmul %102, %104, %cst_73 {dimension_numbers = #tpu.dot_dimension_numbers<[1], [0], [0], [1], [0, 0, 1, 1], [], []>} : vector<32x128xbf16>, vector<128x128xbf16>, vector<32x128xf32> -> vector<32x128xf32>
    %c1_74 = arith.constant 1 : index
    %c0_75 = arith.constant 0 : index
    %c1_76 = arith.constant 1 : index
    %c0_77 = arith.constant 0 : index
    %c0_78 = arith.constant 0 : index
    %106 = vector.load %arg2[%c1_74, %c0_75, %c1_76, %c0_77, %c0_78] : memref<5x2x3x128x128xbf16, #tpu.memory_space<vmem>>, vector<1x1x1x128x128xbf16>
    %107 = vector.shape_cast %106 : vector<1x1x1x128x128xbf16> to vector<128x128xbf16>
    %cst_79 = arith.constant dense<0.000000e+00> : vector<32x128xf32>
    %108 = tpu.matmul %102, %107, %cst_79 {dimension_numbers = #tpu.dot_dimension_numbers<[1], [0], [0], [1], [0, 0, 1, 1], [], []>} : vector<32x128xbf16>, vector<128x128xbf16>, vector<32x128xf32> -> vector<32x128xf32>
    %c1_80 = arith.constant 1 : index
    %c0_81 = arith.constant 0 : index
    %c2_82 = arith.constant 2 : index
    %c0_83 = arith.constant 0 : index
    %c0_84 = arith.constant 0 : index
    %109 = vector.load %arg2[%c1_80, %c0_81, %c2_82, %c0_83, %c0_84] : memref<5x2x3x128x128xbf16, #tpu.memory_space<vmem>>, vector<1x1x1x128x128xbf16>
    %110 = vector.shape_cast %109 : vector<1x1x1x128x128xbf16> to vector<128x128xbf16>
    %cst_85 = arith.constant dense<0.000000e+00> : vector<32x128xf32>
    %111 = tpu.matmul %102, %110, %cst_85 {dimension_numbers = #tpu.dot_dimension_numbers<[1], [0], [0], [1], [0, 0, 1, 1], [], []>} : vector<32x128xbf16>, vector<128x128xbf16>, vector<32x128xf32> -> vector<32x128xf32>
    %c1_i32_86 = arith.constant 1 : i32
    %112 = tpu.dynamic_rotate %105 by %c1_i32_86 dim 0 : vector<32x128xf32>, i32 -> vector<32x128xf32>
    %113 = vector.broadcast %20 : vector<32x1xf32> to vector<32x128xf32>
    %114 = arith.mulf %112, %113 : vector<32x128xf32>
    %115 = arith.addf %114, %108 : vector<32x128xf32>
    %c31_i32_87 = arith.constant 31 : i32
    %116 = tpu.dynamic_rotate %111 by %c31_i32_87 dim 0 : vector<32x128xf32>, i32 -> vector<32x128xf32>
    %117 = vector.broadcast %40 : vector<32x1xf32> to vector<32x128xf32>
    %118 = arith.mulf %116, %117 : vector<32x128xf32>
    %119 = arith.addf %115, %118 : vector<32x128xf32>
    %c1_88 = arith.constant 1 : index
    %c0_89 = arith.constant 0 : index
    %c0_90 = arith.constant 0 : index
    %c0_91 = arith.constant 0 : index
    %120 = vector.load %arg3[%c1_88, %c0_89, %c0_90, %c0_91] : memref<5x2x1x128xf32, #tpu.memory_space<vmem>>, vector<1x1x1x128xf32>
    %121 = vector.shape_cast %120 : vector<1x1x1x128xf32> to vector<1x128xf32>
    %122 = vector.broadcast %121 : vector<1x128xf32> to vector<32x128xf32>
    %123 = arith.mulf %119, %122 : vector<32x128xf32>
    %c1_92 = arith.constant 1 : index
    %c0_93 = arith.constant 0 : index
    %c0_94 = arith.constant 0 : index
    %c0_95 = arith.constant 0 : index
    %124 = vector.load %arg4[%c1_92, %c0_93, %c0_94, %c0_95] : memref<5x2x1x128xf32, #tpu.memory_space<vmem>>, vector<1x1x1x128xf32>
    %125 = vector.shape_cast %124 : vector<1x1x1x128xf32> to vector<1x128xf32>
    %126 = vector.broadcast %125 : vector<1x128xf32> to vector<32x128xf32>
    %127 = arith.addf %123, %126 : vector<32x128xf32>
    %cst_96 = arith.constant 0.000000e+00 : f32
    %128 = vector.broadcast %cst_96 : f32 to vector<32x128xf32>
    %129 = arith.maximumf %127, %128 : vector<32x128xf32>
    %130 = arith.truncf %129 : vector<32x128xf32> to vector<32x128xbf16>
    %c1_97 = arith.constant 1 : index
    %c1_98 = arith.constant 1 : index
    %c0_99 = arith.constant 0 : index
    %c0_100 = arith.constant 0 : index
    %c0_101 = arith.constant 0 : index
    %131 = vector.load %arg2[%c1_97, %c1_98, %c0_99, %c0_100, %c0_101] : memref<5x2x3x128x128xbf16, #tpu.memory_space<vmem>>, vector<1x1x1x128x128xbf16>
    %132 = vector.shape_cast %131 : vector<1x1x1x128x128xbf16> to vector<128x128xbf16>
    %cst_102 = arith.constant dense<0.000000e+00> : vector<32x128xf32>
    %133 = tpu.matmul %130, %132, %cst_102 {dimension_numbers = #tpu.dot_dimension_numbers<[1], [0], [0], [1], [0, 0, 1, 1], [], []>} : vector<32x128xbf16>, vector<128x128xbf16>, vector<32x128xf32> -> vector<32x128xf32>
    %c1_103 = arith.constant 1 : index
    %c1_104 = arith.constant 1 : index
    %c1_105 = arith.constant 1 : index
    %c0_106 = arith.constant 0 : index
    %c0_107 = arith.constant 0 : index
    %134 = vector.load %arg2[%c1_103, %c1_104, %c1_105, %c0_106, %c0_107] : memref<5x2x3x128x128xbf16, #tpu.memory_space<vmem>>, vector<1x1x1x128x128xbf16>
    %135 = vector.shape_cast %134 : vector<1x1x1x128x128xbf16> to vector<128x128xbf16>
    %cst_108 = arith.constant dense<0.000000e+00> : vector<32x128xf32>
    %136 = tpu.matmul %130, %135, %cst_108 {dimension_numbers = #tpu.dot_dimension_numbers<[1], [0], [0], [1], [0, 0, 1, 1], [], []>} : vector<32x128xbf16>, vector<128x128xbf16>, vector<32x128xf32> -> vector<32x128xf32>
    %c1_109 = arith.constant 1 : index
    %c1_110 = arith.constant 1 : index
    %c2_111 = arith.constant 2 : index
    %c0_112 = arith.constant 0 : index
    %c0_113 = arith.constant 0 : index
    %137 = vector.load %arg2[%c1_109, %c1_110, %c2_111, %c0_112, %c0_113] : memref<5x2x3x128x128xbf16, #tpu.memory_space<vmem>>, vector<1x1x1x128x128xbf16>
    %138 = vector.shape_cast %137 : vector<1x1x1x128x128xbf16> to vector<128x128xbf16>
    %cst_114 = arith.constant dense<0.000000e+00> : vector<32x128xf32>
    %139 = tpu.matmul %130, %138, %cst_114 {dimension_numbers = #tpu.dot_dimension_numbers<[1], [0], [0], [1], [0, 0, 1, 1], [], []>} : vector<32x128xbf16>, vector<128x128xbf16>, vector<32x128xf32> -> vector<32x128xf32>
    %c1_i32_115 = arith.constant 1 : i32
    %140 = tpu.dynamic_rotate %133 by %c1_i32_115 dim 0 : vector<32x128xf32>, i32 -> vector<32x128xf32>
    %141 = vector.broadcast %20 : vector<32x1xf32> to vector<32x128xf32>
    %142 = arith.mulf %140, %141 : vector<32x128xf32>
    %143 = arith.addf %142, %136 : vector<32x128xf32>
    %c31_i32_116 = arith.constant 31 : i32
    %144 = tpu.dynamic_rotate %139 by %c31_i32_116 dim 0 : vector<32x128xf32>, i32 -> vector<32x128xf32>
    %145 = vector.broadcast %40 : vector<32x1xf32> to vector<32x128xf32>
    %146 = arith.mulf %144, %145 : vector<32x128xf32>
    %147 = arith.addf %143, %146 : vector<32x128xf32>
    %c1_117 = arith.constant 1 : index
    %c1_118 = arith.constant 1 : index
    %c0_119 = arith.constant 0 : index
    %c0_120 = arith.constant 0 : index
    %148 = vector.load %arg3[%c1_117, %c1_118, %c0_119, %c0_120] : memref<5x2x1x128xf32, #tpu.memory_space<vmem>>, vector<1x1x1x128xf32>
    %149 = vector.shape_cast %148 : vector<1x1x1x128xf32> to vector<1x128xf32>
    %150 = vector.broadcast %149 : vector<1x128xf32> to vector<32x128xf32>
    %151 = arith.mulf %147, %150 : vector<32x128xf32>
    %c1_121 = arith.constant 1 : index
    %c1_122 = arith.constant 1 : index
    %c0_123 = arith.constant 0 : index
    %c0_124 = arith.constant 0 : index
    %152 = vector.load %arg4[%c1_121, %c1_122, %c0_123, %c0_124] : memref<5x2x1x128xf32, #tpu.memory_space<vmem>>, vector<1x1x1x128xf32>
    %153 = vector.shape_cast %152 : vector<1x1x1x128xf32> to vector<1x128xf32>
    %154 = vector.broadcast %153 : vector<1x128xf32> to vector<32x128xf32>
    %155 = arith.addf %151, %154 : vector<32x128xf32>
    %156 = arith.addf %155, %129 : vector<32x128xf32>
    %cst_125 = arith.constant 0.000000e+00 : f32
    %157 = vector.broadcast %cst_125 : f32 to vector<32x128xf32>
    %158 = arith.maximumf %156, %157 : vector<32x128xf32>
    %c1_126 = arith.constant 1 : index
    %c0_127 = arith.constant 0 : index
    %c0_128 = arith.constant 0 : index
    %159 = vector.load %arg5[%c1_126, %c0_127, %c0_128] : memref<5x32x128xf32, #tpu.memory_space<vmem>>, vector<1x32x128xf32>
    %160 = vector.shape_cast %159 : vector<1x32x128xf32> to vector<32x128xf32>
    %161 = vector.shape_cast %158 : vector<32x128xf32> to vector<1x32x128xf32>
    tpu.vector_store %arg5[%c1_126, %c0_127, %c0_128], %161 {strides = array<i32>} : memref<5x32x128xf32, #tpu.memory_space<vmem>>, vector<1x32x128xf32>,
    %162 = arith.truncf %158 : vector<32x128xf32> to vector<32x128xbf16>
    %c2_129 = arith.constant 2 : index
    %c0_130 = arith.constant 0 : index
    %c0_131 = arith.constant 0 : index
    %c0_132 = arith.constant 0 : index
    %c0_133 = arith.constant 0 : index
    %163 = vector.load %arg2[%c2_129, %c0_130, %c0_131, %c0_132, %c0_133] : memref<5x2x3x128x128xbf16, #tpu.memory_space<vmem>>, vector<1x1x1x128x128xbf16>
    %164 = vector.shape_cast %163 : vector<1x1x1x128x128xbf16> to vector<128x128xbf16>
    %cst_134 = arith.constant dense<0.000000e+00> : vector<32x128xf32>
    %165 = tpu.matmul %162, %164, %cst_134 {dimension_numbers = #tpu.dot_dimension_numbers<[1], [0], [0], [1], [0, 0, 1, 1], [], []>} : vector<32x128xbf16>, vector<128x128xbf16>, vector<32x128xf32> -> vector<32x128xf32>
    %c2_135 = arith.constant 2 : index
    %c0_136 = arith.constant 0 : index
    %c1_137 = arith.constant 1 : index
    %c0_138 = arith.constant 0 : index
    %c0_139 = arith.constant 0 : index
    %166 = vector.load %arg2[%c2_135, %c0_136, %c1_137, %c0_138, %c0_139] : memref<5x2x3x128x128xbf16, #tpu.memory_space<vmem>>, vector<1x1x1x128x128xbf16>
    %167 = vector.shape_cast %166 : vector<1x1x1x128x128xbf16> to vector<128x128xbf16>
    %cst_140 = arith.constant dense<0.000000e+00> : vector<32x128xf32>
    %168 = tpu.matmul %162, %167, %cst_140 {dimension_numbers = #tpu.dot_dimension_numbers<[1], [0], [0], [1], [0, 0, 1, 1], [], []>} : vector<32x128xbf16>, vector<128x128xbf16>, vector<32x128xf32> -> vector<32x128xf32>
    %c2_141 = arith.constant 2 : index
    %c0_142 = arith.constant 0 : index
    %c2_143 = arith.constant 2 : index
    %c0_144 = arith.constant 0 : index
    %c0_145 = arith.constant 0 : index
    %169 = vector.load %arg2[%c2_141, %c0_142, %c2_143, %c0_144, %c0_145] : memref<5x2x3x128x128xbf16, #tpu.memory_space<vmem>>, vector<1x1x1x128x128xbf16>
    %170 = vector.shape_cast %169 : vector<1x1x1x128x128xbf16> to vector<128x128xbf16>
    %cst_146 = arith.constant dense<0.000000e+00> : vector<32x128xf32>
    %171 = tpu.matmul %162, %170, %cst_146 {dimension_numbers = #tpu.dot_dimension_numbers<[1], [0], [0], [1], [0, 0, 1, 1], [], []>} : vector<32x128xbf16>, vector<128x128xbf16>, vector<32x128xf32> -> vector<32x128xf32>
    %c1_i32_147 = arith.constant 1 : i32
    %172 = tpu.dynamic_rotate %165 by %c1_i32_147 dim 0 : vector<32x128xf32>, i32 -> vector<32x128xf32>
    %173 = vector.broadcast %20 : vector<32x1xf32> to vector<32x128xf32>
    %174 = arith.mulf %172, %173 : vector<32x128xf32>
    %175 = arith.addf %174, %168 : vector<32x128xf32>
    %c31_i32_148 = arith.constant 31 : i32
    %176 = tpu.dynamic_rotate %171 by %c31_i32_148 dim 0 : vector<32x128xf32>, i32 -> vector<32x128xf32>
    %177 = vector.broadcast %40 : vector<32x1xf32> to vector<32x128xf32>
    %178 = arith.mulf %176, %177 : vector<32x128xf32>
    %179 = arith.addf %175, %178 : vector<32x128xf32>
    %c2_149 = arith.constant 2 : index
    %c0_150 = arith.constant 0 : index
    %c0_151 = arith.constant 0 : index
    %c0_152 = arith.constant 0 : index
    %180 = vector.load %arg3[%c2_149, %c0_150, %c0_151, %c0_152] : memref<5x2x1x128xf32, #tpu.memory_space<vmem>>, vector<1x1x1x128xf32>
    %181 = vector.shape_cast %180 : vector<1x1x1x128xf32> to vector<1x128xf32>
    %182 = vector.broadcast %181 : vector<1x128xf32> to vector<32x128xf32>
    %183 = arith.mulf %179, %182 : vector<32x128xf32>
    %c2_153 = arith.constant 2 : index
    %c0_154 = arith.constant 0 : index
    %c0_155 = arith.constant 0 : index
    %c0_156 = arith.constant 0 : index
    %184 = vector.load %arg4[%c2_153, %c0_154, %c0_155, %c0_156] : memref<5x2x1x128xf32, #tpu.memory_space<vmem>>, vector<1x1x1x128xf32>
    %185 = vector.shape_cast %184 : vector<1x1x1x128xf32> to vector<1x128xf32>
    %186 = vector.broadcast %185 : vector<1x128xf32> to vector<32x128xf32>
    %187 = arith.addf %183, %186 : vector<32x128xf32>
    %cst_157 = arith.constant 0.000000e+00 : f32
    %188 = vector.broadcast %cst_157 : f32 to vector<32x128xf32>
    %189 = arith.maximumf %187, %188 : vector<32x128xf32>
    %190 = arith.truncf %189 : vector<32x128xf32> to vector<32x128xbf16>
    %c2_158 = arith.constant 2 : index
    %c1_159 = arith.constant 1 : index
    %c0_160 = arith.constant 0 : index
    %c0_161 = arith.constant 0 : index
    %c0_162 = arith.constant 0 : index
    %191 = vector.load %arg2[%c2_158, %c1_159, %c0_160, %c0_161, %c0_162] : memref<5x2x3x128x128xbf16, #tpu.memory_space<vmem>>, vector<1x1x1x128x128xbf16>
    %192 = vector.shape_cast %191 : vector<1x1x1x128x128xbf16> to vector<128x128xbf16>
    %cst_163 = arith.constant dense<0.000000e+00> : vector<32x128xf32>
    %193 = tpu.matmul %190, %192, %cst_163 {dimension_numbers = #tpu.dot_dimension_numbers<[1], [0], [0], [1], [0, 0, 1, 1], [], []>} : vector<32x128xbf16>, vector<128x128xbf16>, vector<32x128xf32> -> vector<32x128xf32>
    %c2_164 = arith.constant 2 : index
    %c1_165 = arith.constant 1 : index
    %c1_166 = arith.constant 1 : index
    %c0_167 = arith.constant 0 : index
    %c0_168 = arith.constant 0 : index
    %194 = vector.load %arg2[%c2_164, %c1_165, %c1_166, %c0_167, %c0_168] : memref<5x2x3x128x128xbf16, #tpu.memory_space<vmem>>, vector<1x1x1x128x128xbf16>
    %195 = vector.shape_cast %194 : vector<1x1x1x128x128xbf16> to vector<128x128xbf16>
    %cst_169 = arith.constant dense<0.000000e+00> : vector<32x128xf32>
    %196 = tpu.matmul %190, %195, %cst_169 {dimension_numbers = #tpu.dot_dimension_numbers<[1], [0], [0], [1], [0, 0, 1, 1], [], []>} : vector<32x128xbf16>, vector<128x128xbf16>, vector<32x128xf32> -> vector<32x128xf32>
    %c2_170 = arith.constant 2 : index
    %c1_171 = arith.constant 1 : index
    %c2_172 = arith.constant 2 : index
    %c0_173 = arith.constant 0 : index
    %c0_174 = arith.constant 0 : index
    %197 = vector.load %arg2[%c2_170, %c1_171, %c2_172, %c0_173, %c0_174] : memref<5x2x3x128x128xbf16, #tpu.memory_space<vmem>>, vector<1x1x1x128x128xbf16>
    %198 = vector.shape_cast %197 : vector<1x1x1x128x128xbf16> to vector<128x128xbf16>
    %cst_175 = arith.constant dense<0.000000e+00> : vector<32x128xf32>
    %199 = tpu.matmul %190, %198, %cst_175 {dimension_numbers = #tpu.dot_dimension_numbers<[1], [0], [0], [1], [0, 0, 1, 1], [], []>} : vector<32x128xbf16>, vector<128x128xbf16>, vector<32x128xf32> -> vector<32x128xf32>
    %c1_i32_176 = arith.constant 1 : i32
    %200 = tpu.dynamic_rotate %193 by %c1_i32_176 dim 0 : vector<32x128xf32>, i32 -> vector<32x128xf32>
    %201 = vector.broadcast %20 : vector<32x1xf32> to vector<32x128xf32>
    %202 = arith.mulf %200, %201 : vector<32x128xf32>
    %203 = arith.addf %202, %196 : vector<32x128xf32>
    %c31_i32_177 = arith.constant 31 : i32
    %204 = tpu.dynamic_rotate %199 by %c31_i32_177 dim 0 : vector<32x128xf32>, i32 -> vector<32x128xf32>
    %205 = vector.broadcast %40 : vector<32x1xf32> to vector<32x128xf32>
    %206 = arith.mulf %204, %205 : vector<32x128xf32>
    %207 = arith.addf %203, %206 : vector<32x128xf32>
    %c2_178 = arith.constant 2 : index
    %c1_179 = arith.constant 1 : index
    %c0_180 = arith.constant 0 : index
    %c0_181 = arith.constant 0 : index
    %208 = vector.load %arg3[%c2_178, %c1_179, %c0_180, %c0_181] : memref<5x2x1x128xf32, #tpu.memory_space<vmem>>, vector<1x1x1x128xf32>
    %209 = vector.shape_cast %208 : vector<1x1x1x128xf32> to vector<1x128xf32>
    %210 = vector.broadcast %209 : vector<1x128xf32> to vector<32x128xf32>
    %211 = arith.mulf %207, %210 : vector<32x128xf32>
    %c2_182 = arith.constant 2 : index
    %c1_183 = arith.constant 1 : index
    %c0_184 = arith.constant 0 : index
    %c0_185 = arith.constant 0 : index
    %212 = vector.load %arg4[%c2_182, %c1_183, %c0_184, %c0_185] : memref<5x2x1x128xf32, #tpu.memory_space<vmem>>, vector<1x1x1x128xf32>
    %213 = vector.shape_cast %212 : vector<1x1x1x128xf32> to vector<1x128xf32>
    %214 = vector.broadcast %213 : vector<1x128xf32> to vector<32x128xf32>
    %215 = arith.addf %211, %214 : vector<32x128xf32>
    %216 = arith.addf %215, %189 : vector<32x128xf32>
    %cst_186 = arith.constant 0.000000e+00 : f32
    %217 = vector.broadcast %cst_186 : f32 to vector<32x128xf32>
    %218 = arith.maximumf %216, %217 : vector<32x128xf32>
    %c2_187 = arith.constant 2 : index
    %c0_188 = arith.constant 0 : index
    %c0_189 = arith.constant 0 : index
    %219 = vector.load %arg5[%c2_187, %c0_188, %c0_189] : memref<5x32x128xf32, #tpu.memory_space<vmem>>, vector<1x32x128xf32>
    %220 = vector.shape_cast %219 : vector<1x32x128xf32> to vector<32x128xf32>
    %221 = vector.shape_cast %218 : vector<32x128xf32> to vector<1x32x128xf32>
    tpu.vector_store %arg5[%c2_187, %c0_188, %c0_189], %221 {strides = array<i32>} : memref<5x32x128xf32, #tpu.memory_space<vmem>>, vector<1x32x128xf32>,
    %222 = arith.truncf %218 : vector<32x128xf32> to vector<32x128xbf16>
    %c3 = arith.constant 3 : index
    %c0_190 = arith.constant 0 : index
    %c0_191 = arith.constant 0 : index
    %c0_192 = arith.constant 0 : index
    %c0_193 = arith.constant 0 : index
    %223 = vector.load %arg2[%c3, %c0_190, %c0_191, %c0_192, %c0_193] : memref<5x2x3x128x128xbf16, #tpu.memory_space<vmem>>, vector<1x1x1x128x128xbf16>
    %224 = vector.shape_cast %223 : vector<1x1x1x128x128xbf16> to vector<128x128xbf16>
    %cst_194 = arith.constant dense<0.000000e+00> : vector<32x128xf32>
    %225 = tpu.matmul %222, %224, %cst_194 {dimension_numbers = #tpu.dot_dimension_numbers<[1], [0], [0], [1], [0, 0, 1, 1], [], []>} : vector<32x128xbf16>, vector<128x128xbf16>, vector<32x128xf32> -> vector<32x128xf32>
    %c3_195 = arith.constant 3 : index
    %c0_196 = arith.constant 0 : index
    %c1_197 = arith.constant 1 : index
    %c0_198 = arith.constant 0 : index
    %c0_199 = arith.constant 0 : index
    %226 = vector.load %arg2[%c3_195, %c0_196, %c1_197, %c0_198, %c0_199] : memref<5x2x3x128x128xbf16, #tpu.memory_space<vmem>>, vector<1x1x1x128x128xbf16>
    %227 = vector.shape_cast %226 : vector<1x1x1x128x128xbf16> to vector<128x128xbf16>
    %cst_200 = arith.constant dense<0.000000e+00> : vector<32x128xf32>
    %228 = tpu.matmul %222, %227, %cst_200 {dimension_numbers = #tpu.dot_dimension_numbers<[1], [0], [0], [1], [0, 0, 1, 1], [], []>} : vector<32x128xbf16>, vector<128x128xbf16>, vector<32x128xf32> -> vector<32x128xf32>
    %c3_201 = arith.constant 3 : index
    %c0_202 = arith.constant 0 : index
    %c2_203 = arith.constant 2 : index
    %c0_204 = arith.constant 0 : index
    %c0_205 = arith.constant 0 : index
    %229 = vector.load %arg2[%c3_201, %c0_202, %c2_203, %c0_204, %c0_205] : memref<5x2x3x128x128xbf16, #tpu.memory_space<vmem>>, vector<1x1x1x128x128xbf16>
    %230 = vector.shape_cast %229 : vector<1x1x1x128x128xbf16> to vector<128x128xbf16>
    %cst_206 = arith.constant dense<0.000000e+00> : vector<32x128xf32>
    %231 = tpu.matmul %222, %230, %cst_206 {dimension_numbers = #tpu.dot_dimension_numbers<[1], [0], [0], [1], [0, 0, 1, 1], [], []>} : vector<32x128xbf16>, vector<128x128xbf16>, vector<32x128xf32> -> vector<32x128xf32>
    %c1_i32_207 = arith.constant 1 : i32
    %232 = tpu.dynamic_rotate %225 by %c1_i32_207 dim 0 : vector<32x128xf32>, i32 -> vector<32x128xf32>
    %233 = vector.broadcast %20 : vector<32x1xf32> to vector<32x128xf32>
    %234 = arith.mulf %232, %233 : vector<32x128xf32>
    %235 = arith.addf %234, %228 : vector<32x128xf32>
    %c31_i32_208 = arith.constant 31 : i32
    %236 = tpu.dynamic_rotate %231 by %c31_i32_208 dim 0 : vector<32x128xf32>, i32 -> vector<32x128xf32>
    %237 = vector.broadcast %40 : vector<32x1xf32> to vector<32x128xf32>
    %238 = arith.mulf %236, %237 : vector<32x128xf32>
    %239 = arith.addf %235, %238 : vector<32x128xf32>
    %c3_209 = arith.constant 3 : index
    %c0_210 = arith.constant 0 : index
    %c0_211 = arith.constant 0 : index
    %c0_212 = arith.constant 0 : index
    %240 = vector.load %arg3[%c3_209, %c0_210, %c0_211, %c0_212] : memref<5x2x1x128xf32, #tpu.memory_space<vmem>>, vector<1x1x1x128xf32>
    %241 = vector.shape_cast %240 : vector<1x1x1x128xf32> to vector<1x128xf32>
    %242 = vector.broadcast %241 : vector<1x128xf32> to vector<32x128xf32>
    %243 = arith.mulf %239, %242 : vector<32x128xf32>
    %c3_213 = arith.constant 3 : index
    %c0_214 = arith.constant 0 : index
    %c0_215 = arith.constant 0 : index
    %c0_216 = arith.constant 0 : index
    %244 = vector.load %arg4[%c3_213, %c0_214, %c0_215, %c0_216] : memref<5x2x1x128xf32, #tpu.memory_space<vmem>>, vector<1x1x1x128xf32>
    %245 = vector.shape_cast %244 : vector<1x1x1x128xf32> to vector<1x128xf32>
    %246 = vector.broadcast %245 : vector<1x128xf32> to vector<32x128xf32>
    %247 = arith.addf %243, %246 : vector<32x128xf32>
    %cst_217 = arith.constant 0.000000e+00 : f32
    %248 = vector.broadcast %cst_217 : f32 to vector<32x128xf32>
    %249 = arith.maximumf %247, %248 : vector<32x128xf32>
    %250 = arith.truncf %249 : vector<32x128xf32> to vector<32x128xbf16>
    %c3_218 = arith.constant 3 : index
    %c1_219 = arith.constant 1 : index
    %c0_220 = arith.constant 0 : index
    %c0_221 = arith.constant 0 : index
    %c0_222 = arith.constant 0 : index
    %251 = vector.load %arg2[%c3_218, %c1_219, %c0_220, %c0_221, %c0_222] : memref<5x2x3x128x128xbf16, #tpu.memory_space<vmem>>, vector<1x1x1x128x128xbf16>
    %252 = vector.shape_cast %251 : vector<1x1x1x128x128xbf16> to vector<128x128xbf16>
    %cst_223 = arith.constant dense<0.000000e+00> : vector<32x128xf32>
    %253 = tpu.matmul %250, %252, %cst_223 {dimension_numbers = #tpu.dot_dimension_numbers<[1], [0], [0], [1], [0, 0, 1, 1], [], []>} : vector<32x128xbf16>, vector<128x128xbf16>, vector<32x128xf32> -> vector<32x128xf32>
    %c3_224 = arith.constant 3 : index
    %c1_225 = arith.constant 1 : index
    %c1_226 = arith.constant 1 : index
    %c0_227 = arith.constant 0 : index
    %c0_228 = arith.constant 0 : index
    %254 = vector.load %arg2[%c3_224, %c1_225, %c1_226, %c0_227, %c0_228] : memref<5x2x3x128x128xbf16, #tpu.memory_space<vmem>>, vector<1x1x1x128x128xbf16>
    %255 = vector.shape_cast %254 : vector<1x1x1x128x128xbf16> to vector<128x128xbf16>
    %cst_229 = arith.constant dense<0.000000e+00> : vector<32x128xf32>
    %256 = tpu.matmul %250, %255, %cst_229 {dimension_numbers = #tpu.dot_dimension_numbers<[1], [0], [0], [1], [0, 0, 1, 1], [], []>} : vector<32x128xbf16>, vector<128x128xbf16>, vector<32x128xf32> -> vector<32x128xf32>
    %c3_230 = arith.constant 3 : index
    %c1_231 = arith.constant 1 : index
    %c2_232 = arith.constant 2 : index
    %c0_233 = arith.constant 0 : index
    %c0_234 = arith.constant 0 : index
    %257 = vector.load %arg2[%c3_230, %c1_231, %c2_232, %c0_233, %c0_234] : memref<5x2x3x128x128xbf16, #tpu.memory_space<vmem>>, vector<1x1x1x128x128xbf16>
    %258 = vector.shape_cast %257 : vector<1x1x1x128x128xbf16> to vector<128x128xbf16>
    %cst_235 = arith.constant dense<0.000000e+00> : vector<32x128xf32>
    %259 = tpu.matmul %250, %258, %cst_235 {dimension_numbers = #tpu.dot_dimension_numbers<[1], [0], [0], [1], [0, 0, 1, 1], [], []>} : vector<32x128xbf16>, vector<128x128xbf16>, vector<32x128xf32> -> vector<32x128xf32>
    %c1_i32_236 = arith.constant 1 : i32
    %260 = tpu.dynamic_rotate %253 by %c1_i32_236 dim 0 : vector<32x128xf32>, i32 -> vector<32x128xf32>
    %261 = vector.broadcast %20 : vector<32x1xf32> to vector<32x128xf32>
    %262 = arith.mulf %260, %261 : vector<32x128xf32>
    %263 = arith.addf %262, %256 : vector<32x128xf32>
    %c31_i32_237 = arith.constant 31 : i32
    %264 = tpu.dynamic_rotate %259 by %c31_i32_237 dim 0 : vector<32x128xf32>, i32 -> vector<32x128xf32>
    %265 = vector.broadcast %40 : vector<32x1xf32> to vector<32x128xf32>
    %266 = arith.mulf %264, %265 : vector<32x128xf32>
    %267 = arith.addf %263, %266 : vector<32x128xf32>
    %c3_238 = arith.constant 3 : index
    %c1_239 = arith.constant 1 : index
    %c0_240 = arith.constant 0 : index
    %c0_241 = arith.constant 0 : index
    %268 = vector.load %arg3[%c3_238, %c1_239, %c0_240, %c0_241] : memref<5x2x1x128xf32, #tpu.memory_space<vmem>>, vector<1x1x1x128xf32>
    %269 = vector.shape_cast %268 : vector<1x1x1x128xf32> to vector<1x128xf32>
    %270 = vector.broadcast %269 : vector<1x128xf32> to vector<32x128xf32>
    %271 = arith.mulf %267, %270 : vector<32x128xf32>
    %c3_242 = arith.constant 3 : index
    %c1_243 = arith.constant 1 : index
    %c0_244 = arith.constant 0 : index
    %c0_245 = arith.constant 0 : index
    %272 = vector.load %arg4[%c3_242, %c1_243, %c0_244, %c0_245] : memref<5x2x1x128xf32, #tpu.memory_space<vmem>>, vector<1x1x1x128xf32>
    %273 = vector.shape_cast %272 : vector<1x1x1x128xf32> to vector<1x128xf32>
    %274 = vector.broadcast %273 : vector<1x128xf32> to vector<32x128xf32>
    %275 = arith.addf %271, %274 : vector<32x128xf32>
    %276 = arith.addf %275, %249 : vector<32x128xf32>
    %cst_246 = arith.constant 0.000000e+00 : f32
    %277 = vector.broadcast %cst_246 : f32 to vector<32x128xf32>
    %278 = arith.maximumf %276, %277 : vector<32x128xf32>
    %c3_247 = arith.constant 3 : index
    %c0_248 = arith.constant 0 : index
    %c0_249 = arith.constant 0 : index
    %279 = vector.load %arg5[%c3_247, %c0_248, %c0_249] : memref<5x32x128xf32, #tpu.memory_space<vmem>>, vector<1x32x128xf32>
    %280 = vector.shape_cast %279 : vector<1x32x128xf32> to vector<32x128xf32>
    %281 = vector.shape_cast %278 : vector<32x128xf32> to vector<1x32x128xf32>
    tpu.vector_store %arg5[%c3_247, %c0_248, %c0_249], %281 {strides = array<i32>} : memref<5x32x128xf32, #tpu.memory_space<vmem>>, vector<1x32x128xf32>,
    %282 = arith.truncf %278 : vector<32x128xf32> to vector<32x128xbf16>
    %c4 = arith.constant 4 : index
    %c0_250 = arith.constant 0 : index
    %c0_251 = arith.constant 0 : index
    %c0_252 = arith.constant 0 : index
    %c0_253 = arith.constant 0 : index
    %283 = vector.load %arg2[%c4, %c0_250, %c0_251, %c0_252, %c0_253] : memref<5x2x3x128x128xbf16, #tpu.memory_space<vmem>>, vector<1x1x1x128x128xbf16>
    %284 = vector.shape_cast %283 : vector<1x1x1x128x128xbf16> to vector<128x128xbf16>
    %cst_254 = arith.constant dense<0.000000e+00> : vector<32x128xf32>
    %285 = tpu.matmul %282, %284, %cst_254 {dimension_numbers = #tpu.dot_dimension_numbers<[1], [0], [0], [1], [0, 0, 1, 1], [], []>} : vector<32x128xbf16>, vector<128x128xbf16>, vector<32x128xf32> -> vector<32x128xf32>
    %c4_255 = arith.constant 4 : index
    %c0_256 = arith.constant 0 : index
    %c1_257 = arith.constant 1 : index
    %c0_258 = arith.constant 0 : index
    %c0_259 = arith.constant 0 : index
    %286 = vector.load %arg2[%c4_255, %c0_256, %c1_257, %c0_258, %c0_259] : memref<5x2x3x128x128xbf16, #tpu.memory_space<vmem>>, vector<1x1x1x128x128xbf16>
    %287 = vector.shape_cast %286 : vector<1x1x1x128x128xbf16> to vector<128x128xbf16>
    %cst_260 = arith.constant dense<0.000000e+00> : vector<32x128xf32>
    %288 = tpu.matmul %282, %287, %cst_260 {dimension_numbers = #tpu.dot_dimension_numbers<[1], [0], [0], [1], [0, 0, 1, 1], [], []>} : vector<32x128xbf16>, vector<128x128xbf16>, vector<32x128xf32> -> vector<32x128xf32>
    %c4_261 = arith.constant 4 : index
    %c0_262 = arith.constant 0 : index
    %c2_263 = arith.constant 2 : index
    %c0_264 = arith.constant 0 : index
    %c0_265 = arith.constant 0 : index
    %289 = vector.load %arg2[%c4_261, %c0_262, %c2_263, %c0_264, %c0_265] : memref<5x2x3x128x128xbf16, #tpu.memory_space<vmem>>, vector<1x1x1x128x128xbf16>
    %290 = vector.shape_cast %289 : vector<1x1x1x128x128xbf16> to vector<128x128xbf16>
    %cst_266 = arith.constant dense<0.000000e+00> : vector<32x128xf32>
    %291 = tpu.matmul %282, %290, %cst_266 {dimension_numbers = #tpu.dot_dimension_numbers<[1], [0], [0], [1], [0, 0, 1, 1], [], []>} : vector<32x128xbf16>, vector<128x128xbf16>, vector<32x128xf32> -> vector<32x128xf32>
    %c1_i32_267 = arith.constant 1 : i32
    %292 = tpu.dynamic_rotate %285 by %c1_i32_267 dim 0 : vector<32x128xf32>, i32 -> vector<32x128xf32>
    %293 = vector.broadcast %20 : vector<32x1xf32> to vector<32x128xf32>
    %294 = arith.mulf %292, %293 : vector<32x128xf32>
    %295 = arith.addf %294, %288 : vector<32x128xf32>
    %c31_i32_268 = arith.constant 31 : i32
    %296 = tpu.dynamic_rotate %291 by %c31_i32_268 dim 0 : vector<32x128xf32>, i32 -> vector<32x128xf32>
    %297 = vector.broadcast %40 : vector<32x1xf32> to vector<32x128xf32>
    %298 = arith.mulf %296, %297 : vector<32x128xf32>
    %299 = arith.addf %295, %298 : vector<32x128xf32>
    %c4_269 = arith.constant 4 : index
    %c0_270 = arith.constant 0 : index
    %c0_271 = arith.constant 0 : index
    %c0_272 = arith.constant 0 : index
    %300 = vector.load %arg3[%c4_269, %c0_270, %c0_271, %c0_272] : memref<5x2x1x128xf32, #tpu.memory_space<vmem>>, vector<1x1x1x128xf32>
    %301 = vector.shape_cast %300 : vector<1x1x1x128xf32> to vector<1x128xf32>
    %302 = vector.broadcast %301 : vector<1x128xf32> to vector<32x128xf32>
    %303 = arith.mulf %299, %302 : vector<32x128xf32>
    %c4_273 = arith.constant 4 : index
    %c0_274 = arith.constant 0 : index
    %c0_275 = arith.constant 0 : index
    %c0_276 = arith.constant 0 : index
    %304 = vector.load %arg4[%c4_273, %c0_274, %c0_275, %c0_276] : memref<5x2x1x128xf32, #tpu.memory_space<vmem>>, vector<1x1x1x128xf32>
    %305 = vector.shape_cast %304 : vector<1x1x1x128xf32> to vector<1x128xf32>
    %306 = vector.broadcast %305 : vector<1x128xf32> to vector<32x128xf32>
    %307 = arith.addf %303, %306 : vector<32x128xf32>
    %cst_277 = arith.constant 0.000000e+00 : f32
    %308 = vector.broadcast %cst_277 : f32 to vector<32x128xf32>
    %309 = arith.maximumf %307, %308 : vector<32x128xf32>
    %310 = arith.truncf %309 : vector<32x128xf32> to vector<32x128xbf16>
    %c4_278 = arith.constant 4 : index
    %c1_279 = arith.constant 1 : index
    %c0_280 = arith.constant 0 : index
    %c0_281 = arith.constant 0 : index
    %c0_282 = arith.constant 0 : index
    %311 = vector.load %arg2[%c4_278, %c1_279, %c0_280, %c0_281, %c0_282] : memref<5x2x3x128x128xbf16, #tpu.memory_space<vmem>>, vector<1x1x1x128x128xbf16>
    %312 = vector.shape_cast %311 : vector<1x1x1x128x128xbf16> to vector<128x128xbf16>
    %cst_283 = arith.constant dense<0.000000e+00> : vector<32x128xf32>
    %313 = tpu.matmul %310, %312, %cst_283 {dimension_numbers = #tpu.dot_dimension_numbers<[1], [0], [0], [1], [0, 0, 1, 1], [], []>} : vector<32x128xbf16>, vector<128x128xbf16>, vector<32x128xf32> -> vector<32x128xf32>
    %c4_284 = arith.constant 4 : index
    %c1_285 = arith.constant 1 : index
    %c1_286 = arith.constant 1 : index
    %c0_287 = arith.constant 0 : index
    %c0_288 = arith.constant 0 : index
    %314 = vector.load %arg2[%c4_284, %c1_285, %c1_286, %c0_287, %c0_288] : memref<5x2x3x128x128xbf16, #tpu.memory_space<vmem>>, vector<1x1x1x128x128xbf16>
    %315 = vector.shape_cast %314 : vector<1x1x1x128x128xbf16> to vector<128x128xbf16>
    %cst_289 = arith.constant dense<0.000000e+00> : vector<32x128xf32>
    %316 = tpu.matmul %310, %315, %cst_289 {dimension_numbers = #tpu.dot_dimension_numbers<[1], [0], [0], [1], [0, 0, 1, 1], [], []>} : vector<32x128xbf16>, vector<128x128xbf16>, vector<32x128xf32> -> vector<32x128xf32>
    %c4_290 = arith.constant 4 : index
    %c1_291 = arith.constant 1 : index
    %c2_292 = arith.constant 2 : index
    %c0_293 = arith.constant 0 : index
    %c0_294 = arith.constant 0 : index
    %317 = vector.load %arg2[%c4_290, %c1_291, %c2_292, %c0_293, %c0_294] : memref<5x2x3x128x128xbf16, #tpu.memory_space<vmem>>, vector<1x1x1x128x128xbf16>
    %318 = vector.shape_cast %317 : vector<1x1x1x128x128xbf16> to vector<128x128xbf16>
    %cst_295 = arith.constant dense<0.000000e+00> : vector<32x128xf32>
    %319 = tpu.matmul %310, %318, %cst_295 {dimension_numbers = #tpu.dot_dimension_numbers<[1], [0], [0], [1], [0, 0, 1, 1], [], []>} : vector<32x128xbf16>, vector<128x128xbf16>, vector<32x128xf32> -> vector<32x128xf32>
    %c1_i32_296 = arith.constant 1 : i32
    %320 = tpu.dynamic_rotate %313 by %c1_i32_296 dim 0 : vector<32x128xf32>, i32 -> vector<32x128xf32>
    %321 = vector.broadcast %20 : vector<32x1xf32> to vector<32x128xf32>
    %322 = arith.mulf %320, %321 : vector<32x128xf32>
    %323 = arith.addf %322, %316 : vector<32x128xf32>
    %c31_i32_297 = arith.constant 31 : i32
    %324 = tpu.dynamic_rotate %319 by %c31_i32_297 dim 0 : vector<32x128xf32>, i32 -> vector<32x128xf32>
    %325 = vector.broadcast %40 : vector<32x1xf32> to vector<32x128xf32>
    %326 = arith.mulf %324, %325 : vector<32x128xf32>
    %327 = arith.addf %323, %326 : vector<32x128xf32>
    %c4_298 = arith.constant 4 : index
    %c1_299 = arith.constant 1 : index
    %c0_300 = arith.constant 0 : index
    %c0_301 = arith.constant 0 : index
    %328 = vector.load %arg3[%c4_298, %c1_299, %c0_300, %c0_301] : memref<5x2x1x128xf32, #tpu.memory_space<vmem>>, vector<1x1x1x128xf32>
    %329 = vector.shape_cast %328 : vector<1x1x1x128xf32> to vector<1x128xf32>
    %330 = vector.broadcast %329 : vector<1x128xf32> to vector<32x128xf32>
    %331 = arith.mulf %327, %330 : vector<32x128xf32>
    %c4_302 = arith.constant 4 : index
    %c1_303 = arith.constant 1 : index
    %c0_304 = arith.constant 0 : index
    %c0_305 = arith.constant 0 : index
    %332 = vector.load %arg4[%c4_302, %c1_303, %c0_304, %c0_305] : memref<5x2x1x128xf32, #tpu.memory_space<vmem>>, vector<1x1x1x128xf32>
    %333 = vector.shape_cast %332 : vector<1x1x1x128xf32> to vector<1x128xf32>
    %334 = vector.broadcast %333 : vector<1x128xf32> to vector<32x128xf32>
    %335 = arith.addf %331, %334 : vector<32x128xf32>
    %336 = arith.addf %335, %309 : vector<32x128xf32>
    %cst_306 = arith.constant 0.000000e+00 : f32
    %337 = vector.broadcast %cst_306 : f32 to vector<32x128xf32>
    %338 = arith.maximumf %336, %337 : vector<32x128xf32>
    %c4_307 = arith.constant 4 : index
    %c0_308 = arith.constant 0 : index
    %c0_309 = arith.constant 0 : index
    %339 = vector.load %arg5[%c4_307, %c0_308, %c0_309] : memref<5x32x128xf32, #tpu.memory_space<vmem>>, vector<1x32x128xf32>
    %340 = vector.shape_cast %339 : vector<1x32x128xf32> to vector<32x128xf32>
    %341 = vector.shape_cast %338 : vector<32x128xf32> to vector<1x32x128xf32>
    tpu.vector_store %arg5[%c4_307, %c0_308, %c0_309], %341 {strides = array<i32>} : memref<5x32x128xf32, #tpu.memory_space<vmem>>, vector<1x32x128xf32>,
    return
  }
  func.func @transform_0(%arg0: i32) -> (i32, i32) {
    %c0_i32 = arith.constant 0 : i32
    %c0_i32_0 = arith.constant 0 : i32
    return %arg0, %c0_i32 : i32, i32
  }
  func.func @transform_1(%arg0: i32) -> (i32, i32, i32, i32, i32) {
    %c0_i32 = arith.constant 0 : i32
    %c0_i32_0 = arith.constant 0 : i32
    %c0_i32_1 = arith.constant 0 : i32
    %c0_i32_2 = arith.constant 0 : i32
    %c0_i32_3 = arith.constant 0 : i32
    %c0_i32_4 = arith.constant 0 : i32
    return %c0_i32, %c0_i32_0, %c0_i32_1, %c0_i32_2, %c0_i32_3 : i32, i32, i32, i32, i32
  }
  func.func @transform_2(%arg0: i32) -> (i32, i32, i32, i32) {
    %c0_i32 = arith.constant 0 : i32
    %c0_i32_0 = arith.constant 0 : i32
    %c0_i32_1 = arith.constant 0 : i32
    %c0_i32_2 = arith.constant 0 : i32
    %c0_i32_3 = arith.constant 0 : i32
    return %c0_i32, %c0_i32_0, %c0_i32_1, %c0_i32_2 : i32, i32, i32, i32
  }
  func.func @transform_3(%arg0: i32) -> (i32, i32, i32, i32) {
    %c0_i32 = arith.constant 0 : i32
    %c0_i32_0 = arith.constant 0 : i32
    %c0_i32_1 = arith.constant 0 : i32
    %c0_i32_2 = arith.constant 0 : i32
    %c0_i32_3 = arith.constant 0 : i32
    return %c0_i32, %c0_i32_0, %c0_i32_1, %c0_i32_2 : i32, i32, i32, i32
  }
  func.func @transform_4(%arg0: i32) -> (i32, i32, i32) {
    %c0_i32 = arith.constant 0 : i32
    %c0_i32_0 = arith.constant 0 : i32
    %c0_i32_1 = arith.constant 0 : i32
    return %c0_i32, %arg0, %c0_i32_0 : i32, i32, i32
  }
}

module attributes {stable_mosaic.version = 11 : i64} {
  func.func @_epilogue_kernel(%arg0: i32, %arg1: memref<1x256x128xf32, #tpu.memory_space<vmem>>, %arg2: memref<4x128x128xbf16, #tpu.memory_space<vmem>>, %arg3: memref<1x128xf32, #tpu.memory_space<vmem>>, %arg4: memref<128x32xbf16, #tpu.memory_space<vmem>>, %arg5: memref<128x8xf32, #tpu.memory_space<vmem>>, %arg6: memref<8x128xf32, #tpu.memory_space<vmem>>, %arg7: memref<32x8xf32, #tpu.memory_space<vmem>>, %arg8: memref<8x32xf32, #tpu.memory_space<vmem>>, %arg9: memref<128x128xf32, #tpu.memory_space<vmem>>, %arg10: memref<1x128xf32, #tpu.memory_space<vmem>>, %arg11: memref<1x256x128xf32, #tpu.memory_space<vmem>>) attributes {dimension_semantics = [#tpu.dimension_semantics<parallel>], iteration_bounds = array<i64: 2>, scalar_prefetch = 0 : i64, scratch_operands = 0 : i64, tpu.core_type = #tpu.core_type<tc>, window_params = [{transform_indices = @transform_0, window_bounds = array<i64: 1, 256, 128>}, {pipeline_mode = #tpu.pipeline_mode<synchronous>, transform_indices = @transform_1, window_bounds = array<i64: 4, 128, 128>}, {pipeline_mode = #tpu.pipeline_mode<synchronous>, transform_indices = @transform_2, window_bounds = array<i64: 1, 128>}, {pipeline_mode = #tpu.pipeline_mode<synchronous>, transform_indices = @transform_3, window_bounds = array<i64: 128, 32>}, {pipeline_mode = #tpu.pipeline_mode<synchronous>, transform_indices = @transform_4, window_bounds = array<i64: 128, 8>}, {pipeline_mode = #tpu.pipeline_mode<synchronous>, transform_indices = @transform_5, window_bounds = array<i64: 8, 128>}, {pipeline_mode = #tpu.pipeline_mode<synchronous>, transform_indices = @transform_6, window_bounds = array<i64: 32, 8>}, {pipeline_mode = #tpu.pipeline_mode<synchronous>, transform_indices = @transform_7, window_bounds = array<i64: 8, 32>}, {pipeline_mode = #tpu.pipeline_mode<synchronous>, transform_indices = @transform_8, window_bounds = array<i64: 128, 128>}, {pipeline_mode = #tpu.pipeline_mode<synchronous>, transform_indices = @transform_9, window_bounds = array<i64: 1, 128>}, {transform_indices = @transform_10, window_bounds = array<i64: 1, 256, 128>}]} {
    %c0 = arith.constant 0 : index
    %c0_0 = arith.constant 0 : index
    %c0_1 = arith.constant 0 : index
    %0 = vector.load %arg1[%c0, %c0_0, %c0_1] : memref<1x256x128xf32, #tpu.memory_space<vmem>>, vector<1x256x128xf32>
    %1 = vector.shape_cast %0 : vector<1x256x128xf32> to vector<256x128xf32>
    %2 = arith.truncf %1 : vector<256x128xf32> to vector<256x128xbf16>
    %c0_2 = arith.constant 0 : index
    %c0_3 = arith.constant 0 : index
    %c0_4 = arith.constant 0 : index
    %3 = vector.load %arg2[%c0_2, %c0_3, %c0_4] : memref<4x128x128xbf16, #tpu.memory_space<vmem>>, vector<1x128x128xbf16>
    %4 = vector.shape_cast %3 : vector<1x128x128xbf16> to vector<128x128xbf16>
    %cst = arith.constant dense<0.000000e+00> : vector<256x128xf32>
    %5 = tpu.matmul %2, %4, %cst {dimension_numbers = #tpu.dot_dimension_numbers<[1], [0], [0], [1], [0, 0, 1, 1], [], []>} : vector<256x128xbf16>, vector<128x128xbf16>, vector<256x128xf32> -> vector<256x128xf32>
    %c1 = arith.constant 1 : index
    %c0_5 = arith.constant 0 : index
    %c0_6 = arith.constant 0 : index
    %6 = vector.load %arg2[%c1, %c0_5, %c0_6] : memref<4x128x128xbf16, #tpu.memory_space<vmem>>, vector<1x128x128xbf16>
    %7 = vector.shape_cast %6 : vector<1x128x128xbf16> to vector<128x128xbf16>
    %cst_7 = arith.constant dense<0.000000e+00> : vector<256x128xf32>
    %8 = tpu.matmul %2, %7, %cst_7 {dimension_numbers = #tpu.dot_dimension_numbers<[1], [0], [0], [1], [0, 0, 1, 1], [], []>} : vector<256x128xbf16>, vector<128x128xbf16>, vector<256x128xf32> -> vector<256x128xf32>
    %9 = arith.maximumf %5, %8 : vector<256x128xf32>
    %c2 = arith.constant 2 : index
    %c0_8 = arith.constant 0 : index
    %c0_9 = arith.constant 0 : index
    %10 = vector.load %arg2[%c2, %c0_8, %c0_9] : memref<4x128x128xbf16, #tpu.memory_space<vmem>>, vector<1x128x128xbf16>
    %11 = vector.shape_cast %10 : vector<1x128x128xbf16> to vector<128x128xbf16>
    %cst_10 = arith.constant dense<0.000000e+00> : vector<256x128xf32>
    %12 = tpu.matmul %2, %11, %cst_10 {dimension_numbers = #tpu.dot_dimension_numbers<[1], [0], [0], [1], [0, 0, 1, 1], [], []>} : vector<256x128xbf16>, vector<128x128xbf16>, vector<256x128xf32> -> vector<256x128xf32>
    %13 = arith.maximumf %9, %12 : vector<256x128xf32>
    %c3 = arith.constant 3 : index
    %c0_11 = arith.constant 0 : index
    %c0_12 = arith.constant 0 : index
    %14 = vector.load %arg2[%c3, %c0_11, %c0_12] : memref<4x128x128xbf16, #tpu.memory_space<vmem>>, vector<1x128x128xbf16>
    %15 = vector.shape_cast %14 : vector<1x128x128xbf16> to vector<128x128xbf16>
    %cst_13 = arith.constant dense<0.000000e+00> : vector<256x128xf32>
    %16 = tpu.matmul %2, %15, %cst_13 {dimension_numbers = #tpu.dot_dimension_numbers<[1], [0], [0], [1], [0, 0, 1, 1], [], []>} : vector<256x128xbf16>, vector<128x128xbf16>, vector<256x128xf32> -> vector<256x128xf32>
    %17 = arith.maximumf %13, %16 : vector<256x128xf32>
    %18 = tpu.iota {dimensions = array<i32: 1>} : vector<1x128xi32>
    %c32_i32 = arith.constant 32 : i32
    %c0_i32 = arith.constant 0 : i32
    %19 = arith.cmpi eq, %c32_i32, %c0_i32 : i32
    %c1_i32 = arith.constant 1 : i32
    %20 = arith.select %19, %c1_i32, %c32_i32 : i32
    %21 = vector.broadcast %20 : i32 to vector<1x128xi32>
    %22 = arith.remsi %18, %21 : vector<1x128xi32>
    %c0_i32_14 = arith.constant 0 : i32
    %23 = vector.broadcast %c0_i32_14 : i32 to vector<1x128xi32>
    %24 = arith.cmpi ne, %22, %23 : vector<1x128xi32>
    %c0_i32_15 = arith.constant 0 : i32
    %25 = vector.broadcast %c0_i32_15 : i32 to vector<1x128xi32>
    %26 = arith.cmpi slt, %22, %25 : vector<1x128xi32>
    %c0_i32_16 = arith.constant 0 : i32
    %27 = arith.cmpi slt, %20, %c0_i32_16 : i32
    %28 = vector.broadcast %27 : i1 to vector<1x128xi1>
    %29 = vector.broadcast %28 : vector<1x128xi1> to vector<1x128xi1>
    %30 = arith.xori %26, %29 : vector<1x128xi1>
    %31 = arith.andi %30, %24 : vector<1x128xi1>
    %32 = vector.broadcast %20 : i32 to vector<1x128xi32>
    %33 = arith.addi %22, %32 : vector<1x128xi32>
    %34 = arith.select %31, %33, %22 : vector<1x128xi1>, vector<1x128xi32>
    %c16_i32 = arith.constant 16 : i32
    %35 = vector.broadcast %c16_i32 : i32 to vector<1x128xi32>
    %36 = arith.cmpi slt, %34, %35 : vector<1x128xi32>
    %c0_17 = arith.constant 0 : index
    %c0_18 = arith.constant 0 : index
    %37 = vector.load %arg3[%c0_17, %c0_18] : memref<1x128xf32, #tpu.memory_space<vmem>>, vector<1x128xf32>
    %38 = vector.broadcast %37 : vector<1x128xf32> to vector<256x128xf32>
    %39 = arith.addf %17, %38 : vector<256x128xf32>
    %40 = vector.shape_cast %36 : vector<1x128xi1> to vector<1x128xi1>
    %41 = vector.broadcast %40 : vector<1x128xi1> to vector<256x128xi1>
    %42 = arith.select %41, %1, %39 : vector<256x128xi1>, vector<256x128xf32>
    %43 = arith.truncf %42 : vector<256x128xf32> to vector<256x128xbf16>
    %c0_19 = arith.constant 0 : index
    %c0_20 = arith.constant 0 : index
    %44 = vector.load %arg4[%c0_19, %c0_20] : memref<128x32xbf16, #tpu.memory_space<vmem>>, vector<128x32xbf16>
    %cst_21 = arith.constant dense<0.000000e+00> : vector<256x32xf32>
    %45 = tpu.matmul %43, %44, %cst_21 {dimension_numbers = #tpu.dot_dimension_numbers<[1], [0], [0], [1], [0, 0, 1, 1], [], []>} : vector<256x128xbf16>, vector<128x32xbf16>, vector<256x32xf32> -> vector<256x32xf32>
    %c0_22 = arith.constant 0 : index
    %c0_23 = arith.constant 0 : index
    %46 = vector.load %arg5[%c0_22, %c0_23] : memref<128x8xf32, #tpu.memory_space<vmem>>, vector<128x8xf32>
    %c0_24 = arith.constant 0 : index
    %c0_25 = arith.constant 0 : index
    %47 = vector.load %arg6[%c0_24, %c0_25] : memref<8x128xf32, #tpu.memory_space<vmem>>, vector<8x128xf32>
    %cst_26 = arith.constant dense<0.000000e+00> : vector<128xf32>
    %48 = vector.multi_reduction <add>, %42, %cst_26 [0] : vector<256x128xf32> to vector<128xf32>
    %49 = vector.shape_cast %48 : vector<128xf32> to vector<1x128xf32>
    %cst_27 = arith.constant 3.906250e-03 : f32
    %50 = vector.broadcast %cst_27 : f32 to vector<1x128xf32>
    %51 = arith.mulf %49, %50 : vector<1x128xf32>
    %cst_28 = arith.constant dense<0xFF800000> : vector<128xf32>
    %52 = vector.multi_reduction <maximumf>, %42, %cst_28 [0] : vector<256x128xf32> to vector<128xf32>
    %53 = vector.shape_cast %52 : vector<128xf32> to vector<1x128xf32>
    %54 = tpu.concatenate %51, %53 in 0 : vector<1x128xf32>, vector<1x128xf32> -> vector<2x128xf32>
    %cst_29 = arith.constant dense<0.000000e+00> : vector<2x8xf32>
    %55 = tpu.matmul %54, %46, %cst_29 {dimension_numbers = #tpu.dot_dimension_numbers<[1], [0], [0], [1], [0, 0, 1, 1], [], []>} : vector<2x128xf32>, vector<128x8xf32>, vector<2x8xf32> -> vector<2x8xf32>
    %cst_30 = arith.constant 0.000000e+00 : f32
    %56 = vector.broadcast %cst_30 : f32 to vector<2x8xf32>
    %57 = arith.maximumf %55, %56 : vector<2x8xf32>
    %cst_31 = arith.constant dense<0.000000e+00> : vector<2x128xf32>
    %58 = tpu.matmul %57, %47, %cst_31 {dimension_numbers = #tpu.dot_dimension_numbers<[1], [0], [0], [1], [0, 0, 1, 1], [], []>} : vector<2x8xf32>, vector<8x128xf32>, vector<2x128xf32> -> vector<2x128xf32>
    %59 = vector.extract_strided_slice %58 {offsets = [0, 0], sizes = [1, 128], strides = [1, 1]} : vector<2x128xf32> to vector<1x128xf32>
    %60 = vector.extract_strided_slice %58 {offsets = [1, 0], sizes = [1, 128], strides = [1, 1]} : vector<2x128xf32> to vector<1x128xf32>
    %61 = arith.addf %59, %60 : vector<1x128xf32>
    %62 = arith.negf %61 : vector<1x128xf32>
    %63 = math.exp %62 : vector<1x128xf32>
    %cst_32 = arith.constant 1.000000e+00 : f32
    %64 = vector.broadcast %cst_32 : f32 to vector<1x128xf32>
    %65 = arith.addf %64, %63 : vector<1x128xf32>
    %66 = arith.divf %64, %65 : vector<1x128xf32>
    %c0_33 = arith.constant 0 : index
    %c0_34 = arith.constant 0 : index
    %67 = vector.load %arg7[%c0_33, %c0_34] : memref<32x8xf32, #tpu.memory_space<vmem>>, vector<32x8xf32>
    %c0_35 = arith.constant 0 : index
    %c0_36 = arith.constant 0 : index
    %68 = vector.load %arg8[%c0_35, %c0_36] : memref<8x32xf32, #tpu.memory_space<vmem>>, vector<8x32xf32>
    %cst_37 = arith.constant dense<0.000000e+00> : vector<32xf32>
    %69 = vector.multi_reduction <add>, %45, %cst_37 [0] : vector<256x32xf32> to vector<32xf32>
    %70 = vector.shape_cast %69 : vector<32xf32> to vector<1x32xf32>
    %cst_38 = arith.constant 3.906250e-03 : f32
    %71 = vector.broadcast %cst_38 : f32 to vector<1x32xf32>
    %72 = arith.mulf %70, %71 : vector<1x32xf32>
    %cst_39 = arith.constant dense<0xFF800000> : vector<32xf32>
    %73 = vector.multi_reduction <maximumf>, %45, %cst_39 [0] : vector<256x32xf32> to vector<32xf32>
    %74 = vector.shape_cast %73 : vector<32xf32> to vector<1x32xf32>
    %75 = tpu.concatenate %72, %74 in 0 : vector<1x32xf32>, vector<1x32xf32> -> vector<2x32xf32>
    %cst_40 = arith.constant dense<0.000000e+00> : vector<2x8xf32>
    %76 = tpu.matmul %75, %67, %cst_40 {dimension_numbers = #tpu.dot_dimension_numbers<[1], [0], [0], [1], [0, 0, 1, 1], [], []>} : vector<2x32xf32>, vector<32x8xf32>, vector<2x8xf32> -> vector<2x8xf32>
    %cst_41 = arith.constant 0.000000e+00 : f32
    %77 = vector.broadcast %cst_41 : f32 to vector<2x8xf32>
    %78 = arith.maximumf %76, %77 : vector<2x8xf32>
    %cst_42 = arith.constant dense<0.000000e+00> : vector<2x32xf32>
    %79 = tpu.matmul %78, %68, %cst_42 {dimension_numbers = #tpu.dot_dimension_numbers<[1], [0], [0], [1], [0, 0, 1, 1], [], []>} : vector<2x8xf32>, vector<8x32xf32>, vector<2x32xf32> -> vector<2x32xf32>
    %80 = vector.extract_strided_slice %79 {offsets = [0, 0], sizes = [1, 32], strides = [1, 1]} : vector<2x32xf32> to vector<1x32xf32>
    %81 = vector.extract_strided_slice %79 {offsets = [1, 0], sizes = [1, 32], strides = [1, 1]} : vector<2x32xf32> to vector<1x32xf32>
    %82 = arith.addf %80, %81 : vector<1x32xf32>
    %83 = arith.negf %82 : vector<1x32xf32>
    %84 = math.exp %83 : vector<1x32xf32>
    %cst_43 = arith.constant 1.000000e+00 : f32
    %85 = vector.broadcast %cst_43 : f32 to vector<1x32xf32>
    %86 = arith.addf %85, %84 : vector<1x32xf32>
    %87 = arith.divf %85, %86 : vector<1x32xf32>
    %88 = tpu.concatenate %87, %87, %87, %87 in 1 : vector<1x32xf32>, vector<1x32xf32>, vector<1x32xf32>, vector<1x32xf32> -> vector<1x128xf32>
    %89 = vector.broadcast %88 : vector<1x128xf32> to vector<256x128xf32>
    %90 = arith.addf %42, %89 : vector<256x128xf32>
    %91 = vector.broadcast %66 : vector<1x128xf32> to vector<256x128xf32>
    %92 = arith.mulf %91, %90 : vector<256x128xf32>
    %c0_44 = arith.constant 0 : index
    %c0_45 = arith.constant 0 : index
    %93 = vector.load %arg9[%c0_44, %c0_45] : memref<128x128xf32, #tpu.memory_space<vmem>>, vector<128x128xf32>
    %cst_46 = arith.constant dense<0.000000e+00> : vector<256x128xf32>
    %94 = tpu.matmul %92, %93, %cst_46 {dimension_numbers = #tpu.dot_dimension_numbers<[1], [0], [0], [1], [0, 0, 1, 1], [], []>} : vector<256x128xf32>, vector<128x128xf32>, vector<256x128xf32> -> vector<256x128xf32>
    %c0_47 = arith.constant 0 : index
    %c0_48 = arith.constant 0 : index
    %95 = vector.load %arg10[%c0_47, %c0_48] : memref<1x128xf32, #tpu.memory_space<vmem>>, vector<1x128xf32>
    %96 = vector.broadcast %95 : vector<1x128xf32> to vector<256x128xf32>
    %97 = arith.addf %94, %96 : vector<256x128xf32>
    %c0_49 = arith.constant 0 : index
    %c0_50 = arith.constant 0 : index
    %c0_51 = arith.constant 0 : index
    %98 = vector.load %arg11[%c0_49, %c0_50, %c0_51] : memref<1x256x128xf32, #tpu.memory_space<vmem>>, vector<1x256x128xf32>
    %99 = vector.shape_cast %98 : vector<1x256x128xf32> to vector<256x128xf32>
    %100 = vector.shape_cast %97 : vector<256x128xf32> to vector<1x256x128xf32>
    tpu.vector_store %arg11[%c0_49, %c0_50, %c0_51], %100 {strides = array<i32>} : memref<1x256x128xf32, #tpu.memory_space<vmem>>, vector<1x256x128xf32>,
    return
  }
  func.func @transform_0(%arg0: i32) -> (i32, i32, i32) {
    %c0_i32 = arith.constant 0 : i32
    %c0_i32_0 = arith.constant 0 : i32
    %c0_i32_1 = arith.constant 0 : i32
    return %arg0, %c0_i32, %c0_i32_0 : i32, i32, i32
  }
  func.func @transform_1(%arg0: i32) -> (i32, i32, i32) {
    %c0_i32 = arith.constant 0 : i32
    %c0_i32_0 = arith.constant 0 : i32
    %c0_i32_1 = arith.constant 0 : i32
    %c0_i32_2 = arith.constant 0 : i32
    return %c0_i32, %c0_i32_0, %c0_i32_1 : i32, i32, i32
  }
  func.func @transform_2(%arg0: i32) -> (i32, i32) {
    %c0_i32 = arith.constant 0 : i32
    %c0_i32_0 = arith.constant 0 : i32
    %c0_i32_1 = arith.constant 0 : i32
    return %c0_i32, %c0_i32_0 : i32, i32
  }
  func.func @transform_3(%arg0: i32) -> (i32, i32) {
    %c0_i32 = arith.constant 0 : i32
    %c0_i32_0 = arith.constant 0 : i32
    %c0_i32_1 = arith.constant 0 : i32
    return %c0_i32, %c0_i32_0 : i32, i32
  }
  func.func @transform_4(%arg0: i32) -> (i32, i32) {
    %c0_i32 = arith.constant 0 : i32
    %c0_i32_0 = arith.constant 0 : i32
    %c0_i32_1 = arith.constant 0 : i32
    return %c0_i32, %c0_i32_0 : i32, i32
  }
  func.func @transform_5(%arg0: i32) -> (i32, i32) {
    %c0_i32 = arith.constant 0 : i32
    %c0_i32_0 = arith.constant 0 : i32
    %c0_i32_1 = arith.constant 0 : i32
    return %c0_i32, %c0_i32_0 : i32, i32
  }
  func.func @transform_6(%arg0: i32) -> (i32, i32) {
    %c0_i32 = arith.constant 0 : i32
    %c0_i32_0 = arith.constant 0 : i32
    %c0_i32_1 = arith.constant 0 : i32
    return %c0_i32, %c0_i32_0 : i32, i32
  }
  func.func @transform_7(%arg0: i32) -> (i32, i32) {
    %c0_i32 = arith.constant 0 : i32
    %c0_i32_0 = arith.constant 0 : i32
    %c0_i32_1 = arith.constant 0 : i32
    return %c0_i32, %c0_i32_0 : i32, i32
  }
  func.func @transform_8(%arg0: i32) -> (i32, i32) {
    %c0_i32 = arith.constant 0 : i32
    %c0_i32_0 = arith.constant 0 : i32
    %c0_i32_1 = arith.constant 0 : i32
    return %c0_i32, %c0_i32_0 : i32, i32
  }
  func.func @transform_9(%arg0: i32) -> (i32, i32) {
    %c0_i32 = arith.constant 0 : i32
    %c0_i32_0 = arith.constant 0 : i32
    %c0_i32_1 = arith.constant 0 : i32
    return %c0_i32, %c0_i32_0 : i32, i32
  }
  func.func @transform_10(%arg0: i32) -> (i32, i32, i32) {
    %c0_i32 = arith.constant 0 : i32
    %c0_i32_0 = arith.constant 0 : i32
    %c0_i32_1 = arith.constant 0 : i32
    return %arg0, %c0_i32, %c0_i32_0 : i32, i32, i32
  }
}

</mosaic_0001>

<bundles_post_ra>
// kernel: snunet_ecam_forward.2
= control target key start
LH: loop header
LB: loop body
LE: loop exit
PB: predicated region body
PF: predicated region fallthrough
CT: control target
= control target key end

     0   :  { %s6518_s15 = smov 0   ;;  %s6520_s16 = smov 0   ;;  %s7788_s0 = inlined_call_operand.vmem [shape: f32[64,128], index: 0, kind: input, shape index: {}]   ;;  %s7789_s1 = inlined_call_operand.vmem [shape: bf16[5,2,3,128,128], index: 1, kind: input, shape index: {}]   ;;  %s7790_s2 = inlined_call_operand.vmem [shape: f32[5,2,1,128], index: 2, kind: input, shape index: {}]   ;;  %s7791_s3 = inlined_call_operand.vmem [shape: f32[5,2,1,128], index: 3, kind: input, shape index: {}]   ;;  %s7792_s4 = inlined_call_operand.vmem [shape: f32[5,64,128], index: 4, kind: output, shape index: {}]  }
   0x1   :  { %s6522_s17 = smov 0  }
   0x2 LB: > { %s6531_s18 = sadd.s32 4294967295, %s6490_s17   ;;  %s6533_s19 = sadd.s32 1, %s6490_s17   ;;  %s6490_s17 = sphi %s6522_s17, %s7796_s17   ;;  %s6486_s16 = sphi %s6520_s16, %s7795_s16   ;;  %s6482_s15 = sphi %s6518_s15, %s7794_s15  }
   0x3   : > { %s107_s20 = ssub.s32 %s6490_s17, %s6533_s19  ;;  %s110_s21 = sadd.s32 1, %s6486_s16 }
   0x4   : > { %p108_p0 = scmp.eq.s32.totalorder %s107_s20, 0  ;;  %p120_p1 = scmp.ne.s32.totalorder %s6486_s16, %s6482_s15 }
   0x5   : > { %p121_p2 = scmp.eq.s32.totalorder %s6531_s18, 1  ;;  %p4532_p3 = scmp.ge.s32.totalorder %s6490_s17, 1 }
   0x6   : > { %s6541_s22 = scalar_select %p108_p0, %s6486_s16, %s110_s21  }
   0x7   : > { %p6543_p4 = por %p121_p2, %p120_p1  ;;  %p163_p5 = scmp.lt.s32.totalorder %s6490_s17, 3 }
   0x9   : > { %p164_p6 = pnand %p4532_p3, %p163_p5 }
   0xa   : > { %v6228_v0 = vld [vmem:[%s7789_s1] sm:$0xff] (!%p164_p6)   ;;  %s4533_s26 = sshll.u32 (!%p164_p6), %s6531_s18, 2  ;;  %v6230_v2 = vld [vmem:[%s7789_s1 + $0x8] sm:$0xff] (!%p164_p6)   ;;  %v6232_v4 = vld [vmem:[%s7789_s1 + $0x10] sm:$0xff] (!%p164_p6)   ;;  %v196_v47 = vlaneseq (!%p164_p6)  ;;  %v6492_v61 = vmov (!%p164_p6), 0.0   ;;  %s185_s25 = sand.u32 (!%p164_p6), 1, %s6482_s15  }
   0xb   : > { %167 = sbr.rel (%p164_p6) target bundleno = 2689 (0xa81), region = 36  ;;  %v6229_v1 = vld [vmem:[%s7789_s1 + $0x40] sm:$0xff] (!%p164_p6)   ;;  %p189_p7 = scmp.lt.s32.totalorder (!%p164_p6), %s4533_s26, 7  ;;  %5602 = vmatprep.subr.bf16.mxu0 (!%p164_p6), %v6228_v0  ;;  %v6231_v3 = vld [vmem:[%s7789_s1 + $0x48] sm:$0xff] (!%p164_p6)   ;;  %v6233_v5 = vld [vmem:[%s7789_s1 + $0x50] sm:$0xff] (!%p164_p6)  }
   0xc   : > { %5603 = vmatpush3.bf16.msra.mxu0 (!%p164_p6), %v6228_v0  ;;  %5622 = vmatprep.subr.bf16.mxu1 (!%p164_p6), %v6229_v1  ;;  %v6234_v6 = vld [vmem:[%s7789_s1 + $0x18] sm:$0xff] (!%p164_p6)   ;;  %v6236_v8 = vld [vmem:[%s7789_s1 + $0x20] sm:$0xff] (!%p164_p6)   ;;  %v6238_v12 = vld [vmem:[%s7789_s1 + $0x28] sm:$0xff] (!%p164_p6)   ;;  %v6677_v48 = vshrl.u32 (!%p164_p6), %v196_v47, 7  ;;  %s6202_s29 = smul.u32 (!%p164_p6), 160, %s185_s25 }
   0xd   : > { %5604 = vmatprep.subr.bf16.mxu0 (!%p164_p6), %v6230_v2  ;;  %5623 = vmatpush3.bf16.msra.mxu1 (!%p164_p6), %v6229_v1  ;;  %v6235_v7 = vld [vmem:[%s7789_s1 + $0x58] sm:$0xff] (!%p164_p6)   ;;  %v6237_v9 = vld [vmem:[%s7789_s1 + $0x60] sm:$0xff] (!%p164_p6)   ;;  %v6239_v14 = vld [vmem:[%s7789_s1 + $0x68] sm:$0xff] (!%p164_p6)  }
   0xe   : > { %5624 = vmatprep.subr.bf16.mxu1 (!%p164_p6), %v6231_v3  ;;  %v6240_v15 = vld [vmem:[%s7789_s1 + $0x30] sm:$0xff] (!%p164_p6)   ;;  %v6242_v17 = vld [vmem:[%s7789_s1 + $0x38] sm:$0xff] (!%p164_p6)   ;;  %v6244_v21 = vld [vmem:[%s7789_s1 + $0x80] sm:$0xff] (!%p164_p6)   ;;  %v199_v49 = vadd.s32 (!%p164_p6), 16, %v6677_v48  ;;  %v205_v50 = vand.u32 (!%p164_p6), 15, %v6677_v48  ;;  %vm624_vm2 = vcmp.lt.s32.totalorder (!%p164_p6), %v6677_v48, 1 }
   0xf   : > { %v6241_v16 = vld [vmem:[%s7789_s1 + $0x70] sm:$0xff] (!%p164_p6)   ;;  %v6243_v18 = vld [vmem:[%s7789_s1 + $0x78] sm:$0xff] (!%p164_p6)   ;;  %v6245_v23 = vld [vmem:[%s7789_s1 + $0x88] sm:$0xff] (!%p164_p6)   ;;  %vm641_vm5 = vcmp.lt.s32.totalorder (!%p164_p6), %v6677_v48, 7  ;;  %s6850_s15 = scalar_lea.vmem (!%p164_p6), [#allocation2], %s6202_s29 }
  0x10   : > { %5605 = vmatpush3.bf16.msra.mxu0 (!%p164_p6), %v6230_v2  ;;  %v6246_v24 = vld [vmem:[%s7789_s1 + $0x90] sm:$0xff] (!%p164_p6)   ;;  %v6247_v25 = vld [vmem:[%s7789_s1 + $0x98] sm:$0xff] (!%p164_p6)   ;;  %v6248_v26 = vld [vmem:[%s7789_s1 + $0xa0] sm:$0xff] (!%p164_p6)   ;;  %v219_v51 = vand.u32 (!%p164_p6), 15, %v199_v49  ;;  %vm249_vm0 = vcmp.ne.s32.totalorder (!%p164_p6), %v205_v50, 0 }
  0x11   : > { %5606 = vmatprep.subr.bf16.mxu0 (!%p164_p6), %v6232_v4  ;;  %5625 = vmatpush3.bf16.msra.mxu1 (!%p164_p6), %v6231_v3  ;;  %v6249_v27 = vld [vmem:[%s7789_s1 + $0xa8] sm:$0xff] (!%p164_p6)   ;;  %v6250_v28 = vld [vmem:[%s7789_s1 + $0xb0] sm:$0xff] (!%p164_p6)   ;;  %v6251_v29 = vld [vmem:[%s7789_s1 + $0xb8] sm:$0xff] (!%p164_p6)   ;;  %v6682_v62 = vsel (!%p164_p6), %vm249_vm0, 1.0, %v6492_v61 }
  0x12   : > { %s7798_s26 = smov (!%p189_p7, %s4533_s26), 7  ;;  %5626 = vmatprep.subr.bf16.mxu1 %v6233_v5  ;;  %v6252_v30 = vld [vmem:[%s7789_s1 + $0xc0] sm:$0xff]   ;;  %v6254_v32 = vld [vmem:[%s7789_s1 + $0xc8] sm:$0xff]   ;;  %v6256_v34 = vld [vmem:[%s7789_s1 + $0xd0] sm:$0xff]   ;;  %vm251_vm1 = vcmp.ne.s32.totalorder %v219_v51, 0  ;;  %s5301_s5 = sshll.u32 (%p6543_p4), %s6531_s18, 5 }
  0x13   : > { %s4534_s17 = sshll.u32 %s7798_s26, 3  ;;  %v6253_v31 = vld [vmem:[%s7789_s1 + $0x100] sm:$0xff]   ;;  %v6255_v33 = vld [vmem:[%s7789_s1 + $0x108] sm:$0xff]   ;;  %v6257_v35 = vld [vmem:[%s7789_s1 + $0x110] sm:$0xff]   ;;  %v6684_v1 = vsel %vm251_vm1, 1.0, %v6492_v61  ;;  %s7739_s8 = scalar_lea.vmem (%p6543_p4), %s7792_s4, %s5301_s5 }
  0x14   : > { %5607 = vmatpush3.bf16.msra.mxu0 %v6232_v4  ;;  %s192_s27 = scalar_lea.vmem %s7788_s0, %s4534_s17  ;;  %v6258_v36 = vld [vmem:[%s7789_s1 + $0xd8] sm:$0xff]   ;;  %v6260_v38 = vld [vmem:[%s7789_s1 + $0xe0] sm:$0xff]   ;;  %v6262_v40 = vld [vmem:[%s7789_s1 + $0xe8] sm:$0xff]  }
  0x15   : > { %5608 = vmatprep.subr.bf16.mxu0 %v6234_v6  ;;  %5627 = vmatpush3.bf16.msra.mxu1 %v6233_v5  ;;  %v273_v10 = vld [vmem:[%s192_s27] sm:$0xff]  ;;  %v274_v11 = vld [vmem:[%s192_s27 + $0x8] sm:$0xff]  ;;  %v275_v19 = vld [vmem:[%s192_s27 + $0x10] sm:$0xff] }
  0x16   : > { %5628 = vmatprep.subr.bf16.mxu1 %v6235_v7  ;;  %v277_v13 = vpack.c.bf16 %v274_v11, %v273_v10  ;;  %v276_v20 = vld [vmem:[%s192_s27 + $0x18] sm:$0xff]  ;;  %v6261_v39 = vld [vmem:[%s7789_s1 + $0x120] sm:$0xff]   ;;  %v6263_v41 = vld [vmem:[%s7789_s1 + $0x128] sm:$0xff]  }
  0x17   : > { %v278_v22 = vpack.c.bf16 %v276_v20, %v275_v19  ;;  %v6259_v37 = vld [vmem:[%s7789_s1 + $0x118] sm:$0xff]   ;;  %v6264_v42 = vld [vmem:[%s7789_s1 + $0xf0] sm:$0xff]   ;;  %v6674_v46 = vld [vmem:[%s7789_s1 + $0x140] sm:$0xff]  }
  0x18   : > { %5609 = vmatpush3.bf16.msra.mxu0 %v6234_v6  ;;  %5618 = vmatprep.mubr.bf16.mxu0 %v277_v13  ;;  %v6265_v43 = vld [vmem:[%s7789_s1 + $0x130] sm:$0xff]   ;;  %v6266_v44 = vld [vmem:[%s7789_s1 + $0xf8] sm:$0xff]  }
  0x19   : > { %5610 = vmatprep.subr.bf16.mxu0 %v6236_v8  ;;  %5629 = vmatpush3.bf16.msra.mxu1 %v6235_v7  ;;  %v6267_v45 = vld [vmem:[%s7789_s1 + $0x138] sm:$0xff]  }
  0x1a   : > { %5630 = vmatprep.subr.bf16.mxu1 %v6237_v9  ;;  %5638 = vmatprep.mubr.bf16.mxu1 %v277_v13 }
  0x1c   : > { %5611 = vmatpush3.bf16.msra.mxu0 %v6236_v8 }
  0x1d   : > { %5612 = vmatprep.subr.bf16.mxu0 %v6238_v12  ;;  %5631 = vmatpush3.bf16.msra.mxu1 %v6237_v9 }
  0x1e   : > { %5632 = vmatprep.subr.bf16.mxu1 %v6239_v14 }
  0x20   : > { %5613 = vmatpush3.bf16.msra.mxu0 %v6238_v12 }
  0x21   : > { %5614 = vmatprep.subr.bf16.mxu0 %v6240_v15  ;;  %5633 = vmatpush3.bf16.msra.mxu1 %v6239_v14  ;;  %v198_v14 = vadd.s32 8, %v6677_v48 }
  0x22   : > { %5634 = vmatprep.subr.bf16.mxu1 %v6241_v16 }
  0x24   : > { %5615 = vmatpush3.bf16.msra.mxu0 %v6240_v15 }
  0x25   : > { %5616 = vmatprep.subr.bf16.mxu0 %v6242_v17  ;;  %5635 = vmatpush3.bf16.msra.mxu1 %v6241_v16  ;;  %v212_v16 = vand.u32 15, %v198_v14  ;;  %v6291_v14 = vld [vmem:[%s7789_s1 + $0x1f8] sm:$0xff]  }
  0x26   : > { %5636 = vmatprep.subr.bf16.mxu1 %v6243_v18 }
  0x27   : > { %vm262_vm4 = vcmp.ne.s32.totalorder %v212_v16, 15 }
  0x28   : > { %5617 = vmatpush3.bf16.msra.mxu0 %v6242_v17 }
  0x29   : > { %5637 = vmatpush3.bf16.msra.mxu1 %v6243_v18  ;;  %5642 = vmatprep.subr.bf16.mxu0 %v6244_v21 }
  0x2a   : > { %5662 = vmatprep.subr.bf16.mxu1 %v6252_v30 }
  0x2b   : > { %5619 = vmatmul.mubr.bf16.vlgmr.msra.gmra.mrb[0].mxu0 %v278_v22 }
  0x2c   : > { %5643 = vmatpush3.bf16.msra.mxu0 %v6244_v21  ;;  %5639 = vmatmul.mubr.bf16.vlgmr.msra.gmra.mrb[0].mxu1 %v278_v22 }
  0x2d   : > { %5644 = vmatprep.subr.bf16.mxu0 %v6245_v23  ;;  %5658 = vmatprep.mubr.bf16.mxu0 %v277_v13  ;;  %v200_v13 = vadd.s32 24, %v6677_v48 }
  0x2e   : > { %5663 = vmatpush3.bf16.msra.mxu1 %v6252_v30 }
  0x2f   : > { %5664 = vmatprep.subr.bf16.mxu1 %v6254_v32  ;;  %v226_v15 = vand.u32 15, %v200_v13  ;;  %v6290_v13 = vld [vmem:[%s7789_s1 + $0x1b8] sm:$0xff]  }
  0x30   : > { %5645 = vmatpush3.bf16.msra.mxu0 %v6245_v23 }
  0x31   : > { %5646 = vmatprep.subr.bf16.mxu0 %v6246_v24  ;;  %vm264_vm3 = vcmp.ne.s32.totalorder %v226_v15, 15  ;;  %v6812_v15 = vld [vmem:[%s7789_s1 + $0x200] sm:$0xff]  }
  0x32   : > { %5665 = vmatpush3.bf16.msra.mxu1 %v6254_v32 }
  0x33   : > { %5666 = vmatprep.subr.bf16.mxu1 %v6256_v34 }
  0x34   : > { %5647 = vmatpush3.bf16.msra.mxu0 %v6246_v24 }
  0x35   : > { %5648 = vmatprep.subr.bf16.mxu0 %v6247_v25 }
  0x36   : > { %5667 = vmatpush3.bf16.msra.mxu1 %v6256_v34 }
  0x37   : > { %5668 = vmatprep.subr.bf16.mxu1 %v6258_v36 }
  0x38   : > { %5649 = vmatpush3.bf16.msra.mxu0 %v6247_v25  ;;  %v6701_v25 = vsel %vm262_vm4, 1.0, %v6492_v61 }
  0x39   : > { %5650 = vmatprep.subr.bf16.mxu0 %v6248_v26 }
  0x3a   : > { %5669 = vmatpush3.bf16.msra.mxu1 %v6258_v36 }
  0x3b   : > { %5670 = vmatprep.subr.bf16.mxu1 %v6260_v38 }
  0x3c   : > { %5651 = vmatpush3.bf16.msra.mxu0 %v6248_v26 }
  0x3d   : > { %5652 = vmatprep.subr.bf16.mxu0 %v6249_v27 }
  0x3e   : > { %5671 = vmatpush3.bf16.msra.mxu1 %v6260_v38  ;;  %v4596_v38 = vld [vmem:[%s7791_s3] ss:$0 sm:$0xff] }
  0x3f   : > { %5672 = vmatprep.subr.bf16.mxu1 %v6262_v40 }
  0x40   : > { %5653 = vmatpush3.bf16.msra.mxu0 %v6249_v27 }
  0x41   : > { %5654 = vmatprep.subr.bf16.mxu0 %v6250_v28 }
  0x42   : > { %5673 = vmatpush3.bf16.msra.mxu1 %v6262_v40 }
  0x43   : > { %5674 = vmatprep.subr.bf16.mxu1 %v6264_v42 }
  0x44   : > { %5655 = vmatpush3.bf16.msra.mxu0 %v6250_v28 }
  0x45   : > { %5656 = vmatprep.subr.bf16.mxu0 %v6251_v29 }
  0x46   : > { %5675 = vmatpush3.bf16.msra.mxu1 %v6264_v42 }
  0x47   : > { %5676 = vmatprep.subr.bf16.mxu1 %v6266_v44 }
  0x48   : > { %5657 = vmatpush3.bf16.msra.mxu0 %v6251_v29  ;;  %v4595_v29 = vld [vmem:[%s7790_s2] ss:$0 sm:$0xff] }
  0x49   : > { %5682 = vmatprep.subr.bf16.mxu0 %v6253_v31 }
  0x4a   : > { %5677 = vmatpush3.bf16.msra.mxu1 %v6266_v44 }
  0x4b   : > { %5659 = vmatmul.mubr.bf16.vlgmr.msra.gmra.mrb[4].mxu0 %v278_v22  ;;  %5702 = vmatprep.subr.bf16.mxu1 %v6674_v46  ;;  %v6699_v22 = vsel %vm264_vm3, 1.0, %v6492_v61  ;;  %v6276_v61 = vld [vmem:[%s7789_s1 + $0x180] sm:$0xff]  }
  0x4c   : > { %5683 = vmatpush3.bf16.msra.mxu0 %v6253_v31 }
  0x4d   : > { %5684 = vmatprep.subr.bf16.mxu0 %v6255_v33 }
  0x50   : > { %5685 = vmatpush3.bf16.msra.mxu0 %v6255_v33 }
  0x51   : > { %5686 = vmatprep.subr.bf16.mxu0 %v6257_v35 }
  0x54   : > { %5687 = vmatpush3.bf16.msra.mxu0 %v6257_v35 }
  0x55   : > { %5688 = vmatprep.subr.bf16.mxu0 %v6259_v37 }
  0x58   : > { %5689 = vmatpush3.bf16.msra.mxu0 %v6259_v37 }
  0x59   : > { %5690 = vmatprep.subr.bf16.mxu0 %v6261_v39 }
  0x5c   : > { %5691 = vmatpush3.bf16.msra.mxu0 %v6261_v39 }
  0x5d   : > { %5692 = vmatprep.subr.bf16.mxu0 %v6263_v41 }
  0x60   : > { %5693 = vmatpush3.bf16.msra.mxu0 %v6263_v41 }
  0x61   : > { %5694 = vmatprep.subr.bf16.mxu0 %v6265_v43 }
  0x64   : > { %5695 = vmatpush3.bf16.msra.mxu0 %v6265_v43 }
  0x65   : > { %5696 = vmatprep.subr.bf16.mxu0 %v6267_v45 }
  0x68   : > { %5697 = vmatpush3.bf16.msra.mxu0 %v6267_v45 }
  0x69   : > { %5722 = vmatprep.subr.bf16.mxu0 %v6276_v61 }
  0xfe   : > { %v5620_v52 = vpop.f32.mrb[0].mxu0 }
  0xff   : > { %v622_v53 = vrot.slane %v5620_v52, 7  ;;  %v377_v54 = vpop.f32.mrb[1].mxu0  ;;  %v5640_v55 = vpop.f32.mrb[0].mxu1 }
 0x100   : > { %v620_v56 = vrot.slane %v377_v54, 7  ;;  %v5621_v57 = vpop.f32.mrb[2].mxu0  ;;  %v491_v58 = vpop.f32.mrb[1].mxu1 }
 0x101   : > { %v623_v59 = vrot.slane %v5621_v57, 7  ;;  %v380_v60 = vpop.f32.mrb[3].mxu0  ;;  %v5641_v63 = vpop.f32.mrb[2].mxu1  ;;  %v6271_v57 = vld [vmem:[%s7789_s1 + $0x158] sm:$0xff]  }
 0x102   : > { %v621_v0 = vrot.slane %v380_v60, 7  ;;  %v494_v2 = vpop.f32.mrb[3].mxu1  ;;  %v6275_v60 = vld [vmem:[%s7789_s1 + $0x178] sm:$0xff]  }
 0x103   : > { %v628_v3 = vsel %vm624_vm2, %v623_v59, %v620_v56  ;;  %v625_v4 = vsel %vm624_vm2, %v622_v53, %v623_v59  ;;  %v6274_v59 = vld [vmem:[%s7789_s1 + $0x170] sm:$0xff]  }
 0x104   : > { %v626_v5 = vsel %vm624_vm2, %v621_v0, %v622_v53  ;;  %v629_v6 = vmul.f32 %v6682_v62, %v628_v3  ;;  %v636_v7 = vadd.f32 %v5641_v63, %v625_v4  ;;  %v627_v8 = vsel %vm624_vm2, %v620_v56, %v621_v0  ;;  %v6270_v56 = vld [vmem:[%s7789_s1 + $0x150] sm:$0xff]   ;;  %v6277_v63 = vld [vmem:[%s7789_s1 + $0x1c0] sm:$0xff]   ;;  %v6278_v0 = vld [vmem:[%s7789_s1 + $0x188] sm:$0xff]  }
 0x105   : > { %v631_v9 = vmul.f32 %v6684_v1, %v626_v5  ;;  %v634_v10 = vadd.f32 %v627_v8, %v494_v2  ;;  %v6279_v2 = vld [vmem:[%s7789_s1 + $0x1c8] sm:$0xff]   ;;  %v6280_v3 = vld [vmem:[%s7789_s1 + $0x190] sm:$0xff]   ;;  %v6282_v5 = vld [vmem:[%s7789_s1 + $0x198] sm:$0xff]  }
 0x106   : > { %v633_v11 = vadd.f32 %v629_v6, %v491_v58  ;;  %v6272_v58 = vld [vmem:[%s7789_s1 + $0x160] sm:$0xff]   ;;  %v6281_v4 = vld [vmem:[%s7789_s1 + $0x1d0] sm:$0xff]   ;;  %v6283_v6 = vld [vmem:[%s7789_s1 + $0x1d8] sm:$0xff]  }
 0x107   : > { %v635_v12 = vadd.f32 %v5640_v55, %v631_v9  ;;  %v6269_v55 = vld [vmem:[%s7789_s1 + $0x148] sm:$0xff]   ;;  %v6285_v8 = vld [vmem:[%s7789_s1 + $0x1e0] sm:$0xff]  }
 0x108   : > { %v6286_v9 = vld [vmem:[%s7789_s1 + $0x1a8] sm:$0xff]  }
 0x11e   : > { %v5660_v17 = vpop.f32.mrb[4].mxu0 }
 0x11f   : > { %v605_v18 = vpop.f32.mrb[5].mxu0  ;;  %v639_v21 = vrot.slane %v5660_v17, 1 }
 0x120   : > { %v637_v19 = vrot.slane %v605_v18, 1  ;;  %v5661_v20 = vpop.f32.mrb[6].mxu0 }
 0x121   : > { %v640_v23 = vrot.slane %v5661_v20, 1  ;;  %v608_v24 = vpop.f32.mrb[7].mxu0 }
 0x122   : > { %v638_v26 = vrot.slane %v608_v24, 1 }
 0x123   : > { %v642_v27 = vsel %vm641_vm5, %v639_v21, %v640_v23  ;;  %v645_v28 = vsel %vm641_vm5, %v640_v23, %v637_v19 }
 0x124   : > { %v649_v30 = vmul.f32 %v6699_v22, %v645_v28  ;;  %v652_v31 = vadd.f32 %v642_v27, %v635_v12  ;;  %v643_v32 = vsel %vm641_vm5, %v638_v26, %v639_v21  ;;  %v644_v33 = vsel %vm641_vm5, %v637_v19, %v638_v26  ;;  %v6289_v12 = vld [vmem:[%s7789_s1 + $0x1f0] sm:$0xff]  }
 0x125   : > { %v647_v34 = vmul.f32 %v6701_v25, %v643_v32  ;;  %v650_v35 = vadd.f32 %v644_v33, %v633_v11  ;;  %v6288_v11 = vld [vmem:[%s7789_s1 + $0x1b0] sm:$0xff]  }
 0x126   : > { %v653_v36 = vadd.f32 %v649_v30, %v636_v7  ;;  %v663_v37 = vmul.f32 %v4595_v29, %v652_v31  ;;  %v6284_v7 = vld [vmem:[%s7789_s1 + $0x1a0] sm:$0xff]  }
 0x127   : > { %v651_v39 = vadd.f32 %v647_v34, %v634_v10  ;;  %v661_v40 = vmul.f32 %v4595_v29, %v650_v35  ;;  %v6287_v10 = vld [vmem:[%s7789_s1 + $0x1e8] sm:$0xff]  }
 0x128   : > { %v664_v41 = vmul.f32 %v4595_v29, %v653_v36  ;;  %v6721_v44 = vadd.f32 %v4596_v38, %v663_v37 }
 0x129   : > { %v662_v42 = vmul.f32 %v4595_v29, %v651_v39  ;;  %v6719_v43 = vadd.f32 %v4596_v38, %v661_v40 }
 0x12a   : > { %v6723_v45 = vadd.f32 %v4596_v38, %v664_v41  ;;  %v678_v52 = vmax.f32 %v6721_v44, 0.0 }
 0x12b   : > { %v6725_v47 = vadd.f32 %v4596_v38, %v662_v42  ;;  %v676_v50 = vmax.f32 %v6719_v43, 0.0 }
 0x12c   : > { %v679_v49 = vmax.f32 %v6723_v45, 0.0 }
 0x12d   : > { %v677_v51 = vmax.f32 %v6725_v47, 0.0  ;;  %v6293_v47 = vld [vmem:[%s7789_s1 + $0x208] sm:$0xff]  }
 0x12e   : > { %v681_v54 = vpack.c.bf16 %v679_v49, %v678_v52 }
 0x12f   : > { %v680_v53 = vpack.c.bf16 %v677_v51, %v676_v50 }
 0x131   : > { %5678 = vmatprep.mubr.bf16.mxu1 %v680_v53  ;;  %5698 = vmatprep.mubr.bf16.mxu0 %v680_v53 }
 0x132   : > { %5679 = vmatmul.mubr.bf16.vlgmr.msra.gmra.mrb[4].mxu1 %v681_v54  ;;  %5699 = vmatmul.mubr.bf16.vlgmr.msra.gmra.mrb[8].mxu0 %v681_v54 }
 0x133   : > { %5703 = vmatpush3.bf16.msra.mxu1 %v6674_v46  ;;  %5718 = vmatprep.mubr.bf16.mxu1 %v680_v53  ;;  %v6273_v46 = vld [vmem:[%s7789_s1 + $0x168] sm:$0xff]  }
 0x134   : > { %5704 = vmatprep.subr.bf16.mxu1 %v6269_v55  ;;  %5723 = vmatpush3.bf16.msra.mxu0 %v6276_v61 }
 0x135   : > { %5724 = vmatprep.subr.bf16.mxu0 %v6278_v0 }
 0x137   : > { %5705 = vmatpush3.bf16.msra.mxu1 %v6269_v55 }
 0x138   : > { %5706 = vmatprep.subr.bf16.mxu1 %v6270_v56  ;;  %5725 = vmatpush3.bf16.msra.mxu0 %v6278_v0 }
 0x139   : > { %5726 = vmatprep.subr.bf16.mxu0 %v6280_v3 }
 0x13b   : > { %5707 = vmatpush3.bf16.msra.mxu1 %v6270_v56 }
 0x13c   : > { %5708 = vmatprep.subr.bf16.mxu1 %v6271_v57  ;;  %5727 = vmatpush3.bf16.msra.mxu0 %v6280_v3 }
 0x13d   : > { %5728 = vmatprep.subr.bf16.mxu0 %v6282_v5 }
 0x13f   : > { %5709 = vmatpush3.bf16.msra.mxu1 %v6271_v57 }
 0x140   : > { %5710 = vmatprep.subr.bf16.mxu1 %v6272_v58  ;;  %5729 = vmatpush3.bf16.msra.mxu0 %v6282_v5 }
 0x141   : > { %5730 = vmatprep.subr.bf16.mxu0 %v6284_v7 }
 0x143   : > { %5711 = vmatpush3.bf16.msra.mxu1 %v6272_v58 }
 0x144   : > { %5712 = vmatprep.subr.bf16.mxu1 %v6273_v46  ;;  %5731 = vmatpush3.bf16.msra.mxu0 %v6284_v7 }
 0x145   : > { %5732 = vmatprep.subr.bf16.mxu0 %v6286_v9 }
 0x147   : > { %5713 = vmatpush3.bf16.msra.mxu1 %v6273_v46 }
 0x148   : > { %5714 = vmatprep.subr.bf16.mxu1 %v6274_v59  ;;  %5733 = vmatpush3.bf16.msra.mxu0 %v6286_v9 }
 0x149   : > { %5734 = vmatprep.subr.bf16.mxu0 %v6288_v11 }
 0x14b   : > { %5715 = vmatpush3.bf16.msra.mxu1 %v6274_v59  ;;  %v4670_v59 = vld [vmem:[%s7790_s2 + $0x1] ss:$0 sm:$0xff] }
 0x14c   : > { %5716 = vmatprep.subr.bf16.mxu1 %v6275_v60  ;;  %5735 = vmatpush3.bf16.msra.mxu0 %v6288_v11 }
 0x14d   : > { %5736 = vmatprep.subr.bf16.mxu0 %v6290_v13 }
 0x14f   : > { %5717 = vmatpush3.bf16.msra.mxu1 %v6275_v60 }
 0x150   : > { %5742 = vmatprep.subr.bf16.mxu1 %v6277_v63  ;;  %5737 = vmatpush3.bf16.msra.mxu0 %v6290_v13 }
 0x151   : > { %5762 = vmatprep.subr.bf16.mxu0 %v6812_v15 }
 0x152   : > { %5719 = vmatmul.mubr.bf16.vlgmr.msra.gmra.mrb[8].mxu1 %v681_v54 }
 0x153   : > { %5743 = vmatpush3.bf16.msra.mxu1 %v6277_v63 }
 0x154   : > { %5744 = vmatprep.subr.bf16.mxu1 %v6279_v2 }
 0x157   : > { %5745 = vmatpush3.bf16.msra.mxu1 %v6279_v2  ;;  %v4672_v2 = vld [vmem:[%s7791_s3 + $0x1] ss:$0 sm:$0xff] }
 0x158   : > { %5746 = vmatprep.subr.bf16.mxu1 %v6281_v4 }
 0x15b   : > { %5747 = vmatpush3.bf16.msra.mxu1 %v6281_v4 }
 0x15c   : > { %5748 = vmatprep.subr.bf16.mxu1 %v6283_v6 }
 0x15f   : > { %5749 = vmatpush3.bf16.msra.mxu1 %v6283_v6 }
 0x160   : > { %5750 = vmatprep.subr.bf16.mxu1 %v6285_v8 }
 0x163   : > { %5751 = vmatpush3.bf16.msra.mxu1 %v6285_v8 }
 0x164   : > { %5752 = vmatprep.subr.bf16.mxu1 %v6287_v10 }
 0x167   : > { %5753 = vmatpush3.bf16.msra.mxu1 %v6287_v10 }
 0x168   : > { %5754 = vmatprep.subr.bf16.mxu1 %v6289_v12 }
 0x16b   : > { %5755 = vmatpush3.bf16.msra.mxu1 %v6289_v12 }
 0x16c   : > { %5756 = vmatprep.subr.bf16.mxu1 %v6291_v14 }
 0x16f   : > { %5757 = vmatpush3.bf16.msra.mxu1 %v6291_v14 }
 0x205   : > { %v5680_v16 = vpop.f32.mrb[4].mxu1  ;;  %v5700_v17 = vpop.f32.mrb[8].mxu0 }
 0x206   : > { %v781_v18 = vpop.f32.mrb[5].mxu1  ;;  %v895_v19 = vpop.f32.mrb[9].mxu0  ;;  %v1026_v24 = vrot.slane %v5680_v16, 7 }
 0x207   : > { %v1024_v20 = vrot.slane %v781_v18, 7  ;;  %v5681_v21 = vpop.f32.mrb[6].mxu1  ;;  %v5701_v23 = vpop.f32.mrb[10].mxu0 }
 0x208   : > { %v1027_v26 = vrot.slane %v5681_v21, 7  ;;  %v784_v27 = vpop.f32.mrb[7].mxu1  ;;  %v898_v28 = vpop.f32.mrb[11].mxu0 }
 0x209   : > { %v1025_v29 = vrot.slane %v784_v27, 7  ;;  %v6301_v27 = vld [vmem:[%s7789_s1 + $0x280] sm:$0xff]  }
 0x20a   : > { %v1031_v30 = vsel %vm624_vm2, %v1027_v26, %v1024_v20  ;;  %v1028_v31 = vsel %vm624_vm2, %v1026_v24, %v1027_v26  ;;  %v6300_v26 = vld [vmem:[%s7789_s1 + $0x240] sm:$0xff]  }
 0x20b   : > { %v1032_v32 = vmul.f32 %v6682_v62, %v1031_v30  ;;  %v1039_v33 = vadd.f32 %v5701_v23, %v1028_v31  ;;  %v1029_v34 = vsel %vm624_vm2, %v1025_v29, %v1026_v24  ;;  %v1030_v35 = vsel %vm624_vm2, %v1024_v20, %v1025_v29  ;;  %v6299_v24 = vld [vmem:[%s7789_s1 + $0x238] sm:$0xff]   ;;  %v6303_v29 = vld [vmem:[%s7789_s1 + $0x288] sm:$0xff]   ;;  %5782 = vmatprep.subr.bf16.mxu1 %v6300_v26  ;;  %v6304_v30 = vld [vmem:[%s7789_s1 + $0x250] sm:$0xff]  }
 0x20c   : > { %v1034_v36 = vmul.f32 %v6684_v1, %v1029_v34  ;;  %v1037_v37 = vadd.f32 %v1030_v35, %v898_v28  ;;  %v6302_v28 = vld [vmem:[%s7789_s1 + $0x248] sm:$0xff]   ;;  %v6305_v31 = vld [vmem:[%s7789_s1 + $0x290] sm:$0xff]   ;;  %v6308_v34 = vld [vmem:[%s7789_s1 + $0x260] sm:$0xff]  }
 0x20d   : > { %v1036_v38 = vadd.f32 %v1032_v32, %v895_v19  ;;  %v6306_v32 = vld [vmem:[%s7789_s1 + $0x258] sm:$0xff]   ;;  %v6309_v35 = vld [vmem:[%s7789_s1 + $0x2a0] sm:$0xff]  }
 0x20e   : > { %v1038_v39 = vadd.f32 %v5700_v17, %v1034_v36  ;;  %v6310_v36 = vld [vmem:[%s7789_s1 + $0x268] sm:$0xff]  }
 0x225   : > { %v5720_v40 = vpop.f32.mrb[8].mxu1 }
 0x226   : > { %v1009_v41 = vpop.f32.mrb[9].mxu1  ;;  %v1042_v54 = vrot.slane %v5720_v40, 1  ;;  %v6314_v40 = vld [vmem:[%s7789_s1 + $0x278] sm:$0xff]  }
 0x227   : > { %v1040_v42 = vrot.slane %v1009_v41, 1  ;;  %v5721_v53 = vpop.f32.mrb[10].mxu1  ;;  %v6315_v41 = vld [vmem:[%s7789_s1 + $0x2b8] sm:$0xff]  }
 0x228   : > { %v1043_v55 = vrot.slane %v5721_v53, 1  ;;  %v1012_v56 = vpop.f32.mrb[11].mxu1 }
 0x229   : > { %v1041_v57 = vrot.slane %v1012_v56, 1 }
 0x22a   : > { %v1044_v58 = vsel %vm641_vm5, %v1042_v54, %v1043_v55  ;;  %v1047_v46 = vsel %vm641_vm5, %v1043_v55, %v1040_v42 }
 0x22b   : > { %v1051_v60 = vmul.f32 %v6699_v22, %v1047_v46  ;;  %v1054_v61 = vadd.f32 %v1044_v58, %v1038_v39  ;;  %v1045_v63 = vsel %vm641_vm5, %v1041_v57, %v1042_v54  ;;  %v1046_v0 = vsel %vm641_vm5, %v1040_v42, %v1041_v57  ;;  %v6313_v39 = vld [vmem:[%s7789_s1 + $0x2b0] sm:$0xff]   ;;  %v6316_v42 = vld [vmem:[%s7789_s1 + $0x2c0] sm:$0xff]  }
 0x22c   : > { %v1049_v3 = vmul.f32 %v6701_v25, %v1045_v63  ;;  %v1052_v4 = vadd.f32 %v1046_v0, %v1036_v38  ;;  %v6312_v38 = vld [vmem:[%s7789_s1 + $0x270] sm:$0xff]  }
 0x22d   : > { %v1055_v5 = vadd.f32 %v1051_v60, %v1039_v33  ;;  %v1066_v6 = vmul.f32 %v4670_v59, %v1054_v61  ;;  %v6307_v33 = vld [vmem:[%s7789_s1 + $0x298] sm:$0xff]  }
 0x22e   : > { %v1053_v7 = vadd.f32 %v1049_v3, %v1037_v37  ;;  %v1064_v8 = vmul.f32 %v4670_v59, %v1052_v4  ;;  %v6311_v37 = vld [vmem:[%s7789_s1 + $0x2a8] sm:$0xff]  }
 0x22f   : > { %v1067_v9 = vmul.f32 %v4670_v59, %v1055_v5  ;;  %v1078_v10 = vadd.f32 %v4672_v2, %v1066_v6 }
 0x230   : > { %v1065_v11 = vmul.f32 %v4670_v59, %v1053_v7  ;;  %v1076_v12 = vadd.f32 %v4672_v2, %v1064_v8 }
 0x231   : > { %v1079_v13 = vadd.f32 %v4672_v2, %v1067_v9  ;;  %v1082_v14 = vadd.f32 %v1078_v10, %v678_v52  ;;  %v6297_v52 = vld [vmem:[%s7789_s1 + $0x228] sm:$0xff]  }
 0x232   : > { %v1077_v16 = vadd.f32 %v4672_v2, %v1065_v11  ;;  %v1080_v17 = vadd.f32 %v1076_v12, %v676_v50  ;;  %v6295_v50 = vld [vmem:[%s7789_s1 + $0x218] sm:$0xff]  }
 0x233   : > { %v1083_v18 = vadd.f32 %v1079_v13, %v679_v49  ;;  %v1086_v19 = vmax.f32 %v1082_v14, 0.0  ;;  %v6294_v49 = vld [vmem:[%s7789_s1 + $0x210] sm:$0xff]  }
 0x234   : > { %v1081_v20 = vadd.f32 %v1077_v16, %v677_v51  ;;  %v1084_v21 = vmax.f32 %v1080_v17, 0.0  ;;  %v6296_v51 = vld [vmem:[%s7789_s1 + $0x220] sm:$0xff]  }
 0x235   : > { %v1087_v23 = vmax.f32 %v1083_v18, 0.0  ;;  %1090 = vst [vmem:[%s6850_s15 + $0x10] sm:$0xff] %v1086_v19 }
 0x236   : > { %v1085_v44 = vmax.f32 %v1081_v20, 0.0  ;;  %1088 = vst [vmem:[%s6850_s15] sm:$0xff] %v1084_v21 }
 0x237   : > { %1091 = vst [vmem:[%s6850_s15 + $0x18] sm:$0xff] %v1087_v23  ;;  %v1093_v43 = vpack.c.bf16 %v1087_v23, %v1086_v19 }
 0x238   : > { %1089 = vst [vmem:[%s6850_s15 + $0x8] sm:$0xff] %v1085_v44  ;;  %v1092_v45 = vpack.c.bf16 %v1085_v44, %v1084_v21  ;;  %v4746_v44 = vld [vmem:[%s7790_s2 + $0x2] ss:$0 sm:$0xff] }
 0x23a   : > { %5738 = vmatprep.mubr.bf16.mxu0 %v1092_v45  ;;  %5758 = vmatprep.mubr.bf16.mxu1 %v1092_v45 }
 0x23b   : > { %5739 = vmatmul.mubr.bf16.vlgmr.msra.gmra.mrb[12].mxu0 %v1093_v43  ;;  %5759 = vmatmul.mubr.bf16.vlgmr.msra.gmra.mrb[12].mxu1 %v1093_v43 }
 0x23c   : > { %5763 = vmatpush3.bf16.msra.mxu0 %v6812_v15  ;;  %5778 = vmatprep.mubr.bf16.mxu0 %v1092_v45  ;;  %v6298_v15 = vld [vmem:[%s7789_s1 + $0x230] sm:$0xff]  }
 0x23d   : > { %5764 = vmatprep.subr.bf16.mxu0 %v6293_v47  ;;  %5783 = vmatpush3.bf16.msra.mxu1 %v6300_v26 }
 0x23e   : > { %5784 = vmatprep.subr.bf16.mxu1 %v6302_v28 }
 0x240   : > { %5765 = vmatpush3.bf16.msra.mxu0 %v6293_v47 }
 0x241   : > { %5766 = vmatprep.subr.bf16.mxu0 %v6294_v49  ;;  %5785 = vmatpush3.bf16.msra.mxu1 %v6302_v28 }
 0x242   : > { %5786 = vmatprep.subr.bf16.mxu1 %v6304_v30 }
 0x244   : > { %5767 = vmatpush3.bf16.msra.mxu0 %v6294_v49 }
 0x245   : > { %5768 = vmatprep.subr.bf16.mxu0 %v6295_v50  ;;  %5787 = vmatpush3.bf16.msra.mxu1 %v6304_v30 }
 0x246   : > { %5788 = vmatprep.subr.bf16.mxu1 %v6306_v32 }
 0x248   : > { %5769 = vmatpush3.bf16.msra.mxu0 %v6295_v50 }
 0x249   : > { %5770 = vmatprep.subr.bf16.mxu0 %v6296_v51  ;;  %5789 = vmatpush3.bf16.msra.mxu1 %v6306_v32 }
 0x24a   : > { %5790 = vmatprep.subr.bf16.mxu1 %v6308_v34 }
 0x24c   : > { %5771 = vmatpush3.bf16.msra.mxu0 %v6296_v51 }
 0x24d   : > { %5772 = vmatprep.subr.bf16.mxu0 %v6297_v52  ;;  %5791 = vmatpush3.bf16.msra.mxu1 %v6308_v34 }
 0x24e   : > { %5792 = vmatprep.subr.bf16.mxu1 %v6310_v36 }
 0x250   : > { %5773 = vmatpush3.bf16.msra.mxu0 %v6297_v52 }
 0x251   : > { %5774 = vmatprep.subr.bf16.mxu0 %v6298_v15  ;;  %5793 = vmatpush3.bf16.msra.mxu1 %v6310_v36 }
 0x252   : > { %5794 = vmatprep.subr.bf16.mxu1 %v6312_v38 }
 0x254   : > { %5775 = vmatpush3.bf16.msra.mxu0 %v6298_v15 }
 0x255   : > { %5776 = vmatprep.subr.bf16.mxu0 %v6299_v24  ;;  %5795 = vmatpush3.bf16.msra.mxu1 %v6312_v38 }
 0x256   : > { %5796 = vmatprep.subr.bf16.mxu1 %v6314_v40 }
 0x258   : > { %5777 = vmatpush3.bf16.msra.mxu0 %v6299_v24  ;;  %v4748_v24 = vld [vmem:[%s7791_s3 + $0x2] ss:$0 sm:$0xff] }
 0x259   : > { %5802 = vmatprep.subr.bf16.mxu0 %v6301_v27  ;;  %5797 = vmatpush3.bf16.msra.mxu1 %v6314_v40  ;;  %v6317_v40 = vld [vmem:[%s7789_s1 + $0x2c8] sm:$0xff]  }
 0x25a   : > { %5822 = vmatprep.subr.bf16.mxu1 %v6316_v42 }
 0x25b   : > { %5779 = vmatmul.mubr.bf16.vlgmr.msra.gmra.mrb[16].mxu0 %v1093_v43 }
 0x25c   : > { %5803 = vmatpush3.bf16.msra.mxu0 %v6301_v27 }
 0x25d   : > { %5804 = vmatprep.subr.bf16.mxu0 %v6303_v29 }
 0x260   : > { %5805 = vmatpush3.bf16.msra.mxu0 %v6303_v29 }
 0x261   : > { %5806 = vmatprep.subr.bf16.mxu0 %v6305_v31 }
 0x264   : > { %5807 = vmatpush3.bf16.msra.mxu0 %v6305_v31 }
 0x265   : > { %5808 = vmatprep.subr.bf16.mxu0 %v6307_v33 }
 0x268   : > { %5809 = vmatpush3.bf16.msra.mxu0 %v6307_v33 }
 0x269   : > { %5810 = vmatprep.subr.bf16.mxu0 %v6309_v35 }
 0x26c   : > { %5811 = vmatpush3.bf16.msra.mxu0 %v6309_v35 }
 0x26d   : > { %5812 = vmatprep.subr.bf16.mxu0 %v6311_v37 }
 0x270   : > { %5813 = vmatpush3.bf16.msra.mxu0 %v6311_v37 }
 0x271   : > { %5814 = vmatprep.subr.bf16.mxu0 %v6313_v39 }
 0x274   : > { %5815 = vmatpush3.bf16.msra.mxu0 %v6313_v39 }
 0x275   : > { %5816 = vmatprep.subr.bf16.mxu0 %v6315_v41 }
 0x278   : > { %5817 = vmatpush3.bf16.msra.mxu0 %v6315_v41  ;;  %v6318_v41 = vld [vmem:[%s7789_s1 + $0x2d0] sm:$0xff]  }
 0x30e   : > { %v5740_v53 = vpop.f32.mrb[12].mxu0  ;;  %v5760_v54 = vpop.f32.mrb[12].mxu1 }
 0x30f   : > { %v1193_v55 = vpop.f32.mrb[13].mxu0  ;;  %v1307_v56 = vpop.f32.mrb[13].mxu1  ;;  %v1438_v59 = vrot.slane %v5740_v53, 7  ;;  %v6319_v53 = vld [vmem:[%s7789_s1 + $0x2d8] sm:$0xff]  }
 0x310   : > { %v1436_v57 = vrot.slane %v1193_v55, 7  ;;  %v5741_v58 = vpop.f32.mrb[14].mxu0  ;;  %v5761_v46 = vpop.f32.mrb[14].mxu1  ;;  %v6322_v55 = vld [vmem:[%s7789_s1 + $0x2f0] sm:$0xff]  }
 0x311   : > { %v1439_v60 = vrot.slane %v5741_v58, 7  ;;  %v1196_v61 = vpop.f32.mrb[15].mxu0  ;;  %v1310_v63 = vpop.f32.mrb[15].mxu1  ;;  %v6325_v58 = vld [vmem:[%s7789_s1 + $0x340] sm:$0xff]  }
 0x312   : > { %v1437_v0 = vrot.slane %v1196_v61, 7  ;;  %v6329_v61 = vld [vmem:[%s7789_s1 + $0x350] sm:$0xff]  }
 0x313   : > { %v1443_v2 = vsel %vm624_vm2, %v1439_v60, %v1436_v57  ;;  %v1440_v3 = vsel %vm624_vm2, %v1438_v59, %v1439_v60  ;;  %v6328_v60 = vld [vmem:[%s7789_s1 + $0x310] sm:$0xff]  }
 0x314   : > { %v1444_v4 = vmul.f32 %v6682_v62, %v1443_v2  ;;  %v1451_v5 = vadd.f32 %v5761_v46, %v1440_v3  ;;  %v1441_v6 = vsel %vm624_vm2, %v1437_v0, %v1438_v59  ;;  %v1442_v7 = vsel %vm624_vm2, %v1436_v57, %v1437_v0  ;;  %v6324_v57 = vld [vmem:[%s7789_s1 + $0x300] sm:$0xff]   ;;  %v6326_v46 = vld [vmem:[%s7789_s1 + $0x308] sm:$0xff]   ;;  %v6331_v0 = vld [vmem:[%s7789_s1 + $0x358] sm:$0xff]  }
 0x315   : > { %v1446_v8 = vmul.f32 %v6684_v1, %v1441_v6  ;;  %v1449_v9 = vadd.f32 %v1442_v7, %v1310_v63  ;;  %v6327_v59 = vld [vmem:[%s7789_s1 + $0x348] sm:$0xff]   ;;  %5842 = vmatprep.subr.bf16.mxu0 %v6324_v57  ;;  %v6330_v63 = vld [vmem:[%s7789_s1 + $0x318] sm:$0xff]   ;;  %v6332_v2 = vld [vmem:[%s7789_s1 + $0x320] sm:$0xff]  }
 0x316   : > { %v1448_v10 = vadd.f32 %v1444_v4, %v1307_v56  ;;  %v6323_v56 = vld [vmem:[%s7789_s1 + $0x2f8] sm:$0xff]   ;;  %v6333_v3 = vld [vmem:[%s7789_s1 + $0x360] sm:$0xff]   ;;  %v6334_v4 = vld [vmem:[%s7789_s1 + $0x328] sm:$0xff]  }
 0x317   : > { %v1450_v11 = vadd.f32 %v5760_v54, %v1446_v8  ;;  %v6320_v54 = vld [vmem:[%s7789_s1 + $0x2e0] sm:$0xff]   ;;  %v6336_v6 = vld [vmem:[%s7789_s1 + $0x330] sm:$0xff]   ;;  %v6338_v8 = vld [vmem:[%s7789_s1 + $0x338] sm:$0xff]  }
 0x318   : > { %v6337_v7 = vld [vmem:[%s7789_s1 + $0x370] sm:$0xff]  }
 0x32e   : > { %v5780_v12 = vpop.f32.mrb[16].mxu0 }
 0x32f   : > { %v1421_v13 = vpop.f32.mrb[17].mxu0  ;;  %v1454_v17 = vrot.slane %v5780_v12, 1 }
 0x330   : > { %v1452_v14 = vrot.slane %v1421_v13, 1  ;;  %v5781_v16 = vpop.f32.mrb[18].mxu0 }
 0x331   : > { %v1455_v18 = vrot.slane %v5781_v16, 1  ;;  %v1424_v19 = vpop.f32.mrb[19].mxu0 }
 0x332   : > { %v1453_v20 = vrot.slane %v1424_v19, 1 }
 0x333   : > { %v1456_v21 = vsel %vm641_vm5, %v1454_v17, %v1455_v18  ;;  %v1459_v23 = vsel %vm641_vm5, %v1455_v18, %v1452_v14 }
 0x334   : > { %v1463_v43 = vmul.f32 %v6699_v22, %v1459_v23  ;;  %v1466_v45 = vadd.f32 %v1456_v21, %v1450_v11  ;;  %v1457_v47 = vsel %vm641_vm5, %v1453_v20, %v1454_v17  ;;  %v1458_v49 = vsel %vm641_vm5, %v1452_v14, %v1453_v20 }
 0x335   : > { %v1461_v50 = vmul.f32 %v6701_v25, %v1457_v47  ;;  %v1464_v51 = vadd.f32 %v1458_v49, %v1448_v10  ;;  %v7047_v10 = vld [vmem:[%s7789_s1 + $0x380] sm:$0xff]  }
 0x336   : > { %v1467_v52 = vadd.f32 %v1463_v43, %v1451_v5  ;;  %v1478_v15 = vmul.f32 %v4746_v44, %v1466_v45  ;;  %v6335_v5 = vld [vmem:[%s7789_s1 + $0x368] sm:$0xff]  }
 0x337   : > { %v1465_v26 = vadd.f32 %v1461_v50, %v1449_v9  ;;  %v1476_v27 = vmul.f32 %v4746_v44, %v1464_v51  ;;  %v6339_v9 = vld [vmem:[%s7789_s1 + $0x378] sm:$0xff]  }
 0x338   : > { %v1479_v28 = vmul.f32 %v4746_v44, %v1467_v52  ;;  %v6957_v31 = vadd.f32 %v4748_v24, %v1478_v15 }
 0x339   : > { %v1477_v29 = vmul.f32 %v4746_v44, %v1465_v26  ;;  %v6955_v30 = vadd.f32 %v4748_v24, %v1476_v27 }
 0x33a   : > { %v6959_v32 = vadd.f32 %v4748_v24, %v1479_v28  ;;  %v1494_v37 = vmax.f32 %v6957_v31, 0.0 }
 0x33b   : > { %v6961_v33 = vadd.f32 %v4748_v24, %v1477_v29  ;;  %v1492_v35 = vmax.f32 %v6955_v30, 0.0  ;;  %v6341_v30 = vld [vmem:[%s7789_s1 + $0x388] sm:$0xff]  }
 0x33c   : > { %v1495_v34 = vmax.f32 %v6959_v32, 0.0  ;;  %v6342_v32 = vld [vmem:[%s7789_s1 + $0x390] sm:$0xff]  }
 0x33d   : > { %v1493_v36 = vmax.f32 %v6961_v33, 0.0  ;;  %v6343_v33 = vld [vmem:[%s7789_s1 + $0x398] sm:$0xff]  }
 0x33e   : > { %v1497_v39 = vpack.c.bf16 %v1495_v34, %v1494_v37 }
 0x33f   : > { %v1496_v38 = vpack.c.bf16 %v1493_v36, %v1492_v35 }
 0x341   : > { %5798 = vmatprep.mubr.bf16.mxu1 %v1496_v38  ;;  %5818 = vmatprep.mubr.bf16.mxu0 %v1496_v38 }
 0x342   : > { %5799 = vmatmul.mubr.bf16.vlgmr.msra.gmra.mrb[16].mxu1 %v1497_v39  ;;  %5819 = vmatmul.mubr.bf16.vlgmr.msra.gmra.mrb[20].mxu0 %v1497_v39 }
 0x343   : > { %5823 = vmatpush3.bf16.msra.mxu1 %v6316_v42  ;;  %5838 = vmatprep.mubr.bf16.mxu1 %v1496_v38  ;;  %v6321_v42 = vld [vmem:[%s7789_s1 + $0x2e8] sm:$0xff]  }
 0x344   : > { %5824 = vmatprep.subr.bf16.mxu1 %v6317_v40  ;;  %5843 = vmatpush3.bf16.msra.mxu0 %v6324_v57 }
 0x345   : > { %5844 = vmatprep.subr.bf16.mxu0 %v6326_v46 }
 0x347   : > { %5825 = vmatpush3.bf16.msra.mxu1 %v6317_v40 }
 0x348   : > { %5826 = vmatprep.subr.bf16.mxu1 %v6318_v41  ;;  %5845 = vmatpush3.bf16.msra.mxu0 %v6326_v46 }
 0x349   : > { %5846 = vmatprep.subr.bf16.mxu0 %v6328_v60 }
 0x34b   : > { %5827 = vmatpush3.bf16.msra.mxu1 %v6318_v41 }
 0x34c   : > { %5828 = vmatprep.subr.bf16.mxu1 %v6319_v53  ;;  %5847 = vmatpush3.bf16.msra.mxu0 %v6328_v60 }
 0x34d   : > { %5848 = vmatprep.subr.bf16.mxu0 %v6330_v63 }
 0x34f   : > { %5829 = vmatpush3.bf16.msra.mxu1 %v6319_v53 }
 0x350   : > { %5830 = vmatprep.subr.bf16.mxu1 %v6320_v54  ;;  %5849 = vmatpush3.bf16.msra.mxu0 %v6330_v63 }
 0x351   : > { %5850 = vmatprep.subr.bf16.mxu0 %v6332_v2 }
 0x353   : > { %5831 = vmatpush3.bf16.msra.mxu1 %v6320_v54 }
 0x354   : > { %5832 = vmatprep.subr.bf16.mxu1 %v6321_v42  ;;  %5851 = vmatpush3.bf16.msra.mxu0 %v6332_v2 }
 0x355   : > { %5852 = vmatprep.subr.bf16.mxu0 %v6334_v4 }
 0x357   : > { %5833 = vmatpush3.bf16.msra.mxu1 %v6321_v42 }
 0x358   : > { %5834 = vmatprep.subr.bf16.mxu1 %v6322_v55  ;;  %5853 = vmatpush3.bf16.msra.mxu0 %v6334_v4 }
 0x359   : > { %5854 = vmatprep.subr.bf16.mxu0 %v6336_v6 }
 0x35b   : > { %5835 = vmatpush3.bf16.msra.mxu1 %v6322_v55  ;;  %v4822_v55 = vld [vmem:[%s7790_s2 + $0x3] ss:$0 sm:$0xff] }
 0x35c   : > { %5836 = vmatprep.subr.bf16.mxu1 %v6323_v56  ;;  %5855 = vmatpush3.bf16.msra.mxu0 %v6336_v6 }
 0x35d   : > { %5856 = vmatprep.subr.bf16.mxu0 %v6338_v8 }
 0x35f   : > { %5837 = vmatpush3.bf16.msra.mxu1 %v6323_v56 }
 0x360   : > { %5862 = vmatprep.subr.bf16.mxu1 %v6325_v58  ;;  %5857 = vmatpush3.bf16.msra.mxu0 %v6338_v8 }
 0x361   : > { %5882 = vmatprep.subr.bf16.mxu0 %v7047_v10 }
 0x362   : > { %5839 = vmatmul.mubr.bf16.vlgmr.msra.gmra.mrb[20].mxu1 %v1497_v39 }
 0x363   : > { %5863 = vmatpush3.bf16.msra.mxu1 %v6325_v58 }
 0x364   : > { %5864 = vmatprep.subr.bf16.mxu1 %v6327_v59 }
 0x367   : > { %5865 = vmatpush3.bf16.msra.mxu1 %v6327_v59  ;;  %v4824_v59 = vld [vmem:[%s7791_s3 + $0x3] ss:$0 sm:$0xff] }
 0x368   : > { %5866 = vmatprep.subr.bf16.mxu1 %v6329_v61 }
 0x36b   : > { %5867 = vmatpush3.bf16.msra.mxu1 %v6329_v61 }
 0x36c   : > { %5868 = vmatprep.subr.bf16.mxu1 %v6331_v0 }
 0x36f   : > { %5869 = vmatpush3.bf16.msra.mxu1 %v6331_v0 }
 0x370   : > { %5870 = vmatprep.subr.bf16.mxu1 %v6333_v3 }
 0x373   : > { %5871 = vmatpush3.bf16.msra.mxu1 %v6333_v3 }
 0x374   : > { %5872 = vmatprep.subr.bf16.mxu1 %v6335_v5 }
 0x377   : > { %5873 = vmatpush3.bf16.msra.mxu1 %v6335_v5 }
 0x378   : > { %5874 = vmatprep.subr.bf16.mxu1 %v6337_v7 }
 0x37b   : > { %5875 = vmatpush3.bf16.msra.mxu1 %v6337_v7 }
 0x37c   : > { %5876 = vmatprep.subr.bf16.mxu1 %v6339_v9 }
 0x37f   : > { %5877 = vmatpush3.bf16.msra.mxu1 %v6339_v9 }
 0x415   : > { %v5800_v11 = vpop.f32.mrb[16].mxu1  ;;  %v5820_v12 = vpop.f32.mrb[20].mxu0 }
 0x416   : > { %v1597_v13 = vpop.f32.mrb[17].mxu1  ;;  %v1711_v14 = vpop.f32.mrb[21].mxu0  ;;  %v1842_v19 = vrot.slane %v5800_v11, 7 }
 0x417   : > { %v1840_v16 = vrot.slane %v1597_v13, 7  ;;  %v5801_v17 = vpop.f32.mrb[18].mxu1  ;;  %v5821_v18 = vpop.f32.mrb[22].mxu0 }
 0x418   : > { %v1843_v20 = vrot.slane %v5801_v17, 7  ;;  %v1600_v21 = vpop.f32.mrb[19].mxu1  ;;  %v1714_v23 = vpop.f32.mrb[23].mxu0 }
 0x419   : > { %v1841_v44 = vrot.slane %v1600_v21, 7  ;;  %v6349_v21 = vld [vmem:[%s7789_s1 + $0x400] sm:$0xff]  }
 0x41a   : > { %v1847_v43 = vsel %vm624_vm2, %v1843_v20, %v1840_v16  ;;  %v1844_v45 = vsel %vm624_vm2, %v1842_v19, %v1843_v20 }
 0x41b   : > { %v1848_v47 = vmul.f32 %v6682_v62, %v1847_v43  ;;  %v1855_v49 = vadd.f32 %v5821_v18, %v1844_v45  ;;  %v1845_v50 = vsel %vm624_vm2, %v1841_v44, %v1842_v19  ;;  %v1846_v51 = vsel %vm624_vm2, %v1840_v16, %v1841_v44  ;;  %v6351_v44 = vld [vmem:[%s7789_s1 + $0x408] sm:$0xff]   ;;  %v6352_v43 = vld [vmem:[%s7789_s1 + $0x3d0] sm:$0xff]  }
 0x41c   : > { %v1850_v52 = vmul.f32 %v6684_v1, %v1845_v50  ;;  %v1853_v15 = vadd.f32 %v1846_v51, %v1714_v23  ;;  %v6350_v23 = vld [vmem:[%s7789_s1 + $0x3c8] sm:$0xff]   ;;  %v6353_v45 = vld [vmem:[%s7789_s1 + $0x410] sm:$0xff]   ;;  %v6356_v50 = vld [vmem:[%s7789_s1 + $0x3e0] sm:$0xff]  }
 0x41d   : > { %v1852_v24 = vadd.f32 %v1848_v47, %v1711_v14  ;;  %v6354_v47 = vld [vmem:[%s7789_s1 + $0x3d8] sm:$0xff]   ;;  %v6357_v51 = vld [vmem:[%s7789_s1 + $0x420] sm:$0xff]  }
 0x41e   : > { %v1854_v26 = vadd.f32 %v5820_v12, %v1850_v52  ;;  %v6358_v52 = vld [vmem:[%s7789_s1 + $0x3e8] sm:$0xff]  }
 0x435   : > { %v5840_v27 = vpop.f32.mrb[20].mxu1 }
 0x436   : > { %v1825_v28 = vpop.f32.mrb[21].mxu1  ;;  %v1858_v39 = vrot.slane %v5840_v27, 1  ;;  %v6362_v27 = vld [vmem:[%s7789_s1 + $0x3f8] sm:$0xff]  }
 0x437   : > { %v1856_v29 = vrot.slane %v1825_v28, 1  ;;  %v5841_v38 = vpop.f32.mrb[22].mxu1  ;;  %v6363_v28 = vld [vmem:[%s7789_s1 + $0x438] sm:$0xff]  }
 0x438   : > { %v1859_v40 = vrot.slane %v5841_v38, 1  ;;  %v1828_v41 = vpop.f32.mrb[23].mxu1 }
 0x439   : > { %v1857_v53 = vrot.slane %v1828_v41, 1 }
 0x43a   : > { %v1860_v54 = vsel %vm641_vm5, %v1858_v39, %v1859_v40  ;;  %v1863_v42 = vsel %vm641_vm5, %v1859_v40, %v1856_v29 }
 0x43b   : > { %v1867_v56 = vmul.f32 %v6699_v22, %v1863_v42  ;;  %v1870_v57 = vadd.f32 %v1860_v54, %v1854_v26  ;;  %v1861_v58 = vsel %vm641_vm5, %v1857_v53, %v1858_v39  ;;  %v1862_v46 = vsel %vm641_vm5, %v1856_v29, %v1857_v53  ;;  %v6361_v26 = vld [vmem:[%s7789_s1 + $0x430] sm:$0xff]   ;;  %v6364_v29 = vld [vmem:[%s7789_s1 + $0x440] sm:$0xff]  }
 0x43c   : > { %v1865_v60 = vmul.f32 %v6701_v25, %v1861_v58  ;;  %v1868_v61 = vadd.f32 %v1862_v46, %v1852_v24  ;;  %v6360_v24 = vld [vmem:[%s7789_s1 + $0x3f0] sm:$0xff]  }
 0x43d   : > { %v1871_v63 = vadd.f32 %v1867_v56, %v1855_v49  ;;  %v1882_v0 = vmul.f32 %v4822_v55, %v1870_v57  ;;  %v6355_v49 = vld [vmem:[%s7789_s1 + $0x418] sm:$0xff]  }
 0x43e   : > { %v1869_v2 = vadd.f32 %v1865_v60, %v1853_v15  ;;  %v1880_v3 = vmul.f32 %v4822_v55, %v1868_v61  ;;  %v6359_v15 = vld [vmem:[%s7789_s1 + $0x428] sm:$0xff]  }
 0x43f   : > { %v1883_v4 = vmul.f32 %v4822_v55, %v1871_v63  ;;  %v1894_v5 = vadd.f32 %v4824_v59, %v1882_v0 }
 0x440   : > { %v1881_v6 = vmul.f32 %v4822_v55, %v1869_v2  ;;  %v1892_v7 = vadd.f32 %v4824_v59, %v1880_v3 }
 0x441   : > { %v1895_v8 = vadd.f32 %v4824_v59, %v1883_v4  ;;  %v1898_v9 = vadd.f32 %v1894_v5, %v1494_v37  ;;  %v6347_v37 = vld [vmem:[%s7789_s1 + $0x3b8] sm:$0xff]  }
 0x442   : > { %v1893_v11 = vadd.f32 %v4824_v59, %v1881_v6  ;;  %v1896_v12 = vadd.f32 %v1892_v7, %v1492_v35  ;;  %v6345_v35 = vld [vmem:[%s7789_s1 + $0x3a8] sm:$0xff]  }
 0x443   : > { %v1899_v13 = vadd.f32 %v1895_v8, %v1495_v34  ;;  %v1902_v14 = vmax.f32 %v1898_v9, 0.0  ;;  %v6344_v34 = vld [vmem:[%s7789_s1 + $0x3a0] sm:$0xff]  }
 0x444   : > { %v1897_v16 = vadd.f32 %v1893_v11, %v1493_v36  ;;  %v1900_v17 = vmax.f32 %v1896_v12, 0.0  ;;  %v6346_v36 = vld [vmem:[%s7789_s1 + $0x3b0] sm:$0xff]  }
 0x445   : > { %v1903_v18 = vmax.f32 %v1899_v13, 0.0  ;;  %4827 = vst [vmem:[%s6850_s15 + $0x30] sm:$0xff] %v1902_v14 }
 0x446   : > { %v1901_v19 = vmax.f32 %v1897_v16, 0.0  ;;  %4825 = vst [vmem:[%s6850_s15 + $0x20] sm:$0xff] %v1900_v17 }
 0x447   : > { %4828 = vst [vmem:[%s6850_s15 + $0x38] sm:$0xff] %v1903_v18  ;;  %v1910_v20 = vpack.c.bf16 %v1903_v18, %v1902_v14 }
 0x448   : > { %4826 = vst [vmem:[%s6850_s15 + $0x28] sm:$0xff] %v1901_v19  ;;  %v1909_v31 = vpack.c.bf16 %v1901_v19, %v1900_v17  ;;  %v4902_v19 = vld [vmem:[%s7790_s2 + $0x4] ss:$0 sm:$0xff] }
 0x44a   : > { %5858 = vmatprep.mubr.bf16.mxu0 %v1909_v31  ;;  %5878 = vmatprep.mubr.bf16.mxu1 %v1909_v31 }
 0x44b   : > { %5859 = vmatmul.mubr.bf16.vlgmr.msra.gmra.mrb[24].mxu0 %v1910_v20  ;;  %5879 = vmatmul.mubr.bf16.vlgmr.msra.gmra.mrb[24].mxu1 %v1910_v20 }
 0x44c   : > { %5883 = vmatpush3.bf16.msra.mxu0 %v7047_v10  ;;  %5898 = vmatprep.mubr.bf16.mxu0 %v1909_v31  ;;  %v6348_v10 = vld [vmem:[%s7789_s1 + $0x3c0] sm:$0xff]  }
 0x44d   : > { %5884 = vmatprep.subr.bf16.mxu0 %v6341_v30  ;;  %5902 = vmatprep.subr.bf16.mxu1 %v6348_v10 }
 0x44e   : > { %5903 = vmatpush3.bf16.msra.mxu1 %v6348_v10 }
 0x44f   : > { %5904 = vmatprep.subr.bf16.mxu1 %v6350_v23 }
 0x450   : > { %5885 = vmatpush3.bf16.msra.mxu0 %v6341_v30 }
 0x451   : > { %5886 = vmatprep.subr.bf16.mxu0 %v6342_v32 }
 0x452   : > { %5905 = vmatpush3.bf16.msra.mxu1 %v6350_v23 }
 0x453   : > { %5906 = vmatprep.subr.bf16.mxu1 %v6352_v43 }
 0x454   : > { %5887 = vmatpush3.bf16.msra.mxu0 %v6342_v32 }
 0x455   : > { %5888 = vmatprep.subr.bf16.mxu0 %v6343_v33 }
 0x456   : > { %5907 = vmatpush3.bf16.msra.mxu1 %v6352_v43 }
 0x457   : > { %5908 = vmatprep.subr.bf16.mxu1 %v6354_v47 }
 0x458   : > { %5889 = vmatpush3.bf16.msra.mxu0 %v6343_v33 }
 0x459   : > { %5890 = vmatprep.subr.bf16.mxu0 %v6344_v34 }
 0x45a   : > { %5909 = vmatpush3.bf16.msra.mxu1 %v6354_v47 }
 0x45b   : > { %5910 = vmatprep.subr.bf16.mxu1 %v6356_v50 }
 0x45c   : > { %5891 = vmatpush3.bf16.msra.mxu0 %v6344_v34 }
 0x45d   : > { %5892 = vmatprep.subr.bf16.mxu0 %v6345_v35 }
 0x45e   : > { %5911 = vmatpush3.bf16.msra.mxu1 %v6356_v50 }
 0x45f   : > { %5912 = vmatprep.subr.bf16.mxu1 %v6358_v52 }
 0x460   : > { %5893 = vmatpush3.bf16.msra.mxu0 %v6345_v35 }
 0x461   : > { %5894 = vmatprep.subr.bf16.mxu0 %v6346_v36 }
 0x462   : > { %5913 = vmatpush3.bf16.msra.mxu1 %v6358_v52 }
 0x463   : > { %5914 = vmatprep.subr.bf16.mxu1 %v6360_v24 }
 0x464   : > { %5895 = vmatpush3.bf16.msra.mxu0 %v6346_v36 }
 0x465   : > { %5896 = vmatprep.subr.bf16.mxu0 %v6347_v37 }
 0x466   : > { %5915 = vmatpush3.bf16.msra.mxu1 %v6360_v24 }
 0x467   : > { %5916 = vmatprep.subr.bf16.mxu1 %v6362_v27 }
 0x468   : > { %5897 = vmatpush3.bf16.msra.mxu0 %v6347_v37  ;;  %v4904_v37 = vld [vmem:[%s7791_s3 + $0x4] ss:$0 sm:$0xff] }
 0x469   : > { %5922 = vmatprep.subr.bf16.mxu0 %v6349_v21 }
 0x46a   : > { %5917 = vmatpush3.bf16.msra.mxu1 %v6362_v27  ;;  %v6365_v27 = vld [vmem:[%s7789_s1 + $0x448] sm:$0xff]  }
 0x46b   : > { %5899 = vmatmul.mubr.bf16.vlgmr.msra.gmra.mrb[28].mxu0 %v1910_v20  ;;  %5942 = vmatprep.subr.bf16.mxu1 %v6364_v29 }
 0x46c   : > { %5923 = vmatpush3.bf16.msra.mxu0 %v6349_v21 }
 0x46d   : > { %5924 = vmatprep.subr.bf16.mxu0 %v6351_v44 }
 0x470   : > { %5925 = vmatpush3.bf16.msra.mxu0 %v6351_v44 }
 0x471   : > { %5926 = vmatprep.subr.bf16.mxu0 %v6353_v45 }
 0x474   : > { %5927 = vmatpush3.bf16.msra.mxu0 %v6353_v45 }
 0x475   : > { %5928 = vmatprep.subr.bf16.mxu0 %v6355_v49 }
 0x478   : > { %5929 = vmatpush3.bf16.msra.mxu0 %v6355_v49 }
 0x479   : > { %5930 = vmatprep.subr.bf16.mxu0 %v6357_v51 }
 0x47c   : > { %5931 = vmatpush3.bf16.msra.mxu0 %v6357_v51 }
 0x47d   : > { %5932 = vmatprep.subr.bf16.mxu0 %v6359_v15 }
 0x480   : > { %5933 = vmatpush3.bf16.msra.mxu0 %v6359_v15 }
 0x481   : > { %5934 = vmatprep.subr.bf16.mxu0 %v6361_v26 }
 0x484   : > { %5935 = vmatpush3.bf16.msra.mxu0 %v6361_v26 }
 0x485   : > { %5936 = vmatprep.subr.bf16.mxu0 %v6363_v28 }
 0x488   : > { %5937 = vmatpush3.bf16.msra.mxu0 %v6363_v28  ;;  %v6366_v28 = vld [vmem:[%s7789_s1 + $0x450] sm:$0xff]  }
 0x51e   : > { %v5860_v38 = vpop.f32.mrb[24].mxu0  ;;  %v5880_v39 = vpop.f32.mrb[24].mxu1 }
 0x51f   : > { %v2010_v40 = vpop.f32.mrb[25].mxu0  ;;  %v2124_v41 = vpop.f32.mrb[25].mxu1  ;;  %v2255_v55 = vrot.slane %v5860_v38, 7  ;;  %v6367_v38 = vld [vmem:[%s7789_s1 + $0x458] sm:$0xff]  }
 0x520   : > { %v2253_v53 = vrot.slane %v2010_v40, 7  ;;  %v5861_v54 = vpop.f32.mrb[26].mxu0  ;;  %v5881_v42 = vpop.f32.mrb[26].mxu1  ;;  %v6370_v40 = vld [vmem:[%s7789_s1 + $0x470] sm:$0xff]  }
 0x521   : > { %v2256_v56 = vrot.slane %v5861_v54, 7  ;;  %v2013_v57 = vpop.f32.mrb[27].mxu0  ;;  %v2127_v58 = vpop.f32.mrb[27].mxu1  ;;  %v6373_v54 = vld [vmem:[%s7789_s1 + $0x4c0] sm:$0xff]  }
 0x522   : > { %v2254_v46 = vrot.slane %v2013_v57, 7  ;;  %v6377_v57 = vld [vmem:[%s7789_s1 + $0x4d0] sm:$0xff]  }
 0x523   : > { %v2260_v59 = vsel %vm624_vm2, %v2256_v56, %v2253_v53  ;;  %v2257_v60 = vsel %vm624_vm2, %v2255_v55, %v2256_v56  ;;  %v6376_v56 = vld [vmem:[%s7789_s1 + $0x490] sm:$0xff]  }
 0x524   : > { %v2261_v61 = vmul.f32 %v6682_v62, %v2260_v59  ;;  %v2268_v63 = vadd.f32 %v5881_v42, %v2257_v60  ;;  %v2258_v0 = vsel %vm624_vm2, %v2254_v46, %v2255_v55  ;;  %v2259_v2 = vsel %vm624_vm2, %v2253_v53, %v2254_v46  ;;  %v6372_v53 = vld [vmem:[%s7789_s1 + $0x480] sm:$0xff]   ;;  %v6374_v42 = vld [vmem:[%s7789_s1 + $0x488] sm:$0xff]   ;;  %v6379_v46 = vld [vmem:[%s7789_s1 + $0x4d8] sm:$0xff]  }
 0x525   : > { %v2263_v3 = vmul.f32 %v6684_v1, %v2258_v0  ;;  %v2266_v4 = vadd.f32 %v2259_v2, %v2127_v58  ;;  %v6375_v55 = vld [vmem:[%s7789_s1 + $0x4c8] sm:$0xff]   ;;  %5962 = vmatprep.subr.bf16.mxu0 %v6372_v53  ;;  %v6378_v58 = vld [vmem:[%s7789_s1 + $0x498] sm:$0xff]   ;;  %v6380_v59 = vld [vmem:[%s7789_s1 + $0x4a0] sm:$0xff]  }
 0x526   : > { %v2265_v5 = vadd.f32 %v2261_v61, %v2124_v41  ;;  %v6371_v41 = vld [vmem:[%s7789_s1 + $0x478] sm:$0xff]   ;;  %v6381_v60 = vld [vmem:[%s7789_s1 + $0x4e0] sm:$0xff]   ;;  %v6382_v61 = vld [vmem:[%s7789_s1 + $0x4a8] sm:$0xff]  }
 0x527   : > { %v2267_v6 = vadd.f32 %v5880_v39, %v2263_v3  ;;  %v6368_v39 = vld [vmem:[%s7789_s1 + $0x460] sm:$0xff]   ;;  %v6384_v0 = vld [vmem:[%s7789_s1 + $0x4b0] sm:$0xff]   ;;  %v6386_v3 = vld [vmem:[%s7789_s1 + $0x4b8] sm:$0xff]  }
 0x528   : > { %v6385_v2 = vld [vmem:[%s7789_s1 + $0x4f0] sm:$0xff]  }
 0x53e   : > { %v5900_v7 = vpop.f32.mrb[28].mxu0 }
 0x53f   : > { %v2238_v8 = vpop.f32.mrb[29].mxu0  ;;  %v2271_v12 = vrot.slane %v5900_v7, 1 }
 0x540   : > { %v2269_v9 = vrot.slane %v2238_v8, 1  ;;  %v5901_v11 = vpop.f32.mrb[30].mxu0 }
 0x541   : > { %v2272_v13 = vrot.slane %v5901_v11, 1  ;;  %v2241_v14 = vpop.f32.mrb[31].mxu0 }
 0x542   : > { %v2270_v16 = vrot.slane %v2241_v14, 1 }
 0x543   : > { %v2273_v17 = vsel %vm641_vm5, %v2271_v12, %v2272_v13  ;;  %v2276_v18 = vsel %vm641_vm5, %v2272_v13, %v2269_v9 }
 0x544   : > { %v2280_v20 = vmul.f32 %v6699_v22, %v2276_v18  ;;  %v2283_v31 = vadd.f32 %v2273_v17, %v2267_v6  ;;  %v2274_v30 = vsel %vm641_vm5, %v2270_v16, %v2271_v12  ;;  %v2275_v32 = vsel %vm641_vm5, %v2269_v9, %v2270_v16 }
 0x545   : > { %v2278_v33 = vmul.f32 %v6701_v25, %v2274_v30  ;;  %v2281_v34 = vadd.f32 %v2275_v32, %v2265_v5  ;;  %v7279_v5 = vld [vmem:[%s7789_s1 + $0x500] sm:$0xff]  }
 0x546   : > { %v2284_v35 = vadd.f32 %v2280_v20, %v2268_v63  ;;  %v2295_v36 = vmul.f32 %v4902_v19, %v2283_v31  ;;  %v6383_v63 = vld [vmem:[%s7789_s1 + $0x4e8] sm:$0xff]  }
 0x547   : > { %v2282_v10 = vadd.f32 %v2278_v33, %v2266_v4  ;;  %v2293_v21 = vmul.f32 %v4902_v19, %v2281_v34  ;;  %v6387_v4 = vld [vmem:[%s7789_s1 + $0x4f8] sm:$0xff]  }
 0x548   : > { %v2296_v23 = vmul.f32 %v4902_v19, %v2284_v35  ;;  %v7189_v45 = vadd.f32 %v4904_v37, %v2295_v36 }
 0x549   : > { %v2294_v44 = vmul.f32 %v4902_v19, %v2282_v10  ;;  %v7187_v43 = vadd.f32 %v4904_v37, %v2293_v21 }
 0x54a   : > { %v7191_v47 = vadd.f32 %v4904_v37, %v2296_v23  ;;  %v2311_v15 = vmax.f32 %v7189_v45, 0.0 }
 0x54b   : > { %v7193_v49 = vadd.f32 %v4904_v37, %v2294_v44  ;;  %v2309_v51 = vmax.f32 %v7187_v43, 0.0  ;;  %v6389_v43 = vld [vmem:[%s7789_s1 + $0x508] sm:$0xff]  }
 0x54c   : > { %v2312_v50 = vmax.f32 %v7191_v47, 0.0  ;;  %v6390_v47 = vld [vmem:[%s7789_s1 + $0x510] sm:$0xff]  }
 0x54d   : > { %v2310_v52 = vmax.f32 %v7193_v49, 0.0  ;;  %v6391_v49 = vld [vmem:[%s7789_s1 + $0x518] sm:$0xff]  }
 0x54e   : > { %v2314_v26 = vpack.c.bf16 %v2312_v50, %v2311_v15 }
 0x54f   : > { %v2313_v24 = vpack.c.bf16 %v2310_v52, %v2309_v51 }
 0x551   : > { %5918 = vmatprep.mubr.bf16.mxu1 %v2313_v24  ;;  %5938 = vmatprep.mubr.bf16.mxu0 %v2313_v24 }
 0x552   : > { %5919 = vmatmul.mubr.bf16.vlgmr.msra.gmra.mrb[28].mxu1 %v2314_v26  ;;  %5939 = vmatmul.mubr.bf16.vlgmr.msra.gmra.mrb[32].mxu0 %v2314_v26 }
 0x553   : > { %5943 = vmatpush3.bf16.msra.mxu1 %v6364_v29  ;;  %5958 = vmatprep.mubr.bf16.mxu1 %v2313_v24  ;;  %v6369_v29 = vld [vmem:[%s7789_s1 + $0x468] sm:$0xff]  }
 0x554   : > { %5944 = vmatprep.subr.bf16.mxu1 %v6365_v27  ;;  %5963 = vmatpush3.bf16.msra.mxu0 %v6372_v53 }
 0x555   : > { %5964 = vmatprep.subr.bf16.mxu0 %v6374_v42 }
 0x557   : > { %5945 = vmatpush3.bf16.msra.mxu1 %v6365_v27 }
 0x558   : > { %5946 = vmatprep.subr.bf16.mxu1 %v6366_v28  ;;  %5965 = vmatpush3.bf16.msra.mxu0 %v6374_v42 }
 0x559   : > { %5966 = vmatprep.subr.bf16.mxu0 %v6376_v56 }
 0x55b   : > { %5947 = vmatpush3.bf16.msra.mxu1 %v6366_v28 }
 0x55c   : > { %5948 = vmatprep.subr.bf16.mxu1 %v6367_v38  ;;  %5967 = vmatpush3.bf16.msra.mxu0 %v6376_v56 }
 0x55d   : > { %5968 = vmatprep.subr.bf16.mxu0 %v6378_v58 }
 0x55f   : > { %5949 = vmatpush3.bf16.msra.mxu1 %v6367_v38 }
 0x560   : > { %5950 = vmatprep.subr.bf16.mxu1 %v6368_v39  ;;  %5969 = vmatpush3.bf16.msra.mxu0 %v6378_v58 }
 0x561   : > { %5970 = vmatprep.subr.bf16.mxu0 %v6380_v59 }
 0x563   : > { %5951 = vmatpush3.bf16.msra.mxu1 %v6368_v39 }
 0x564   : > { %5952 = vmatprep.subr.bf16.mxu1 %v6369_v29  ;;  %5971 = vmatpush3.bf16.msra.mxu0 %v6380_v59 }
 0x565   : > { %5972 = vmatprep.subr.bf16.mxu0 %v6382_v61 }
 0x567   : > { %5953 = vmatpush3.bf16.msra.mxu1 %v6369_v29 }
 0x568   : > { %5954 = vmatprep.subr.bf16.mxu1 %v6370_v40  ;;  %5973 = vmatpush3.bf16.msra.mxu0 %v6382_v61 }
 0x569   : > { %5974 = vmatprep.subr.bf16.mxu0 %v6384_v0 }
 0x56b   : > { %5955 = vmatpush3.bf16.msra.mxu1 %v6370_v40  ;;  %v4978_v40 = vld [vmem:[%s7790_s2 + $0x5] ss:$0 sm:$0xff] }
 0x56c   : > { %5956 = vmatprep.subr.bf16.mxu1 %v6371_v41  ;;  %5975 = vmatpush3.bf16.msra.mxu0 %v6384_v0 }
 0x56d   : > { %5976 = vmatprep.subr.bf16.mxu0 %v6386_v3 }
 0x56f   : > { %5957 = vmatpush3.bf16.msra.mxu1 %v6371_v41 }
 0x570   : > { %5982 = vmatprep.subr.bf16.mxu1 %v6373_v54  ;;  %5977 = vmatpush3.bf16.msra.mxu0 %v6386_v3 }
 0x571   : > { %6002 = vmatprep.subr.bf16.mxu0 %v7279_v5 }
 0x572   : > { %5959 = vmatmul.mubr.bf16.vlgmr.msra.gmra.mrb[32].mxu1 %v2314_v26 }
 0x573   : > { %5983 = vmatpush3.bf16.msra.mxu1 %v6373_v54 }
 0x574   : > { %5984 = vmatprep.subr.bf16.mxu1 %v6375_v55 }
 0x577   : > { %5985 = vmatpush3.bf16.msra.mxu1 %v6375_v55  ;;  %v4980_v55 = vld [vmem:[%s7791_s3 + $0x5] ss:$0 sm:$0xff] }
 0x578   : > { %5986 = vmatprep.subr.bf16.mxu1 %v6377_v57 }
 0x57b   : > { %5987 = vmatpush3.bf16.msra.mxu1 %v6377_v57 }
 0x57c   : > { %5988 = vmatprep.subr.bf16.mxu1 %v6379_v46 }
 0x57f   : > { %5989 = vmatpush3.bf16.msra.mxu1 %v6379_v46 }
 0x580   : > { %5990 = vmatprep.subr.bf16.mxu1 %v6381_v60 }
 0x583   : > { %5991 = vmatpush3.bf16.msra.mxu1 %v6381_v60 }
 0x584   : > { %5992 = vmatprep.subr.bf16.mxu1 %v6383_v63 }
 0x587   : > { %5993 = vmatpush3.bf16.msra.mxu1 %v6383_v63 }
 0x588   : > { %5994 = vmatprep.subr.bf16.mxu1 %v6385_v2 }
 0x58b   : > { %5995 = vmatpush3.bf16.msra.mxu1 %v6385_v2 }
 0x58c   : > { %5996 = vmatprep.subr.bf16.mxu1 %v6387_v4 }
 0x58f   : > { %5997 = vmatpush3.bf16.msra.mxu1 %v6387_v4 }
 0x625   : > { %v5920_v6 = vpop.f32.mrb[28].mxu1  ;;  %v5940_v7 = vpop.f32.mrb[32].mxu0 }
 0x626   : > { %v2414_v8 = vpop.f32.mrb[29].mxu1  ;;  %v2528_v9 = vpop.f32.mrb[33].mxu0  ;;  %v2659_v14 = vrot.slane %v5920_v6, 7 }
 0x627   : > { %v2657_v11 = vrot.slane %v2414_v8, 7  ;;  %v5921_v12 = vpop.f32.mrb[30].mxu1  ;;  %v5941_v13 = vpop.f32.mrb[34].mxu0 }
 0x628   : > { %v2660_v16 = vrot.slane %v5921_v12, 7  ;;  %v2417_v17 = vpop.f32.mrb[31].mxu1  ;;  %v2531_v18 = vpop.f32.mrb[35].mxu0 }
 0x629   : > { %v2658_v19 = vrot.slane %v2417_v17, 7  ;;  %v6397_v17 = vld [vmem:[%s7789_s1 + $0x580] sm:$0xff]  }
 0x62a   : > { %v2664_v20 = vsel %vm624_vm2, %v2660_v16, %v2657_v11  ;;  %v2661_v31 = vsel %vm624_vm2, %v2659_v14, %v2660_v16 }
 0x62b   : > { %v2665_v30 = vmul.f32 %v6682_v62, %v2664_v20  ;;  %v2672_v32 = vadd.f32 %v5941_v13, %v2661_v31  ;;  %v2662_v33 = vsel %vm624_vm2, %v2658_v19, %v2659_v14  ;;  %v2663_v34 = vsel %vm624_vm2, %v2657_v11, %v2658_v19  ;;  %v6399_v19 = vld [vmem:[%s7789_s1 + $0x588] sm:$0xff]   ;;  %v6400_v20 = vld [vmem:[%s7789_s1 + $0x550] sm:$0xff]  }
 0x62c   : > { %v2667_v35 = vmul.f32 %v6684_v1, %v2662_v33  ;;  %v2670_v36 = vadd.f32 %v2663_v34, %v2531_v18  ;;  %v6398_v18 = vld [vmem:[%s7789_s1 + $0x548] sm:$0xff]   ;;  %v6401_v31 = vld [vmem:[%s7789_s1 + $0x590] sm:$0xff]   ;;  %v6404_v33 = vld [vmem:[%s7789_s1 + $0x560] sm:$0xff]  }
 0x62d   : > { %v2669_v37 = vadd.f32 %v2665_v30, %v2528_v9  ;;  %v6402_v30 = vld [vmem:[%s7789_s1 + $0x558] sm:$0xff]   ;;  %v6405_v34 = vld [vmem:[%s7789_s1 + $0x5a0] sm:$0xff]  }
 0x62e   : > { %v2671_v10 = vadd.f32 %v5940_v7, %v2667_v35  ;;  %v6406_v35 = vld [vmem:[%s7789_s1 + $0x568] sm:$0xff]  }
 0x645   : > { %v5960_v21 = vpop.f32.mrb[32].mxu1 }
 0x646   : > { %v2642_v23 = vpop.f32.mrb[33].mxu1  ;;  %v2675_v26 = vrot.slane %v5960_v21, 1  ;;  %v6410_v21 = vld [vmem:[%s7789_s1 + $0x578] sm:$0xff]  }
 0x647   : > { %v2673_v44 = vrot.slane %v2642_v23, 1  ;;  %v5961_v24 = vpop.f32.mrb[34].mxu1  ;;  %v6411_v23 = vld [vmem:[%s7789_s1 + $0x5b8] sm:$0xff]  }
 0x648   : > { %v2676_v27 = vrot.slane %v5961_v24, 1  ;;  %v2645_v28 = vpop.f32.mrb[35].mxu1 }
 0x649   : > { %v2674_v38 = vrot.slane %v2645_v28, 1 }
 0x64a   : > { %v2677_v39 = vsel %vm641_vm5, %v2675_v26, %v2676_v27  ;;  %v2680_v29 = vsel %vm641_vm5, %v2676_v27, %v2673_v44 }
 0x64b   : > { %v2684_v41 = vmul.f32 %v6699_v22, %v2680_v29  ;;  %v2687_v53 = vadd.f32 %v2677_v39, %v2671_v10  ;;  %v2678_v54 = vsel %vm641_vm5, %v2674_v38, %v2675_v26  ;;  %v2679_v42 = vsel %vm641_vm5, %v2673_v44, %v2674_v38  ;;  %v6409_v10 = vld [vmem:[%s7789_s1 + $0x5b0] sm:$0xff]   ;;  %v6412_v44 = vld [vmem:[%s7789_s1 + $0x5c0] sm:$0xff]  }
 0x64c   : > { %v2682_v56 = vmul.f32 %v6701_v25, %v2678_v54  ;;  %v2685_v57 = vadd.f32 %v2679_v42, %v2669_v37  ;;  %v6408_v37 = vld [vmem:[%s7789_s1 + $0x570] sm:$0xff]  }
 0x64d   : > { %v2688_v58 = vadd.f32 %v2684_v41, %v2672_v32  ;;  %v2699_v46 = vmul.f32 %v4978_v40, %v2687_v53  ;;  %v6403_v32 = vld [vmem:[%s7789_s1 + $0x598] sm:$0xff]  }
 0x64e   : > { %v2686_v59 = vadd.f32 %v2682_v56, %v2670_v36  ;;  %v2697_v60 = vmul.f32 %v4978_v40, %v2685_v57  ;;  %v6407_v36 = vld [vmem:[%s7789_s1 + $0x5a8] sm:$0xff]  }
 0x64f   : > { %v2700_v61 = vmul.f32 %v4978_v40, %v2688_v58  ;;  %v2711_v63 = vadd.f32 %v4980_v55, %v2699_v46 }
 0x650   : > { %v2698_v0 = vmul.f32 %v4978_v40, %v2686_v59  ;;  %v2709_v2 = vadd.f32 %v4980_v55, %v2697_v60 }
 0x651   : > { %v2712_v3 = vadd.f32 %v4980_v55, %v2700_v61  ;;  %v2715_v4 = vadd.f32 %v2711_v63, %v2311_v15  ;;  %v6395_v15 = vld [vmem:[%s7789_s1 + $0x538] sm:$0xff]  }
 0x652   : > { %v2710_v6 = vadd.f32 %v4980_v55, %v2698_v0  ;;  %v2713_v7 = vadd.f32 %v2709_v2, %v2309_v51  ;;  %v6393_v51 = vld [vmem:[%s7789_s1 + $0x528] sm:$0xff]  }
 0x653   : > { %v2716_v8 = vadd.f32 %v2712_v3, %v2312_v50  ;;  %v2719_v9 = vmax.f32 %v2715_v4, 0.0  ;;  %v6392_v50 = vld [vmem:[%s7789_s1 + $0x520] sm:$0xff]  }
 0x654   : > { %v2714_v11 = vadd.f32 %v2710_v6, %v2310_v52  ;;  %v2717_v12 = vmax.f32 %v2713_v7, 0.0  ;;  %v6394_v52 = vld [vmem:[%s7789_s1 + $0x530] sm:$0xff]  }
 0x655   : > { %v2720_v13 = vmax.f32 %v2716_v8, 0.0  ;;  %4983 = vst [vmem:[%s6850_s15 + $0x50] sm:$0xff] %v2719_v9 }
 0x656   : > { %v2718_v14 = vmax.f32 %v2714_v11, 0.0  ;;  %4981 = vst [vmem:[%s6850_s15 + $0x40] sm:$0xff] %v2717_v12 }
 0x657   : > { %4984 = vst [vmem:[%s6850_s15 + $0x58] sm:$0xff] %v2720_v13  ;;  %v2727_v16 = vpack.c.bf16 %v2720_v13, %v2719_v9 }
 0x658   : > { %4982 = vst [vmem:[%s6850_s15 + $0x48] sm:$0xff] %v2718_v14  ;;  %v2726_v45 = vpack.c.bf16 %v2718_v14, %v2717_v12  ;;  %v5058_v14 = vld [vmem:[%s7790_s2 + $0x6] ss:$0 sm:$0xff] }
 0x65a   : > { %5978 = vmatprep.mubr.bf16.mxu0 %v2726_v45  ;;  %5998 = vmatprep.mubr.bf16.mxu1 %v2726_v45 }
 0x65b   : > { %5979 = vmatmul.mubr.bf16.vlgmr.msra.gmra.mrb[36].mxu0 %v2727_v16  ;;  %5999 = vmatmul.mubr.bf16.vlgmr.msra.gmra.mrb[36].mxu1 %v2727_v16 }
 0x65c   : > { %6003 = vmatpush3.bf16.msra.mxu0 %v7279_v5  ;;  %6018 = vmatprep.mubr.bf16.mxu0 %v2726_v45  ;;  %v6396_v5 = vld [vmem:[%s7789_s1 + $0x540] sm:$0xff]  }
 0x65d   : > { %6004 = vmatprep.subr.bf16.mxu0 %v6389_v43  ;;  %6022 = vmatprep.subr.bf16.mxu1 %v6396_v5 }
 0x65e   : > { %6023 = vmatpush3.bf16.msra.mxu1 %v6396_v5 }
 0x65f   : > { %6024 = vmatprep.subr.bf16.mxu1 %v6398_v18 }
 0x660   : > { %6005 = vmatpush3.bf16.msra.mxu0 %v6389_v43 }
 0x661   : > { %6006 = vmatprep.subr.bf16.mxu0 %v6390_v47 }
 0x662   : > { %6025 = vmatpush3.bf16.msra.mxu1 %v6398_v18 }
 0x663   : > { %6026 = vmatprep.subr.bf16.mxu1 %v6400_v20 }
 0x664   : > { %6007 = vmatpush3.bf16.msra.mxu0 %v6390_v47 }
 0x665   : > { %6008 = vmatprep.subr.bf16.mxu0 %v6391_v49 }
 0x666   : > { %6027 = vmatpush3.bf16.msra.mxu1 %v6400_v20 }
 0x667   : > { %6028 = vmatprep.subr.bf16.mxu1 %v6402_v30 }
 0x668   : > { %6009 = vmatpush3.bf16.msra.mxu0 %v6391_v49 }
 0x669   : > { %6010 = vmatprep.subr.bf16.mxu0 %v6392_v50 }
 0x66a   : > { %6029 = vmatpush3.bf16.msra.mxu1 %v6402_v30 }
 0x66b   : > { %6030 = vmatprep.subr.bf16.mxu1 %v6404_v33 }
 0x66c   : > { %6011 = vmatpush3.bf16.msra.mxu0 %v6392_v50 }
 0x66d   : > { %6012 = vmatprep.subr.bf16.mxu0 %v6393_v51 }
 0x66e   : > { %6031 = vmatpush3.bf16.msra.mxu1 %v6404_v33 }
 0x66f   : > { %6032 = vmatprep.subr.bf16.mxu1 %v6406_v35 }
 0x670   : > { %6013 = vmatpush3.bf16.msra.mxu0 %v6393_v51 }
 0x671   : > { %6014 = vmatprep.subr.bf16.mxu0 %v6394_v52 }
 0x672   : > { %6033 = vmatpush3.bf16.msra.mxu1 %v6406_v35 }
 0x673   : > { %6034 = vmatprep.subr.bf16.mxu1 %v6408_v37 }
 0x674   : > { %6015 = vmatpush3.bf16.msra.mxu0 %v6394_v52 }
 0x675   : > { %6016 = vmatprep.subr.bf16.mxu0 %v6395_v15 }
 0x676   : > { %6035 = vmatpush3.bf16.msra.mxu1 %v6408_v37 }
 0x677   : > { %6036 = vmatprep.subr.bf16.mxu1 %v6410_v21 }
 0x678   : > { %6017 = vmatpush3.bf16.msra.mxu0 %v6395_v15  ;;  %v5060_v15 = vld [vmem:[%s7791_s3 + $0x6] ss:$0 sm:$0xff] }
 0x679   : > { %6042 = vmatprep.subr.bf16.mxu0 %v6397_v17 }
 0x67a   : > { %6037 = vmatpush3.bf16.msra.mxu1 %v6410_v21  ;;  %v6413_v21 = vld [vmem:[%s7789_s1 + $0x5c8] sm:$0xff]  }
 0x67b   : > { %6019 = vmatmul.mubr.bf16.vlgmr.msra.gmra.mrb[40].mxu0 %v2727_v16  ;;  %6062 = vmatprep.subr.bf16.mxu1 %v6412_v44 }
 0x67c   : > { %6043 = vmatpush3.bf16.msra.mxu0 %v6397_v17 }
 0x67d   : > { %6044 = vmatprep.subr.bf16.mxu0 %v6399_v19 }
 0x680   : > { %6045 = vmatpush3.bf16.msra.mxu0 %v6399_v19 }
 0x681   : > { %6046 = vmatprep.subr.bf16.mxu0 %v6401_v31 }
 0x684   : > { %6047 = vmatpush3.bf16.msra.mxu0 %v6401_v31 }
 0x685   : > { %6048 = vmatprep.subr.bf16.mxu0 %v6403_v32 }
 0x688   : > { %6049 = vmatpush3.bf16.msra.mxu0 %v6403_v32 }
 0x689   : > { %6050 = vmatprep.subr.bf16.mxu0 %v6405_v34 }
 0x68c   : > { %6051 = vmatpush3.bf16.msra.mxu0 %v6405_v34 }
 0x68d   : > { %6052 = vmatprep.subr.bf16.mxu0 %v6407_v36 }
 0x690   : > { %6053 = vmatpush3.bf16.msra.mxu0 %v6407_v36 }
 0x691   : > { %6054 = vmatprep.subr.bf16.mxu0 %v6409_v10 }
 0x694   : > { %6055 = vmatpush3.bf16.msra.mxu0 %v6409_v10 }
 0x695   : > { %6056 = vmatprep.subr.bf16.mxu0 %v6411_v23 }
 0x698   : > { %6057 = vmatpush3.bf16.msra.mxu0 %v6411_v23  ;;  %v6414_v23 = vld [vmem:[%s7789_s1 + $0x5d0] sm:$0xff]  }
 0x72e   : > { %v5980_v24 = vpop.f32.mrb[36].mxu0  ;;  %v6000_v26 = vpop.f32.mrb[36].mxu1 }
 0x72f   : > { %v2827_v27 = vpop.f32.mrb[37].mxu0  ;;  %v2941_v28 = vpop.f32.mrb[37].mxu1  ;;  %v3072_v40 = vrot.slane %v5980_v24, 7  ;;  %v6415_v24 = vld [vmem:[%s7789_s1 + $0x5d8] sm:$0xff]  }
 0x730   : > { %v3070_v38 = vrot.slane %v2827_v27, 7  ;;  %v5981_v39 = vpop.f32.mrb[38].mxu0  ;;  %v6001_v29 = vpop.f32.mrb[38].mxu1  ;;  %v6418_v27 = vld [vmem:[%s7789_s1 + $0x5f0] sm:$0xff]  }
 0x731   : > { %v3073_v41 = vrot.slane %v5981_v39, 7  ;;  %v2830_v53 = vpop.f32.mrb[39].mxu0  ;;  %v2944_v54 = vpop.f32.mrb[39].mxu1  ;;  %v6421_v39 = vld [vmem:[%s7789_s1 + $0x640] sm:$0xff]  }
 0x732   : > { %v3071_v42 = vrot.slane %v2830_v53, 7  ;;  %v6425_v53 = vld [vmem:[%s7789_s1 + $0x650] sm:$0xff]  }
 0x733   : > { %v3077_v55 = vsel %vm624_vm2, %v3073_v41, %v3070_v38  ;;  %v3074_v56 = vsel %vm624_vm2, %v3072_v40, %v3073_v41  ;;  %v6424_v41 = vld [vmem:[%s7789_s1 + $0x610] sm:$0xff]  }
 0x734   : > { %v3078_v57 = vmul.f32 %v6682_v62, %v3077_v55  ;;  %v3085_v58 = vadd.f32 %v6001_v29, %v3074_v56  ;;  %v3075_v46 = vsel %vm624_vm2, %v3071_v42, %v3072_v40  ;;  %v3076_v59 = vsel %vm624_vm2, %v3070_v38, %v3071_v42  ;;  %v6420_v38 = vld [vmem:[%s7789_s1 + $0x600] sm:$0xff]   ;;  %v6422_v29 = vld [vmem:[%s7789_s1 + $0x608] sm:$0xff]   ;;  %v6427_v42 = vld [vmem:[%s7789_s1 + $0x658] sm:$0xff]  }
 0x735   : > { %v3080_v60 = vmul.f32 %v6684_v1, %v3075_v46  ;;  %v3083_v61 = vadd.f32 %v3076_v59, %v2944_v54  ;;  %v6423_v40 = vld [vmem:[%s7789_s1 + $0x648] sm:$0xff]   ;;  %6082 = vmatprep.subr.bf16.mxu0 %v6420_v38  ;;  %v6426_v54 = vld [vmem:[%s7789_s1 + $0x618] sm:$0xff]   ;;  %v6428_v55 = vld [vmem:[%s7789_s1 + $0x620] sm:$0xff]  }
 0x736   : > { %v3082_v63 = vadd.f32 %v3078_v57, %v2941_v28  ;;  %v6419_v28 = vld [vmem:[%s7789_s1 + $0x5f8] sm:$0xff]   ;;  %v6429_v56 = vld [vmem:[%s7789_s1 + $0x660] sm:$0xff]   ;;  %v6430_v57 = vld [vmem:[%s7789_s1 + $0x628] sm:$0xff]  }
 0x737   : > { %v3084_v0 = vadd.f32 %v6000_v26, %v3080_v60  ;;  %v6416_v26 = vld [vmem:[%s7789_s1 + $0x5e0] sm:$0xff]   ;;  %v6432_v46 = vld [vmem:[%s7789_s1 + $0x630] sm:$0xff]   ;;  %v6434_v60 = vld [vmem:[%s7789_s1 + $0x638] sm:$0xff]  }
 0x738   : > { %v6433_v59 = vld [vmem:[%s7789_s1 + $0x670] sm:$0xff]  }
 0x74e   : > { %v6020_v2 = vpop.f32.mrb[40].mxu0 }
 0x74f   : > { %v3055_v3 = vpop.f32.mrb[41].mxu0  ;;  %v3088_v7 = vrot.slane %v6020_v2, 1 }
 0x750   : > { %v3086_v4 = vrot.slane %v3055_v3, 1  ;;  %v6021_v6 = vpop.f32.mrb[42].mxu0 }
 0x751   : > { %v3089_v8 = vrot.slane %v6021_v6, 1  ;;  %v3058_v9 = vpop.f32.mrb[43].mxu0 }
 0x752   : > { %v3087_v11 = vrot.slane %v3058_v9, 1 }
 0x753   : > { %v3090_v12 = vsel %vm641_vm5, %v3088_v7, %v3089_v8  ;;  %v3093_v13 = vsel %vm641_vm5, %v3089_v8, %v3086_v4 }
 0x754   : > { %v3097_v16 = vmul.f32 %v6699_v22, %v3093_v13  ;;  %v3100_v45 = vadd.f32 %v3090_v12, %v3084_v0  ;;  %v3091_v43 = vsel %vm641_vm5, %v3087_v11, %v3088_v7  ;;  %v3092_v47 = vsel %vm641_vm5, %v3086_v4, %v3087_v11 }
 0x755   : > { %v3095_v49 = vmul.f32 %v6701_v25, %v3091_v43  ;;  %v3098_v50 = vadd.f32 %v3092_v47, %v3082_v63  ;;  %v7511_v63 = vld [vmem:[%s7789_s1 + $0x680] sm:$0xff]  }
 0x756   : > { %v3101_v51 = vadd.f32 %v3097_v16, %v3085_v58  ;;  %v3112_v52 = vmul.f32 %v5058_v14, %v3100_v45  ;;  %v6431_v58 = vld [vmem:[%s7789_s1 + $0x668] sm:$0xff]  }
 0x757   : > { %v3099_v5 = vadd.f32 %v3095_v49, %v3083_v61  ;;  %v3110_v17 = vmul.f32 %v5058_v14, %v3098_v50  ;;  %v6435_v61 = vld [vmem:[%s7789_s1 + $0x678] sm:$0xff]  }
 0x758   : > { %v3113_v18 = vmul.f32 %v5058_v14, %v3101_v51  ;;  %v7421_v31 = vadd.f32 %v5060_v15, %v3112_v52 }
 0x759   : > { %v3111_v19 = vmul.f32 %v5058_v14, %v3099_v5  ;;  %v7419_v20 = vadd.f32 %v5060_v15, %v3110_v17 }
 0x75a   : > { %v7423_v30 = vadd.f32 %v5060_v15, %v3113_v18  ;;  %v3128_v36 = vmax.f32 %v7421_v31, 0.0 }
 0x75b   : > { %v7425_v32 = vadd.f32 %v5060_v15, %v3111_v19  ;;  %v3126_v34 = vmax.f32 %v7419_v20, 0.0  ;;  %v6437_v20 = vld [vmem:[%s7789_s1 + $0x688] sm:$0xff]  }
 0x75c   : > { %v3129_v33 = vmax.f32 %v7423_v30, 0.0  ;;  %v6438_v30 = vld [vmem:[%s7789_s1 + $0x690] sm:$0xff]  }
 0x75d   : > { %v3127_v35 = vmax.f32 %v7425_v32, 0.0  ;;  %v6439_v32 = vld [vmem:[%s7789_s1 + $0x698] sm:$0xff]  }
 0x75e   : > { %v3131_v10 = vpack.c.bf16 %v3129_v33, %v3128_v36 }
 0x75f   : > { %v3130_v37 = vpack.c.bf16 %v3127_v35, %v3126_v34 }
 0x761   : > { %6038 = vmatprep.mubr.bf16.mxu1 %v3130_v37  ;;  %6058 = vmatprep.mubr.bf16.mxu0 %v3130_v37 }
 0x762   : > { %6039 = vmatmul.mubr.bf16.vlgmr.msra.gmra.mrb[40].mxu1 %v3131_v10  ;;  %6059 = vmatmul.mubr.bf16.vlgmr.msra.gmra.mrb[44].mxu0 %v3131_v10 }
 0x763   : > { %6063 = vmatpush3.bf16.msra.mxu1 %v6412_v44  ;;  %6078 = vmatprep.mubr.bf16.mxu1 %v3130_v37  ;;  %v6417_v44 = vld [vmem:[%s7789_s1 + $0x5e8] sm:$0xff]  }
 0x764   : > { %6064 = vmatprep.subr.bf16.mxu1 %v6413_v21  ;;  %6083 = vmatpush3.bf16.msra.mxu0 %v6420_v38 }
 0x765   : > { %6084 = vmatprep.subr.bf16.mxu0 %v6422_v29 }
 0x767   : > { %6065 = vmatpush3.bf16.msra.mxu1 %v6413_v21 }
 0x768   : > { %6066 = vmatprep.subr.bf16.mxu1 %v6414_v23  ;;  %6085 = vmatpush3.bf16.msra.mxu0 %v6422_v29 }
 0x769   : > { %6086 = vmatprep.subr.bf16.mxu0 %v6424_v41 }
 0x76b   : > { %6067 = vmatpush3.bf16.msra.mxu1 %v6414_v23 }
 0x76c   : > { %6068 = vmatprep.subr.bf16.mxu1 %v6415_v24  ;;  %6087 = vmatpush3.bf16.msra.mxu0 %v6424_v41 }
 0x76d   : > { %6088 = vmatprep.subr.bf16.mxu0 %v6426_v54 }
 0x76f   : > { %6069 = vmatpush3.bf16.msra.mxu1 %v6415_v24 }
 0x770   : > { %6070 = vmatprep.subr.bf16.mxu1 %v6416_v26  ;;  %6089 = vmatpush3.bf16.msra.mxu0 %v6426_v54 }
 0x771   : > { %6090 = vmatprep.subr.bf16.mxu0 %v6428_v55 }
 0x773   : > { %6071 = vmatpush3.bf16.msra.mxu1 %v6416_v26 }
 0x774   : > { %6072 = vmatprep.subr.bf16.mxu1 %v6417_v44  ;;  %6091 = vmatpush3.bf16.msra.mxu0 %v6428_v55 }
 0x775   : > { %6092 = vmatprep.subr.bf16.mxu0 %v6430_v57 }
 0x777   : > { %6073 = vmatpush3.bf16.msra.mxu1 %v6417_v44 }
 0x778   : > { %6074 = vmatprep.subr.bf16.mxu1 %v6418_v27  ;;  %6093 = vmatpush3.bf16.msra.mxu0 %v6430_v57 }
 0x779   : > { %6094 = vmatprep.subr.bf16.mxu0 %v6432_v46 }
 0x77b   : > { %6075 = vmatpush3.bf16.msra.mxu1 %v6418_v27  ;;  %v5134_v27 = vld [vmem:[%s7790_s2 + $0x7] ss:$0 sm:$0xff] }
 0x77c   : > { %6076 = vmatprep.subr.bf16.mxu1 %v6419_v28  ;;  %6095 = vmatpush3.bf16.msra.mxu0 %v6432_v46 }
 0x77d   : > { %6096 = vmatprep.subr.bf16.mxu0 %v6434_v60 }
 0x77f   : > { %6077 = vmatpush3.bf16.msra.mxu1 %v6419_v28 }
 0x780   : > { %6102 = vmatprep.subr.bf16.mxu1 %v6421_v39  ;;  %6097 = vmatpush3.bf16.msra.mxu0 %v6434_v60 }
 0x781   : > { %6122 = vmatprep.subr.bf16.mxu0 %v7511_v63 }
 0x782   : > { %6079 = vmatmul.mubr.bf16.vlgmr.msra.gmra.mrb[44].mxu1 %v3131_v10 }
 0x783   : > { %6103 = vmatpush3.bf16.msra.mxu1 %v6421_v39 }
 0x784   : > { %6104 = vmatprep.subr.bf16.mxu1 %v6423_v40 }
 0x787   : > { %6105 = vmatpush3.bf16.msra.mxu1 %v6423_v40  ;;  %v5136_v40 = vld [vmem:[%s7791_s3 + $0x7] ss:$0 sm:$0xff] }
 0x788   : > { %6106 = vmatprep.subr.bf16.mxu1 %v6425_v53 }
 0x78b   : > { %6107 = vmatpush3.bf16.msra.mxu1 %v6425_v53 }
 0x78c   : > { %6108 = vmatprep.subr.bf16.mxu1 %v6427_v42 }
 0x78f   : > { %6109 = vmatpush3.bf16.msra.mxu1 %v6427_v42 }
 0x790   : > { %6110 = vmatprep.subr.bf16.mxu1 %v6429_v56 }
 0x793   : > { %6111 = vmatpush3.bf16.msra.mxu1 %v6429_v56 }
 0x794   : > { %6112 = vmatprep.subr.bf16.mxu1 %v6431_v58 }
 0x797   : > { %6113 = vmatpush3.bf16.msra.mxu1 %v6431_v58 }
 0x798   : > { %6114 = vmatprep.subr.bf16.mxu1 %v6433_v59 }
 0x79b   : > { %6115 = vmatpush3.bf16.msra.mxu1 %v6433_v59 }
 0x79c   : > { %6116 = vmatprep.subr.bf16.mxu1 %v6435_v61 }
 0x79f   : > { %6117 = vmatpush3.bf16.msra.mxu1 %v6435_v61 }
 0x835   : > { %v6040_v0 = vpop.f32.mrb[40].mxu1  ;;  %v6060_v2 = vpop.f32.mrb[44].mxu0 }
 0x836   : > { %v3231_v3 = vpop.f32.mrb[41].mxu1  ;;  %v3345_v4 = vpop.f32.mrb[45].mxu0  ;;  %v3476_v9 = vrot.slane %v6040_v0, 7 }
 0x837   : > { %v3474_v6 = vrot.slane %v3231_v3, 7  ;;  %v6041_v7 = vpop.f32.mrb[42].mxu1  ;;  %v6061_v8 = vpop.f32.mrb[46].mxu0 }
 0x838   : > { %v3477_v11 = vrot.slane %v6041_v7, 7  ;;  %v3234_v12 = vpop.f32.mrb[43].mxu1  ;;  %v3348_v13 = vpop.f32.mrb[47].mxu0 }
 0x839   : > { %v3475_v14 = vrot.slane %v3234_v12, 7  ;;  %v6445_v12 = vld [vmem:[%s7789_s1 + $0x700] sm:$0xff]  }
 0x83a   : > { %v3481_v16 = vsel %vm624_vm2, %v3477_v11, %v3474_v6  ;;  %v3478_v45 = vsel %vm624_vm2, %v3476_v9, %v3477_v11 }
 0x83b   : > { %v3482_v43 = vmul.f32 %v6682_v62, %v3481_v16  ;;  %v3489_v47 = vadd.f32 %v6061_v8, %v3478_v45  ;;  %v3479_v49 = vsel %vm624_vm2, %v3475_v14, %v3476_v9  ;;  %v3480_v50 = vsel %vm624_vm2, %v3474_v6, %v3475_v14  ;;  %v6447_v14 = vld [vmem:[%s7789_s1 + $0x708] sm:$0xff]   ;;  %v6448_v16 = vld [vmem:[%s7789_s1 + $0x6d0] sm:$0xff]  }
 0x83c   : > { %v3484_v51 = vmul.f32 %v6684_v1, %v3479_v49  ;;  %v3487_v52 = vadd.f32 %v3480_v50, %v3348_v13  ;;  %v6446_v13 = vld [vmem:[%s7789_s1 + $0x6c8] sm:$0xff]   ;;  %v6449_v45 = vld [vmem:[%s7789_s1 + $0x710] sm:$0xff]   ;;  %v6452_v49 = vld [vmem:[%s7789_s1 + $0x6e0] sm:$0xff]  }
 0x83d   : > { %v3486_v15 = vadd.f32 %v3482_v43, %v3345_v4  ;;  %v6450_v43 = vld [vmem:[%s7789_s1 + $0x6d8] sm:$0xff]   ;;  %v6453_v50 = vld [vmem:[%s7789_s1 + $0x720] sm:$0xff]  }
 0x83e   : > { %v3488_v5 = vadd.f32 %v6060_v2, %v3484_v51  ;;  %v6454_v51 = vld [vmem:[%s7789_s1 + $0x6e8] sm:$0xff]  }
 0x855   : > { %v6080_v17 = vpop.f32.mrb[44].mxu1 }
 0x856   : > { %v3459_v18 = vpop.f32.mrb[45].mxu1  ;;  %v3492_v10 = vrot.slane %v6080_v17, 1  ;;  %v6458_v17 = vld [vmem:[%s7789_s1 + $0x6f8] sm:$0xff]  }
 0x857   : > { %v3490_v19 = vrot.slane %v3459_v18, 1  ;;  %v6081_v37 = vpop.f32.mrb[46].mxu1  ;;  %v6459_v18 = vld [vmem:[%s7789_s1 + $0x738] sm:$0xff]  }
 0x858   : > { %v3493_v21 = vrot.slane %v6081_v37, 1  ;;  %v3462_v23 = vpop.f32.mrb[47].mxu1 }
 0x859   : > { %v3491_v24 = vrot.slane %v3462_v23, 1 }
 0x85a   : > { %v3494_v26 = vsel %vm641_vm5, %v3492_v10, %v3493_v21  ;;  %v3497_v44 = vsel %vm641_vm5, %v3493_v21, %v3490_v19 }
 0x85b   : > { %v3501_v28 = vmul.f32 %v6699_v22, %v3497_v44  ;;  %v3504_v38 = vadd.f32 %v3494_v26, %v3488_v5  ;;  %v3495_v39 = vsel %vm641_vm5, %v3491_v24, %v3492_v10  ;;  %v3496_v29 = vsel %vm641_vm5, %v3490_v19, %v3491_v24  ;;  %v6457_v5 = vld [vmem:[%s7789_s1 + $0x730] sm:$0xff]   ;;  %v6460_v19 = vld [vmem:[%s7789_s1 + $0x740] sm:$0xff]  }
 0x85c   : > { %v3499_v41 = vmul.f32 %v6701_v25, %v3495_v39  ;;  %v3502_v53 = vadd.f32 %v3496_v29, %v3486_v15  ;;  %v6456_v15 = vld [vmem:[%s7789_s1 + $0x6f0] sm:$0xff]  }
 0x85d   : > { %v3505_v54 = vadd.f32 %v3501_v28, %v3489_v47  ;;  %v3516_v42 = vmul.f32 %v5134_v27, %v3504_v38  ;;  %v6451_v47 = vld [vmem:[%s7789_s1 + $0x718] sm:$0xff]  }
 0x85e   : > { %v3503_v55 = vadd.f32 %v3499_v41, %v3487_v52  ;;  %v3514_v56 = vmul.f32 %v5134_v27, %v3502_v53  ;;  %v6455_v52 = vld [vmem:[%s7789_s1 + $0x728] sm:$0xff]  }
 0x85f   : > { %v3517_v57 = vmul.f32 %v5134_v27, %v3505_v54  ;;  %v3528_v58 = vadd.f32 %v5136_v40, %v3516_v42 }
 0x860   : > { %v3515_v46 = vmul.f32 %v5134_v27, %v3503_v55  ;;  %v3526_v59 = vadd.f32 %v5136_v40, %v3514_v56 }
 0x861   : > { %v3529_v60 = vadd.f32 %v5136_v40, %v3517_v57  ;;  %v3532_v61 = vadd.f32 %v3528_v58, %v3128_v36  ;;  %v6443_v36 = vld [vmem:[%s7789_s1 + $0x6b8] sm:$0xff]  }
 0x862   : > { %v3527_v0 = vadd.f32 %v5136_v40, %v3515_v46  ;;  %v3530_v2 = vadd.f32 %v3526_v59, %v3126_v34  ;;  %v6441_v34 = vld [vmem:[%s7789_s1 + $0x6a8] sm:$0xff]  }
 0x863   : > { %v3533_v3 = vadd.f32 %v3529_v60, %v3129_v33  ;;  %v3536_v4 = vmax.f32 %v3532_v61, 0.0  ;;  %v6440_v33 = vld [vmem:[%s7789_s1 + $0x6a0] sm:$0xff]  }
 0x864   : > { %v3531_v6 = vadd.f32 %v3527_v0, %v3127_v35  ;;  %v3534_v7 = vmax.f32 %v3530_v2, 0.0  ;;  %v6442_v35 = vld [vmem:[%s7789_s1 + $0x6b0] sm:$0xff]  }
 0x865   : > { %v3537_v8 = vmax.f32 %v3533_v3, 0.0  ;;  %5139 = vst [vmem:[%s6850_s15 + $0x70] sm:$0xff] %v3536_v4 }
 0x866   : > { %v3535_v9 = vmax.f32 %v3531_v6, 0.0  ;;  %5137 = vst [vmem:[%s6850_s15 + $0x60] sm:$0xff] %v3534_v7 }
 0x867   : > { %5140 = vst [vmem:[%s6850_s15 + $0x78] sm:$0xff] %v3537_v8  ;;  %v3544_v11 = vpack.c.bf16 %v3537_v8, %v3536_v4 }
 0x868   : > { %5138 = vst [vmem:[%s6850_s15 + $0x68] sm:$0xff] %v3535_v9  ;;  %v3543_v31 = vpack.c.bf16 %v3535_v9, %v3534_v7  ;;  %v5214_v9 = vld [vmem:[%s7790_s2 + $0x8] ss:$0 sm:$0xff] }
 0x86a   : > { %6098 = vmatprep.mubr.bf16.mxu0 %v3543_v31  ;;  %6118 = vmatprep.mubr.bf16.mxu1 %v3543_v31 }
 0x86b   : > { %6099 = vmatmul.mubr.bf16.vlgmr.msra.gmra.mrb[48].mxu0 %v3544_v11  ;;  %6119 = vmatmul.mubr.bf16.vlgmr.msra.gmra.mrb[48].mxu1 %v3544_v11 }
 0x86c   : > { %6123 = vmatpush3.bf16.msra.mxu0 %v7511_v63  ;;  %6138 = vmatprep.mubr.bf16.mxu0 %v3543_v31  ;;  %v6444_v63 = vld [vmem:[%s7789_s1 + $0x6c0] sm:$0xff]  }
 0x86d   : > { %6124 = vmatprep.subr.bf16.mxu0 %v6437_v20  ;;  %6142 = vmatprep.subr.bf16.mxu1 %v6444_v63 }
 0x86e   : > { %6143 = vmatpush3.bf16.msra.mxu1 %v6444_v63 }
 0x86f   : > { %6144 = vmatprep.subr.bf16.mxu1 %v6446_v13 }
 0x870   : > { %6125 = vmatpush3.bf16.msra.mxu0 %v6437_v20 }
 0x871   : > { %6126 = vmatprep.subr.bf16.mxu0 %v6438_v30 }
 0x872   : > { %6145 = vmatpush3.bf16.msra.mxu1 %v6446_v13 }
 0x873   : > { %6146 = vmatprep.subr.bf16.mxu1 %v6448_v16 }
 0x874   : > { %6127 = vmatpush3.bf16.msra.mxu0 %v6438_v30 }
 0x875   : > { %6128 = vmatprep.subr.bf16.mxu0 %v6439_v32 }
 0x876   : > { %6147 = vmatpush3.bf16.msra.mxu1 %v6448_v16 }
 0x877   : > { %6148 = vmatprep.subr.bf16.mxu1 %v6450_v43 }
 0x878   : > { %6129 = vmatpush3.bf16.msra.mxu0 %v6439_v32 }
 0x879   : > { %6130 = vmatprep.subr.bf16.mxu0 %v6440_v33 }
 0x87a   : > { %6149 = vmatpush3.bf16.msra.mxu1 %v6450_v43 }
 0x87b   : > { %6150 = vmatprep.subr.bf16.mxu1 %v6452_v49 }
 0x87c   : > { %6131 = vmatpush3.bf16.msra.mxu0 %v6440_v33 }
 0x87d   : > { %6132 = vmatprep.subr.bf16.mxu0 %v6441_v34 }
 0x87e   : > { %6151 = vmatpush3.bf16.msra.mxu1 %v6452_v49 }
 0x87f   : > { %6152 = vmatprep.subr.bf16.mxu1 %v6454_v51 }
 0x880   : > { %6133 = vmatpush3.bf16.msra.mxu0 %v6441_v34 }
 0x881   : > { %6134 = vmatprep.subr.bf16.mxu0 %v6442_v35 }
 0x882   : > { %6153 = vmatpush3.bf16.msra.mxu1 %v6454_v51 }
 0x883   : > { %6154 = vmatprep.subr.bf16.mxu1 %v6456_v15 }
 0x884   : > { %6135 = vmatpush3.bf16.msra.mxu0 %v6442_v35 }
 0x885   : > { %6136 = vmatprep.subr.bf16.mxu0 %v6443_v36 }
 0x886   : > { %6155 = vmatpush3.bf16.msra.mxu1 %v6456_v15 }
 0x887   : > { %6156 = vmatprep.subr.bf16.mxu1 %v6458_v17 }
 0x888   : > { %6137 = vmatpush3.bf16.msra.mxu0 %v6443_v36  ;;  %v5216_v36 = vld [vmem:[%s7791_s3 + $0x8] ss:$0 sm:$0xff] }
 0x889   : > { %6162 = vmatprep.subr.bf16.mxu0 %v6445_v12 }
 0x88a   : > { %6157 = vmatpush3.bf16.msra.mxu1 %v6458_v17  ;;  %v6461_v17 = vld [vmem:[%s7789_s1 + $0x748] sm:$0xff]  }
 0x88b   : > { %6139 = vmatmul.mubr.bf16.vlgmr.msra.gmra.mrb[52].mxu0 %v3544_v11  ;;  %6182 = vmatprep.subr.bf16.mxu1 %v6460_v19 }
 0x88c   : > { %6163 = vmatpush3.bf16.msra.mxu0 %v6445_v12 }
 0x88d   : > { %6164 = vmatprep.subr.bf16.mxu0 %v6447_v14 }
 0x890   : > { %6165 = vmatpush3.bf16.msra.mxu0 %v6447_v14 }
 0x891   : > { %6166 = vmatprep.subr.bf16.mxu0 %v6449_v45 }
 0x894   : > { %6167 = vmatpush3.bf16.msra.mxu0 %v6449_v45 }
 0x895   : > { %6168 = vmatprep.subr.bf16.mxu0 %v6451_v47 }
 0x898   : > { %6169 = vmatpush3.bf16.msra.mxu0 %v6451_v47 }
 0x899   : > { %6170 = vmatprep.subr.bf16.mxu0 %v6453_v50 }
 0x89c   : > { %6171 = vmatpush3.bf16.msra.mxu0 %v6453_v50 }
 0x89d   : > { %6172 = vmatprep.subr.bf16.mxu0 %v6455_v52 }
 0x8a0   : > { %6173 = vmatpush3.bf16.msra.mxu0 %v6455_v52 }
 0x8a1   : > { %6174 = vmatprep.subr.bf16.mxu0 %v6457_v5 }
 0x8a4   : > { %6175 = vmatpush3.bf16.msra.mxu0 %v6457_v5 }
 0x8a5   : > { %6176 = vmatprep.subr.bf16.mxu0 %v6459_v18 }
 0x8a8   : > { %6177 = vmatpush3.bf16.msra.mxu0 %v6459_v18  ;;  %v6462_v18 = vld [vmem:[%s7789_s1 + $0x750] sm:$0xff]  }
 0x93e   : > { %v6100_v37 = vpop.f32.mrb[48].mxu0  ;;  %v6120_v10 = vpop.f32.mrb[48].mxu1 }
 0x93f   : > { %v3644_v21 = vpop.f32.mrb[49].mxu0  ;;  %v3758_v23 = vpop.f32.mrb[49].mxu1  ;;  %v3889_v27 = vrot.slane %v6100_v37, 7  ;;  %v6463_v37 = vld [vmem:[%s7789_s1 + $0x758] sm:$0xff]  }
 0x940   : > { %v3887_v24 = vrot.slane %v3644_v21, 7  ;;  %v6101_v26 = vpop.f32.mrb[50].mxu0  ;;  %v6121_v44 = vpop.f32.mrb[50].mxu1  ;;  %v6466_v21 = vld [vmem:[%s7789_s1 + $0x770] sm:$0xff]  }
 0x941   : > { %v3890_v28 = vrot.slane %v6101_v26, 7  ;;  %v3647_v38 = vpop.f32.mrb[51].mxu0  ;;  %v3761_v39 = vpop.f32.mrb[51].mxu1 }
 0x942   : > { %v3888_v29 = vrot.slane %v3647_v38, 7 }
 0x943   : > { %v3894_v40 = vsel %vm624_vm2, %v3890_v28, %v3887_v24  ;;  %v3891_v41 = vsel %vm624_vm2, %v3889_v27, %v3890_v28 }
 0x944   : > { %v3895_v53 = vmul.f32 %v6682_v62, %v3894_v40  ;;  %v3902_v54 = vadd.f32 %v6121_v44, %v3891_v41  ;;  %v3892_v42 = vsel %vm624_vm2, %v3888_v29, %v3889_v27  ;;  %v3893_v55 = vsel %vm624_vm2, %v3887_v24, %v3888_v29 }
 0x945   : > { %v3897_v56 = vmul.f32 %v6684_v1, %v3892_v42  ;;  %v3900_v57 = vadd.f32 %v3893_v55, %v3761_v39 }
 0x946   : > { %v3899_v58 = vadd.f32 %v3895_v53, %v3758_v23  ;;  %v6467_v23 = vld [vmem:[%s7789_s1 + $0x778] sm:$0xff]  }
 0x947   : > { %v3901_v46 = vadd.f32 %v6120_v10, %v3897_v56  ;;  %v6464_v10 = vld [vmem:[%s7789_s1 + $0x760] sm:$0xff]  }
 0x95e   : > { %v6140_v59 = vpop.f32.mrb[52].mxu0 }
 0x95f   : > { %v3872_v60 = vpop.f32.mrb[53].mxu0  ;;  %v3905_v2 = vrot.slane %v6140_v59, 1 }
 0x960   : > { %v3903_v61 = vrot.slane %v3872_v60, 1  ;;  %v6141_v0 = vpop.f32.mrb[54].mxu0 }
 0x961   : > { %v3906_v3 = vrot.slane %v6141_v0, 1  ;;  %v3875_v4 = vpop.f32.mrb[55].mxu0 }
 0x962   : > { %v3904_v6 = vrot.slane %v3875_v4, 1 }
 0x963   : > { %v3907_v7 = vsel %vm641_vm5, %v3905_v2, %v3906_v3  ;;  %v3910_v8 = vsel %vm641_vm5, %v3906_v3, %v3903_v61 }
 0x964   : > { %v3914_v11 = vmul.f32 %v6699_v22, %v3910_v8  ;;  %v3917_v31 = vadd.f32 %v3907_v7, %v3901_v46  ;;  %v3908_v20 = vsel %vm641_vm5, %v3904_v6, %v3905_v2  ;;  %v3909_v30 = vsel %vm641_vm5, %v3903_v61, %v3904_v6 }
 0x965   : > { %v3912_v32 = vmul.f32 %v6701_v25, %v3908_v20  ;;  %v3915_v33 = vadd.f32 %v3909_v30, %v3899_v58 }
 0x966   : > { %v3918_v34 = vadd.f32 %v3914_v11, %v3902_v54  ;;  %v3929_v35 = vmul.f32 %v5214_v9, %v3917_v31 }
 0x967   : > { %v3916_v63 = vadd.f32 %v3912_v32, %v3900_v57  ;;  %v3927_v12 = vmul.f32 %v5214_v9, %v3915_v33 }
 0x968   : > { %v3930_v13 = vmul.f32 %v5214_v9, %v3918_v34  ;;  %v7653_v45 = vadd.f32 %v5216_v36, %v3929_v35  ;;  %v5292_v34 = vld [vmem:[%s7791_s3 + $0x9] ss:$0 sm:$0xff] }
 0x969   : > { %v3928_v14 = vmul.f32 %v5214_v9, %v3916_v63  ;;  %v7651_v16 = vadd.f32 %v5216_v36, %v3927_v12 }
 0x96a   : > { %v7655_v43 = vadd.f32 %v5216_v36, %v3930_v13  ;;  %v3945_v52 = vmax.f32 %v7653_v45, 0.0  ;;  %v4437_v45 = vld [vmem:[%s6850_s15 + $0x8] sm:$0xff] (%p6543_p4) }
 0x96b   : > { %v7657_v47 = vadd.f32 %v5216_v36, %v3928_v14  ;;  %v3943_v50 = vmax.f32 %v7651_v16, 0.0  ;;  %v4435_v16 = vld [vmem:[%s6850_s15] sm:$0xff] (%p6543_p4)  ;;  %4438 = vst [vmem:[%s7739_s8 + $0x8] sm:$0xff] (%p6543_p4), %v4437_v45 }
 0x96c   : > { %v3946_v49 = vmax.f32 %v7655_v43, 0.0  ;;  %v4439_v43 = vld [vmem:[%s6850_s15 + $0x10] sm:$0xff] (%p6543_p4)  ;;  %4436 = vst [vmem:[%s7739_s8] sm:$0xff] (%p6543_p4), %v4435_v16 }
 0x96d   : > { %v3944_v51 = vmax.f32 %v7657_v47, 0.0  ;;  %v4441_v47 = vld [vmem:[%s6850_s15 + $0x18] sm:$0xff] (%p6543_p4)  ;;  %4440 = vst [vmem:[%s7739_s8 + $0x10] sm:$0xff] (%p6543_p4), %v4439_v43 }
 0x96e   : > { %v3948_v5 = vpack.c.bf16 %v3946_v49, %v3945_v52  ;;  %4442 = vst [vmem:[%s7739_s8 + $0x18] sm:$0xff] (%p6543_p4), %v4441_v47 }
 0x96f   : > { %v3947_v15 = vpack.c.bf16 %v3944_v51, %v3943_v50 }
 0x971   : > { %6158 = vmatprep.mubr.bf16.mxu1 %v3947_v15  ;;  %6178 = vmatprep.mubr.bf16.mxu0 %v3947_v15 }
 0x972   : > { %6159 = vmatmul.mubr.bf16.vlgmr.msra.gmra.mrb[52].mxu1 %v3948_v5  ;;  %6179 = vmatmul.mubr.bf16.vlgmr.msra.gmra.mrb[56].mxu0 %v3948_v5 }
 0x973   : > { %6183 = vmatpush3.bf16.msra.mxu1 %v6460_v19  ;;  %6198 = vmatprep.mubr.bf16.mxu1 %v3947_v15  ;;  %v6465_v19 = vld [vmem:[%s7789_s1 + $0x768] sm:$0xff]  }
 0x974   : > { %6184 = vmatprep.subr.bf16.mxu1 %v6461_v17 }
 0x977   : > { %6185 = vmatpush3.bf16.msra.mxu1 %v6461_v17 }
 0x978   : > { %6186 = vmatprep.subr.bf16.mxu1 %v6462_v18 }
 0x97b   : > { %6187 = vmatpush3.bf16.msra.mxu1 %v6462_v18 }
 0x97c   : > { %6188 = vmatprep.subr.bf16.mxu1 %v6463_v37 }
 0x97f   : > { %6189 = vmatpush3.bf16.msra.mxu1 %v6463_v37 }
 0x980   : > { %6190 = vmatprep.subr.bf16.mxu1 %v6464_v10 }
 0x983   : > { %6191 = vmatpush3.bf16.msra.mxu1 %v6464_v10 }
 0x984   : > { %6192 = vmatprep.subr.bf16.mxu1 %v6465_v19 }
 0x987   : > { %6193 = vmatpush3.bf16.msra.mxu1 %v6465_v19 }
 0x988   : > { %6194 = vmatprep.subr.bf16.mxu1 %v6466_v21 }
 0x98b   : > { %6195 = vmatpush3.bf16.msra.mxu1 %v6466_v21 }
 0x98c   : > { %6196 = vmatprep.subr.bf16.mxu1 %v6467_v23 }
 0x98f   : > { %6197 = vmatpush3.bf16.msra.mxu1 %v6467_v23 }
 0x992   : > { %6199 = vmatmul.mubr.bf16.vlgmr.msra.gmra.mrb[56].mxu1 %v3948_v5 }
 0xa45   : > { %v6160_v24 = vpop.f32.mrb[52].mxu1  ;;  %v6180_v26 = vpop.f32.mrb[56].mxu0 }
 0xa46   : > { %v4048_v44 = vpop.f32.mrb[53].mxu1  ;;  %v4162_v27 = vpop.f32.mrb[57].mxu0  ;;  %v4293_v29 = vrot.slane %v6160_v24, 7 }
 0xa47   : > { %v4291_v28 = vrot.slane %v4048_v44, 7  ;;  %v6161_v38 = vpop.f32.mrb[54].mxu1  ;;  %v6181_v39 = vpop.f32.mrb[58].mxu0  ;;  %v4451_v44 = vld [vmem:[%s6850_s15 + $0x40] sm:$0xff] (%p6543_p4) }
 0xa48   : > { %v4294_v40 = vrot.slane %v6161_v38, 7  ;;  %v4051_v41 = vpop.f32.mrb[55].mxu1  ;;  %v4165_v53 = vpop.f32.mrb[59].mxu0  ;;  %4452 = vst [vmem:[%s7739_s8 + $0x80] sm:$0xff] (%p6543_p4), %v4451_v44  ;;  %v4457_v38 = vld [vmem:[%s6850_s15 + $0x58] sm:$0xff] (%p6543_p4) }
 0xa49   : > { %v4292_v54 = vrot.slane %v4051_v41, 7  ;;  %4458 = vst [vmem:[%s7739_s8 + $0x98] sm:$0xff] (%p6543_p4), %v4457_v38  ;;  %v4465_v41 = vld [vmem:[%s6850_s15 + $0x78] sm:$0xff] (%p6543_p4) }
 0xa4a   : > { %v4298_v42 = vsel %vm624_vm2, %v4294_v40, %v4291_v28  ;;  %v4295_v55 = vsel %vm624_vm2, %v4293_v29, %v4294_v40  ;;  %v4463_v40 = vld [vmem:[%s6850_s15 + $0x70] sm:$0xff] (%p6543_p4)  ;;  %4466 = vst [vmem:[%s7739_s8 + $0xd8] sm:$0xff] (%p6543_p4), %v4465_v41 }
 0xa4b   : > { %v4299_v56 = vmul.f32 %v6682_v62, %v4298_v42  ;;  %v4306_v57 = vadd.f32 %v6181_v39, %v4295_v55  ;;  %v4296_v58 = vsel %vm624_vm2, %v4292_v54, %v4293_v29  ;;  %v4297_v46 = vsel %vm624_vm2, %v4291_v28, %v4292_v54  ;;  %v4455_v28 = vld [vmem:[%s6850_s15 + $0x50] sm:$0xff] (%p6543_p4)  ;;  %v4459_v39 = vld [vmem:[%s6850_s15 + $0x60] sm:$0xff] (%p6543_p4)  ;;  %v4461_v29 = vld [vmem:[%s6850_s15 + $0x68] sm:$0xff] (%p6543_p4)  ;;  %4464 = vst [vmem:[%s7739_s8 + $0xd0] sm:$0xff] (%p6543_p4), %v4463_v40 }
 0xa4c   : > { %v4301_v59 = vmul.f32 %v6684_v1, %v4296_v58  ;;  %v4304_v60 = vadd.f32 %v4297_v46, %v4165_v53  ;;  %v5290_v1 = vld [vmem:[%s7790_s2 + $0x9] ss:$0 sm:$0xff]  ;;  %4456 = vst [vmem:[%s7739_s8 + $0x90] sm:$0xff] (%p6543_p4), %v4455_v28  ;;  %4460 = vst [vmem:[%s7739_s8 + $0xc0] sm:$0xff] (%p6543_p4), %v4459_v39 }
 0xa4d   : > { %v4303_v61 = vadd.f32 %v4299_v56, %v4162_v27  ;;  %v4453_v27 = vld [vmem:[%s6850_s15 + $0x48] sm:$0xff] (%p6543_p4)  ;;  %4462 = vst [vmem:[%s7739_s8 + $0xc8] sm:$0xff] (%p6543_p4), %v4461_v29 }
 0xa4e   : > { %v4305_v0 = vadd.f32 %v6180_v26, %v4301_v59  ;;  %4454 = vst [vmem:[%s7739_s8 + $0x88] sm:$0xff] (%p6543_p4), %v4453_v27 }
 0xa65   : > { %v6200_v2 = vpop.f32.mrb[56].mxu1 }
 0xa66   : > { %v4276_v3 = vpop.f32.mrb[57].mxu1  ;;  %v4309_v7 = vrot.slane %v6200_v2, 1 }
 0xa67   : > { %v4307_v4 = vrot.slane %v4276_v3, 1  ;;  %v6201_v6 = vpop.f32.mrb[58].mxu1 }
 0xa68   : > { %v4310_v8 = vrot.slane %v6201_v6, 1  ;;  %v4279_v9 = vpop.f32.mrb[59].mxu1 }
 0xa69   : > { %v4308_v62 = vrot.slane %v4279_v9, 1 }
 0xa6a   : > { %v4311_v11 = vsel %vm641_vm5, %v4309_v7, %v4310_v8  ;;  %v4314_v31 = vsel %vm641_vm5, %v4310_v8, %v4307_v4 }
 0xa6b   : > { %v4318_v20 = vmul.f32 %v6699_v22, %v4314_v31  ;;  %v4321_v30 = vadd.f32 %v4311_v11, %v4305_v0  ;;  %v4312_v32 = vsel %vm641_vm5, %v4308_v62, %v4309_v7  ;;  %v4313_v33 = vsel %vm641_vm5, %v4307_v4, %v4308_v62 }
 0xa6c   : > { %v4316_v35 = vmul.f32 %v6701_v25, %v4312_v32  ;;  %v4319_v36 = vadd.f32 %v4313_v33, %v4303_v61 }
 0xa6d   : > { %v4322_v63 = vadd.f32 %v4318_v20, %v4306_v57  ;;  %v4333_v12 = vmul.f32 %v5290_v1, %v4321_v30 }
 0xa6e   : > { %v4320_v13 = vadd.f32 %v4316_v35, %v4304_v60  ;;  %v4331_v14 = vmul.f32 %v5290_v1, %v4319_v36 }
 0xa6f   : > { %v4334_v22 = vmul.f32 %v5290_v1, %v4322_v63  ;;  %v4345_v15 = vadd.f32 %v5292_v34, %v4333_v12 }
 0xa70   : > { %v4332_v5 = vmul.f32 %v5290_v1, %v4320_v13  ;;  %v4343_v48 = vadd.f32 %v5292_v34, %v4331_v14 }
 0xa71   : > { %v4346_v17 = vadd.f32 %v5292_v34, %v4334_v22  ;;  %v4349_v18 = vadd.f32 %v4345_v15, %v3945_v52  ;;  %v4449_v52 = vld [vmem:[%s6850_s15 + $0x38] sm:$0xff] (%p6543_p4) }
 0xa72   : > { %v4344_v37 = vadd.f32 %v5292_v34, %v4332_v5  ;;  %v4347_v25 = vadd.f32 %v4343_v48, %v3943_v50  ;;  %4366 = sbr.rel (!%p6543_p4) target bundleno = 2689 (0xa81), region = 40  ;;  %v4445_v50 = vld [vmem:[%s6850_s15 + $0x28] sm:$0xff] (%p6543_p4)  ;;  %4450 = vst [vmem:[%s7739_s8 + $0x58] sm:$0xff] (%p6543_p4), %v4449_v52 }
 0xa73   : > { %v4350_v10 = vadd.f32 %v4346_v17, %v3946_v49  ;;  %v4353_v19 = vmax.f32 %v4349_v18, 0.0  ;;  %v4443_v49 = vld [vmem:[%s6850_s15 + $0x20] sm:$0xff] (%p6543_p4)  ;;  %4446 = vst [vmem:[%s7739_s8 + $0x48] sm:$0xff] (%p6543_p4), %v4445_v50 }
 0xa74   : > { %v4348_v21 = vadd.f32 %v4344_v37, %v3944_v51  ;;  %v4351_v23 = vmax.f32 %v4347_v25, 0.0  ;;  %4444 = vst [vmem:[%s7739_s8 + $0x40] sm:$0xff] (%p6543_p4), %v4443_v49  ;;  %v4447_v51 = vld [vmem:[%s6850_s15 + $0x30] sm:$0xff] (%p6543_p4) }
 0xa75   : > { %v4354_v24 = vmax.f32 %v4350_v10, 0.0  ;;  %5295 = vst [vmem:[%s6850_s15 + $0x90] sm:$0xff] %v4353_v19  ;;  %4448 = vst [vmem:[%s7739_s8 + $0x50] sm:$0xff] (%p6543_p4), %v4447_v51 }
 0xa76   : > { %v4352_v26 = vmax.f32 %v4348_v21, 0.0  ;;  %5293 = vst [vmem:[%s6850_s15 + $0x80] sm:$0xff] %v4351_v23 }
 0xa77   : > { %5296 = vst [vmem:[%s6850_s15 + $0x98] sm:$0xff] %v4354_v24 }
 0xa78   : > { %5294 = vst [vmem:[%s6850_s15 + $0x88] sm:$0xff] %v4352_v26 }
 0xa7c   : > { %v4471_v42 = vld [vmem:[%s6850_s15 + $0x90] sm:$0xff] }
 0xa7d   : > { %v4467_v53 = vld [vmem:[%s6850_s15 + $0x80] sm:$0xff]  ;;  %4472 = vst [vmem:[%s7739_s8 + $0x110] sm:$0xff] %v4471_v42 }
 0xa7e   : > { %4468 = vst [vmem:[%s7739_s8 + $0x100] sm:$0xff] %v4467_v53  ;;  %v4473_v55 = vld [vmem:[%s6850_s15 + $0x98] sm:$0xff] }
 0xa7f   : > { %v4469_v54 = vld [vmem:[%s6850_s15 + $0x88] sm:$0xff]  ;;  %4474 = vst [vmem:[%s7739_s8 + $0x118] sm:$0xff] %v4473_v55 }
 0xa80   : > { %4470 = vst [vmem:[%s7739_s8 + $0x108] sm:$0xff] %v4469_v54 }
 0xa81 PF: > { %p11_p8 = scmp.ge.s32.totalorder %s6533_s19, 4   ;;  %s7794_s15 = smov %s6486_s16 }
 0xa82   : > { %s7795_s16 = smov %s6541_s22  ;;  %s7796_s17 = smov %s6533_s19 }
 0xa83   :  { %13 = sbr.rel (!%p11_p8) target bundleno = 2 (0x2), region = 155 }

// kernel: snunet_ecam_forward.3
= control target key start
LH: loop header
LB: loop body
LE: loop exit
PB: predicated region body
PF: predicated region fallthrough
CT: control target
= control target key end

     0   :  { %s3598_s13 = smov 0   ;;  %s4895_s0 = inlined_call_operand.vmem [shape: f32[2,256,128], index: 0, kind: input, shape index: {}]   ;;  %s4896_s1 = inlined_call_operand.vmem [shape: bf16[4,128,128], index: 1, kind: input, shape index: {}]   ;;  %s4897_s2 = inlined_call_operand.vmem [shape: f32[1,128], index: 2, kind: input, shape index: {}]   ;;  %s4898_s3 = inlined_call_operand.vmem [shape: bf16[128,32], index: 3, kind: input, shape index: {}]   ;;  %s4899_s4 = inlined_call_operand.vmem [shape: f32[128,8], index: 4, kind: input, shape index: {}]   ;;  %s4900_s5 = inlined_call_operand.vmem [shape: f32[8,128], index: 5, kind: input, shape index: {}]   ;;  %s4901_s6 = inlined_call_operand.vmem [shape: f32[32,8], index: 6, kind: input, shape index: {}]   ;;  %s4902_s7 = inlined_call_operand.vmem [shape: f32[8,32], index: 7, kind: input, shape index: {}]   ;;  %s4903_s8 = inlined_call_operand.vmem [shape: f32[128,128], index: 8, kind: input, shape index: {}]   ;;  %s4904_s9 = inlined_call_operand.vmem [shape: f32[1,128], index: 9, kind: input, shape index: {}]   ;;  %s4905_s10 = inlined_call_operand.vmem [shape: f32[2,256,128], index: 10, kind: output, shape index: {}]  }
   0x1 LB: > { %s2711_s14 = sadd.s32 4294967295, %s3535_s13   ;;  %p2715_p0 = scmp.ge.s32.totalorder %s3535_s13, 1  ;;  %s3535_s13 = sphi %s3598_s13, %s20_s13  }
   0x2   : > { %p312_p1 = scmp.lt.s32.totalorder %s3535_s13, 3 }
   0x4   : > { %p313_p2 = pnand %p2715_p0, %p312_p1 }
   0x6   : > { %316 = sbr.rel (%p313_p2) target bundleno = 1468 (0x5bc), region = 60 }
   0xd   : > { %v3481_v0 = vld [vmem:[%s4896_s1] sm:$0xff]   ;;  %v3483_v2 = vld [vmem:[%s4896_s1 + $0x8] sm:$0xff]   ;;  %p350_p3 = scmp.lt.s32.totalorder %s2711_s14, 1  ;;  %v3485_v4 = vld [vmem:[%s4896_s1 + $0x10] sm:$0xff]   ;;  %vm3538_vm0 = vmmov 0   ;;  %vm1829_vm2 = vcmask 1040384  }
   0xe   : > { %v3482_v1 = vld [vmem:[%s4896_s1 + $0x40] sm:$0xff]   ;;  %3013 = vmatprep.subr.bf16.mxu0 %v3481_v0  ;;  %v3484_v3 = vld [vmem:[%s4896_s1 + $0x48] sm:$0xff]   ;;  %v3486_v5 = vld [vmem:[%s4896_s1 + $0x50] sm:$0xff]   ;;  %vm1991_vm3 = vcmask 261120   ;;  %vm1902_vm4 = vcmask 64512   ;;  %s3540_s25 = smov 96  }
   0xf   : > { %3061 = vmatprep.subr.bf16.mxu1 %v3482_v1  ;;  %3014 = vmatpush3.bf16.msra.mxu0 %v3481_v0  ;;  %s5090_s14 = smov (!%p350_p3, %s2711_s14), 1  ;;  %v3487_v6 = vld [vmem:[%s4896_s1 + $0x18] sm:$0xff]   ;;  %v3489_v8 = vld [vmem:[%s4896_s1 + $0x20] sm:$0xff]   ;;  %v3491_v10 = vld [vmem:[%s4896_s1 + $0x28] sm:$0xff]   ;;  %s3541_s26 = smov 32   ;;  %vm2300_vm5 = vcmask 523264  }
  0x10   : > { %3062 = vmatpush3.bf16.msra.mxu1 %v3482_v1  ;;  %3015 = vmatprep.subr.bf16.mxu0 %v3483_v2  ;;  %v3488_v7 = vld [vmem:[%s4896_s1 + $0x58] sm:$0xff]   ;;  %s2817_s11 = sshll.u32 %s5090_s14, 8  ;;  %v3490_v9 = vld [vmem:[%s4896_s1 + $0x60] sm:$0xff]   ;;  %v3492_v13 = vld [vmem:[%s4896_s1 + $0x68] sm:$0xff]   ;;  %s3542_s27 = smov 64   ;;  %vm2302_vm6 = vcmask 785408  }
  0x11   : > { %3063 = vmatprep.subr.bf16.mxu1 %v3484_v3  ;;  %s3644_s20 = scalar_lea.vmem %s4895_s0, %s2817_s11  ;;  %v3493_v15 = vld [vmem:[%s4896_s1 + $0x30] sm:$0xff]   ;;  %v3495_v17 = vld [vmem:[%s4896_s1 + $0x38] sm:$0xff]   ;;  %v3497_v21 = vld [vmem:[%s4896_s1 + $0x80] sm:$0xff]   ;;  %s4826_s15 = scalar_lea.vmem %s4905_s10, %s2817_s11 }
  0x12   : > { %v3650_v11 = vld [vmem:[%s3644_s20] sm:$0xff]  ;;  %v3653_v12 = vld [vmem:[%s3644_s20 + $0x8] sm:$0xff]  ;;  %v3494_v16 = vld [vmem:[%s4896_s1 + $0x70] sm:$0xff]  }
  0x13   : > { %3016 = vmatpush3.bf16.msra.mxu0 %v3483_v2  ;;  %v3660_v14 = vpack.c.bf16 %v3653_v12, %v3650_v11  ;;  %v3496_v18 = vld [vmem:[%s4896_s1 + $0x78] sm:$0xff]   ;;  %v3677_v19 = vld [vmem:[%s3644_s20 + $0x10] sm:$0xff]  ;;  %v3498_v22 = vld [vmem:[%s4896_s1 + $0xc0] sm:$0xff]  }
  0x14   : > { %3064 = vmatpush3.bf16.msra.mxu1 %v3484_v3  ;;  %3017 = vmatprep.subr.bf16.mxu0 %v3485_v4  ;;  %v3680_v20 = vld [vmem:[%s3644_s20 + $0x18] sm:$0xff]  ;;  %v3689_v23 = vld [vmem:[%s3644_s20 + $0x20] sm:$0xff]  ;;  %v3692_v24 = vld [vmem:[%s3644_s20 + $0x28] sm:$0xff] }
  0x15   : > { %3065 = vmatprep.subr.bf16.mxu1 %v3486_v5  ;;  %3029 = vmatprep.mubr.bf16.mxu0 %v3660_v14  ;;  %v3696_v25 = vpack.c.bf16 %v3680_v20, %v3677_v19  ;;  %v3700_v26 = vpack.c.bf16 %v3692_v24, %v3689_v23  ;;  %v3703_v27 = vld [vmem:[%s3644_s20 + $0x30] sm:$0xff]  ;;  %v3499_v28 = vld [vmem:[%s4896_s1 + $0x88] sm:$0xff]   ;;  %v3714_v30 = vld [vmem:[%s3644_s20 + $0x38] sm:$0xff] }
  0x16   : > { %3077 = vmatprep.mubr.bf16.mxu1 %v3660_v14  ;;  %v3500_v29 = vld [vmem:[%s4896_s1 + $0xc8] sm:$0xff]   ;;  %v3718_v31 = vld [vmem:[%s3644_s20 + $0x40] sm:$0xff]  ;;  %v3501_v33 = vld [vmem:[%s4896_s1 + $0x90] sm:$0xff]   ;;  %v3732_v35 = vpack.c.bf16 %v3714_v30, %v3703_v27 }
  0x17   : > { %3018 = vmatpush3.bf16.msra.mxu0 %v3485_v4  ;;  %v3721_v32 = vld [vmem:[%s3644_s20 + $0x48] sm:$0xff]  ;;  %v3502_v34 = vld [vmem:[%s4896_s1 + $0xd0] sm:$0xff]   ;;  %v3742_v38 = vld [vmem:[%s3644_s20 + $0x58] sm:$0xff] }
  0x18   : > { %3066 = vmatpush3.bf16.msra.mxu1 %v3486_v5  ;;  %3019 = vmatprep.subr.bf16.mxu0 %v3487_v6  ;;  %v3736_v36 = vpack.c.bf16 %v3721_v32, %v3718_v31  ;;  %v3739_v37 = vld [vmem:[%s3644_s20 + $0x50] sm:$0xff]  ;;  %v3503_v39 = vld [vmem:[%s4896_s1 + $0x98] sm:$0xff]   ;;  %v3749_v40 = vld [vmem:[%s3644_s20 + $0x60] sm:$0xff] }
  0x19   : > { %3067 = vmatprep.subr.bf16.mxu1 %v3488_v7  ;;  %v3752_v41 = vld [vmem:[%s3644_s20 + $0x68] sm:$0xff]  ;;  %v3504_v42 = vld [vmem:[%s4896_s1 + $0xd8] sm:$0xff]   ;;  %v3505_v43 = vld [vmem:[%s4896_s1 + $0xa0] sm:$0xff]   ;;  %v3768_v45 = vpack.c.bf16 %v3742_v38, %v3739_v37 }
  0x1a   : > { %4958 = vst [vmem:[#allocation2_spill] sm:$0xff] %v3752_v41  ;;  %v3506_v44 = vld [vmem:[%s4896_s1 + $0xe0] sm:$0xff]   ;;  %v3772_v46 = vpack.c.bf16 %v3752_v41, %v3749_v40  ;;  %v3507_v47 = vld [vmem:[%s4896_s1 + $0xa8] sm:$0xff]   ;;  %v3784_v49 = vld [vmem:[%s3644_s20 + $0x70] sm:$0xff] }
  0x1b   : > { %3020 = vmatpush3.bf16.msra.mxu0 %v3487_v6  ;;  %v3508_v48 = vld [vmem:[%s4896_s1 + $0xe8] sm:$0xff]   ;;  %4959 = vst [vmem:[#allocation3_spill] sm:$0xff] %v3784_v49  ;;  %v3787_v50 = vld [vmem:[%s3644_s20 + $0x78] sm:$0xff]  ;;  %v3791_v51 = vld [vmem:[%s3644_s20 + $0x80] sm:$0xff] }
  0x1c   : > { %3068 = vmatpush3.bf16.msra.mxu1 %v3488_v7  ;;  %3021 = vmatprep.subr.bf16.mxu0 %v3489_v8  ;;  %4960 = vst [vmem:[#allocation4_spill] sm:$0xff] %v3791_v51  ;;  %v3794_v52 = vld [vmem:[%s3644_s20 + $0x88] sm:$0xff]  ;;  %v3509_v53 = vld [vmem:[%s4896_s1 + $0xb0] sm:$0xff]   ;;  %v3801_v54 = vpack.c.bf16 %v3787_v50, %v3784_v49  ;;  %v3511_v57 = vld [vmem:[%s4896_s1 + $0xb8] sm:$0xff]  }
  0x1d   : > { %3069 = vmatprep.subr.bf16.mxu1 %v3490_v9  ;;  %4961 = vst [vmem:[#allocation5_spill] sm:$0xff] %v3794_v52  ;;  %v3510_v55 = vld [vmem:[%s4896_s1 + $0xf0] sm:$0xff]   ;;  %v3808_v56 = vpack.c.bf16 %v3794_v52, %v3791_v51  ;;  %v3512_v58 = vld [vmem:[%s4896_s1 + $0xf8] sm:$0xff]   ;;  %v3827_v61 = vld [vmem:[%s3644_s20 + $0xa0] sm:$0xff] }
  0x1e   : > { %v3820_v59 = vld [vmem:[%s3644_s20 + $0x90] sm:$0xff]  ;;  %v3823_v60 = vld [vmem:[%s3644_s20 + $0x98] sm:$0xff]  ;;  %4964 = vst [vmem:[#allocation8_spill] sm:$0xff] %v3827_v61  ;;  %v3830_v62 = vld [vmem:[%s3644_s20 + $0xa8] sm:$0xff] }
  0x1f   : > { %3022 = vmatpush3.bf16.msra.mxu0 %v3489_v8  ;;  %4962 = vst [vmem:[#allocation6_spill] sm:$0xff] %v3820_v59  ;;  %4963 = vst [vmem:[#allocation7_spill] sm:$0xff] %v3823_v60  ;;  %v402_v63 = vpack.c.bf16 %v3823_v60, %v3820_v59  ;;  %v403_v0 = vpack.c.bf16 %v3830_v62, %v3827_v61  ;;  %v3837_v1 = vld [vmem:[%s3644_s20 + $0xb0] sm:$0xff]  ;;  %v3840_v2 = vld [vmem:[%s3644_s20 + $0xb8] sm:$0xff] }
  0x20   : > { %3070 = vmatpush3.bf16.msra.mxu1 %v3490_v9  ;;  %3023 = vmatprep.subr.bf16.mxu0 %v3491_v10  ;;  %4965 = vst [vmem:[#allocation9_spill] sm:$0xff] %v3830_v62  ;;  %4966 = vst [vmem:[#allocation10_spill] sm:$0xff] %v3837_v1  ;;  %v3843_v3 = vld [vmem:[%s3644_s20 + $0xc0] sm:$0xff]  ;;  %v3846_v4 = vld [vmem:[%s3644_s20 + $0xc8] sm:$0xff]  ;;  %v404_v5 = vpack.c.bf16 %v3840_v2, %v3837_v1 }
  0x21   : > { %3071 = vmatprep.subr.bf16.mxu1 %v3492_v13  ;;  %4967 = vst [vmem:[#allocation11_spill] sm:$0xff] %v3840_v2  ;;  %4968 = vst [vmem:[#allocation12_spill] sm:$0xff] %v3843_v3  ;;  %v405_v6 = vpack.c.bf16 %v3846_v4, %v3843_v3  ;;  %v3853_v7 = vld [vmem:[%s3644_s20 + $0xd0] sm:$0xff]  ;;  %v3856_v8 = vld [vmem:[%s3644_s20 + $0xd8] sm:$0xff] }
  0x22   : > { %4969 = vst [vmem:[#allocation13_spill] sm:$0xff] %v3846_v4  ;;  %4970 = vst [vmem:[#allocation14_spill] sm:$0xff] %v3853_v7  ;;  %v3859_v9 = vld [vmem:[%s3644_s20 + $0xe0] sm:$0xff] }
  0x23   : > { %3024 = vmatpush3.bf16.msra.mxu0 %v3491_v10  ;;  %4971 = vst [vmem:[#allocation15_spill] sm:$0xff] %v3856_v8  ;;  %4972 = vst [vmem:[#allocation16_spill] sm:$0xff] %v3859_v9  ;;  %v3862_v10 = vld [vmem:[%s3644_s20 + $0xe8] sm:$0xff]  ;;  %v4179_v61 = vld [vmem:[%s4897_s2] ss:$0 sm:$0xff] }
  0x24   : > { %3072 = vmatpush3.bf16.msra.mxu1 %v3492_v13  ;;  %3025 = vmatprep.subr.bf16.mxu0 %v3493_v15  ;;  %4973 = vst [vmem:[#allocation17_spill] sm:$0xff] %v3862_v10  ;;  %v406_v13 = vpack.c.bf16 %v3856_v8, %v3853_v7 }
  0x25   : > { %3073 = vmatprep.subr.bf16.mxu1 %v3494_v16 }
  0x27   : > { %3026 = vmatpush3.bf16.msra.mxu0 %v3493_v15  ;;  %v407_v15 = vpack.c.bf16 %v3862_v10, %v3859_v9 }
  0x28   : > { %3074 = vmatpush3.bf16.msra.mxu1 %v3494_v16  ;;  %3027 = vmatprep.subr.bf16.mxu0 %v3495_v17  ;;  %v3869_v16 = vld [vmem:[%s3644_s20 + $0xf0] sm:$0xff] }
  0x29   : > { %3075 = vmatprep.subr.bf16.mxu1 %v3496_v18  ;;  %4974 = vst [vmem:[#allocation18_spill] sm:$0xff] %v3869_v16 }
  0x2b   : > { %3028 = vmatpush3.bf16.msra.mxu0 %v3495_v17  ;;  %v3872_v17 = vld [vmem:[%s3644_s20 + $0xf8] sm:$0xff] }
  0x2c   : > { %3076 = vmatpush3.bf16.msra.mxu1 %v3496_v18  ;;  %3109 = vmatprep.subr.bf16.mxu0 %v3497_v21  ;;  %4975 = vst [vmem:[#allocation19_spill] sm:$0xff] %v3872_v17  ;;  %v408_v18 = vpack.c.bf16 %v3872_v17, %v3869_v16 }
  0x2d   : > { %3157 = vmatprep.subr.bf16.mxu1 %v3498_v22 }
  0x2e   : > { %3030 = vmatmul.mubr.bf16.vlgmr.msra.gmra.mrb[0].mxu0 %v3696_v25 }
  0x2f   : > { %3078 = vmatmul.mubr.bf16.vlgmr.msra.gmra.mrb[0].mxu1 %v3696_v25  ;;  %3110 = vmatpush3.bf16.msra.mxu0 %v3497_v21  ;;  %v3514_v21 = vld [vmem:[%s4898_s3 + $0x8] sm:$0xff]  }
  0x30   : > { %3158 = vmatpush3.bf16.msra.mxu1 %v3498_v22  ;;  %3033 = vmatprep.mubr.bf16.mxu0 %v3700_v26  ;;  %v3515_v22 = vld [vmem:[%s4898_s3 + $0x10] sm:$0xff]  }
  0x31   : > { %3081 = vmatprep.mubr.bf16.mxu1 %v3700_v26  ;;  %3111 = vmatprep.subr.bf16.mxu0 %v3499_v28 }
  0x32   : > { %3159 = vmatprep.subr.bf16.mxu1 %v3500_v29 }
  0x33   : > { %3112 = vmatpush3.bf16.msra.mxu0 %v3499_v28  ;;  %v3518_v28 = vld [vmem:[%s4898_s3 + $0x28] sm:$0xff]  }
  0x34   : > { %3160 = vmatpush3.bf16.msra.mxu1 %v3500_v29  ;;  %3113 = vmatprep.subr.bf16.mxu0 %v3501_v33  ;;  %v3519_v29 = vld [vmem:[%s4898_s3 + $0x30] sm:$0xff]  }
  0x35   : > { %3161 = vmatprep.subr.bf16.mxu1 %v3502_v34 }
  0x36   : > { %3034 = vmatmul.mubr.bf16.gmra.mrb[4].mxu0 %v3732_v35 }
  0x37   : > { %3082 = vmatmul.mubr.bf16.gmra.mrb[4].mxu1 %v3732_v35  ;;  %3037 = vmatprep.mubr.bf16.mxu0 %v3736_v36 }
  0x38   : > { %3085 = vmatprep.mubr.bf16.mxu1 %v3736_v36  ;;  %3114 = vmatpush3.bf16.msra.mxu0 %v3501_v33  ;;  %v3520_v33 = vld [vmem:[%s4898_s3 + $0x38] sm:$0xff]  }
  0x39   : > { %3162 = vmatpush3.bf16.msra.mxu1 %v3502_v34  ;;  %3115 = vmatprep.subr.bf16.mxu0 %v3503_v39  ;;  %v4906_v34 = vmov 0.0|0.0  }
  0x3a   : > { %3163 = vmatprep.subr.bf16.mxu1 %v3504_v42 }
  0x3c   : > { %3116 = vmatpush3.bf16.msra.mxu0 %v3503_v39 }
  0x3d   : > { %3164 = vmatpush3.bf16.msra.mxu1 %v3504_v42  ;;  %3117 = vmatprep.subr.bf16.mxu0 %v3505_v43  ;;  %v1739_v42 = vld [vmem:[%s4899_s4 + $0x10] sm:$0xff] }
  0x3e   : > { %3038 = vmatmul.mubr.bf16.gmra.mrb[8].mxu0 %v3768_v45  ;;  %3165 = vmatprep.subr.bf16.mxu1 %v3506_v44 }
  0x3f   : > { %3086 = vmatmul.mubr.bf16.gmra.mrb[8].mxu1 %v3768_v45  ;;  %3041 = vmatprep.mubr.bf16.mxu0 %v3772_v46 }
  0x40   : > { %3089 = vmatprep.mubr.bf16.mxu1 %v3772_v46  ;;  %3118 = vmatpush3.bf16.msra.mxu0 %v3505_v43  ;;  %v1740_v43 = vld [vmem:[%s4899_s4 + $0x18] sm:$0xff] }
  0x41   : > { %3166 = vmatpush3.bf16.msra.mxu1 %v3506_v44  ;;  %3119 = vmatprep.subr.bf16.mxu0 %v3507_v47  ;;  %v3393_v44 = vpack.c.bf16 %v1740_v43, %v1739_v42 }
  0x42   : > { %3167 = vmatprep.subr.bf16.mxu1 %v3508_v48 }
  0x44   : > { %3120 = vmatpush3.bf16.msra.mxu0 %v3507_v47 }
  0x45   : > { %3168 = vmatpush3.bf16.msra.mxu1 %v3508_v48  ;;  %3121 = vmatprep.subr.bf16.mxu0 %v3509_v53  ;;  %v1743_v48 = vld [vmem:[%s4899_s4 + $0x30] sm:$0xff] }
  0x46   : > { %3042 = vmatmul.mubr.bf16.gmra.mrb[12].mxu0 %v3801_v54  ;;  %3169 = vmatprep.subr.bf16.mxu1 %v3510_v55 }
  0x47   : > { %3090 = vmatmul.mubr.bf16.gmra.mrb[12].mxu1 %v3801_v54  ;;  %3045 = vmatprep.mubr.bf16.mxu0 %v3808_v56 }
  0x48   : > { %3093 = vmatprep.mubr.bf16.mxu1 %v3808_v56  ;;  %3122 = vmatpush3.bf16.msra.mxu0 %v3509_v53  ;;  %v1744_v53 = vld [vmem:[%s4899_s4 + $0x38] sm:$0xff] }
  0x49   : > { %3170 = vmatpush3.bf16.msra.mxu1 %v3510_v55  ;;  %3123 = vmatprep.subr.bf16.mxu0 %v3511_v57 }
  0x4a   : > { %3171 = vmatprep.subr.bf16.mxu1 %v3512_v58 }
  0x4c   : > { %3124 = vmatpush3.bf16.msra.mxu0 %v3511_v57 }
  0x4d   : > { %3172 = vmatpush3.bf16.msra.mxu1 %v3512_v58  ;;  %v1745_v58 = vld [vmem:[%s4899_s4 + $0x40] sm:$0xff] }
  0x4e   : > { %3046 = vmatmul.mubr.bf16.gmra.mrb[16].mxu0 %v402_v63  ;;  %3389 = vmatprep.subr.bf16.mxu1 %v4906_v34 }
  0x4f   : > { %3094 = vmatmul.mubr.bf16.gmra.mrb[16].mxu1 %v402_v63  ;;  %3049 = vmatprep.mubr.bf16.mxu0 %v403_v0 }
  0x50   : > { %3097 = vmatprep.mubr.bf16.mxu1 %v403_v0 }
  0x56   : > { %3050 = vmatmul.mubr.bf16.gmra.mrb[20].mxu0 %v404_v5 }
  0x57   : > { %3098 = vmatmul.mubr.bf16.gmra.mrb[20].mxu1 %v404_v5  ;;  %3053 = vmatprep.mubr.bf16.mxu0 %v405_v6 }
  0x58   : > { %3101 = vmatprep.mubr.bf16.mxu1 %v405_v6 }
  0x5e   : > { %3054 = vmatmul.mubr.bf16.gmra.mrb[24].mxu0 %v406_v13 }
  0x5f   : > { %3102 = vmatmul.mubr.bf16.gmra.mrb[24].mxu1 %v406_v13  ;;  %3057 = vmatprep.mubr.bf16.mxu0 %v407_v15 }
  0x60   : > { %3105 = vmatprep.mubr.bf16.mxu1 %v407_v15 }
  0x66   : > { %3058 = vmatmul.mubr.bf16.gmra.mrb[28].mxu0 %v408_v18 }
  0x67   : > { %3106 = vmatmul.mubr.bf16.gmra.mrb[28].mxu1 %v408_v18  ;;  %3125 = vmatprep.mubr.bf16.mxu0 %v3660_v14 }
  0x68   : > { %3173 = vmatprep.mubr.bf16.mxu1 %v3660_v14  ;;  %v3513_v14 = vld [vmem:[%s4898_s3] sm:$0xff]  }
  0x69   : > { %3205 = vmatprep.subr.bf16.mxu0 %v3513_v14 }
  0x6e   : > { %3126 = vmatmul.mubr.bf16.vlgmr.msra.gmra.mrb[32].mxu0 %v3696_v25 }
  0x6f   : > { %3174 = vmatmul.mubr.bf16.vlgmr.msra.gmra.mrb[32].mxu1 %v3696_v25  ;;  %3129 = vmatprep.mubr.bf16.mxu0 %v3700_v26  ;;  %v3516_v25 = vld [vmem:[%s4898_s3 + $0x18] sm:$0xff]  }
  0x70   : > { %3177 = vmatprep.mubr.bf16.mxu1 %v3700_v26  ;;  %3206 = vmatpush3.bf16.msra.mxu0 %v3513_v14  ;;  %v3517_v26 = vld [vmem:[%s4898_s3 + $0x20] sm:$0xff]  }
  0x71   : > { %3207 = vmatprep.subr.bf16.mxu0 %v3514_v21 }
  0x74   : > { %3208 = vmatpush3.bf16.msra.mxu0 %v3514_v21 }
  0x75   : > { %3209 = vmatprep.subr.bf16.mxu0 %v3515_v22 }
  0x76   : > { %3130 = vmatmul.mubr.bf16.gmra.mrb[36].mxu0 %v3732_v35 }
  0x77   : > { %3178 = vmatmul.mubr.bf16.gmra.mrb[36].mxu1 %v3732_v35  ;;  %3133 = vmatprep.mubr.bf16.mxu0 %v3736_v36  ;;  %v1737_v35 = vld [vmem:[%s4899_s4] sm:$0xff] }
  0x78   : > { %3181 = vmatprep.mubr.bf16.mxu1 %v3736_v36  ;;  %3210 = vmatpush3.bf16.msra.mxu0 %v3515_v22  ;;  %v1738_v36 = vld [vmem:[%s4899_s4 + $0x8] sm:$0xff] }
  0x79   : > { %3211 = vmatprep.subr.bf16.mxu0 %v3516_v25  ;;  %v3390_v39 = vpack.c.bf16 %v1738_v36, %v1737_v35  ;;  %v1750_v36 = vld [vmem:[%s4899_s4 + $0x68] sm:$0xff] }
  0x7b   : > { %3391 = vmatpush3.bf16.msra.mxu1 %v3390_v39  ;;  %v4908_v39 = vmov 0.0  }
  0x7c   : > { %3212 = vmatpush3.bf16.msra.mxu0 %v3516_v25  ;;  %3392 = vmatprep.subr.bf16.mxu1 %v4906_v34 }
  0x7d   : > { %3213 = vmatprep.subr.bf16.mxu0 %v3517_v26 }
  0x7e   : > { %3134 = vmatmul.mubr.bf16.gmra.mrb[40].mxu0 %v3768_v45 }
  0x7f   : > { %3182 = vmatmul.mubr.bf16.gmra.mrb[40].mxu1 %v3768_v45  ;;  %3137 = vmatprep.mubr.bf16.mxu0 %v3772_v46  ;;  %v1741_v45 = vld [vmem:[%s4899_s4 + $0x20] sm:$0xff] }
  0x80   : > { %3185 = vmatprep.mubr.bf16.mxu1 %v3772_v46  ;;  %3214 = vmatpush3.bf16.msra.mxu0 %v3517_v26  ;;  %v1742_v46 = vld [vmem:[%s4899_s4 + $0x28] sm:$0xff]  ;;  %v1747_v26 = vld [vmem:[%s4899_s4 + $0x50] sm:$0xff] }
  0x81   : > { %3215 = vmatprep.subr.bf16.mxu0 %v3518_v28  ;;  %3394 = vmatpush3.bf16.msra.mxu1 %v3393_v44  ;;  %v3396_v47 = vpack.c.bf16 %v1742_v46, %v1741_v45 }
  0x82   : > { %3395 = vmatprep.subr.bf16.mxu1 %v4906_v34 }
  0x84   : > { %3216 = vmatpush3.bf16.msra.mxu0 %v3518_v28  ;;  %v1748_v28 = vld [vmem:[%s4899_s4 + $0x58] sm:$0xff] }
  0x85   : > { %3217 = vmatprep.subr.bf16.mxu0 %v3519_v29  ;;  %3397 = vmatpush3.bf16.msra.mxu1 %v3396_v47  ;;  %v3405_v35 = vpack.c.bf16 %v1748_v28, %v1747_v26 }
  0x86   : > { %3138 = vmatmul.mubr.bf16.gmra.mrb[44].mxu0 %v3801_v54  ;;  %3398 = vmatprep.subr.bf16.mxu1 %v4906_v34 }
  0x87   : > { %3186 = vmatmul.mubr.bf16.gmra.mrb[44].mxu1 %v3801_v54  ;;  %3141 = vmatprep.mubr.bf16.mxu0 %v3808_v56  ;;  %v3399_v54 = vpack.c.bf16 %v1744_v53, %v1743_v48 }
  0x88   : > { %3189 = vmatprep.mubr.bf16.mxu1 %v3808_v56  ;;  %3218 = vmatpush3.bf16.msra.mxu0 %v3519_v29  ;;  %v1749_v29 = vld [vmem:[%s4899_s4 + $0x60] sm:$0xff] }
  0x89   : > { %3219 = vmatprep.subr.bf16.mxu0 %v3520_v33  ;;  %3400 = vmatpush3.bf16.msra.mxu1 %v3399_v54  ;;  %v3408_v47 = vpack.c.bf16 %v1750_v36, %v1749_v29 }
  0x8a   : > { %3401 = vmatprep.subr.bf16.mxu1 %v4906_v34 }
  0x8c   : > { %3220 = vmatpush3.bf16.msra.mxu0 %v3520_v33 }
  0x8e   : > { %3142 = vmatmul.mubr.bf16.gmra.mrb[48].mxu0 %v402_v63 }
  0x8f   : > { %3190 = vmatmul.mubr.bf16.gmra.mrb[48].mxu1 %v402_v63  ;;  %3145 = vmatprep.mubr.bf16.mxu0 %v403_v0  ;;  %v1746_v63 = vld [vmem:[%s4899_s4 + $0x48] sm:$0xff] }
  0x90   : > { %3193 = vmatprep.mubr.bf16.mxu1 %v403_v0 }
  0x96   : > { %3146 = vmatmul.mubr.bf16.gmra.mrb[52].mxu0 %v404_v5 }
  0x97   : > { %3194 = vmatmul.mubr.bf16.gmra.mrb[52].mxu1 %v404_v5  ;;  %3149 = vmatprep.mubr.bf16.mxu0 %v405_v6 }
  0x98   : > { %3197 = vmatprep.mubr.bf16.mxu1 %v405_v6 }
  0x9e   : > { %3150 = vmatmul.mubr.bf16.gmra.mrb[56].mxu0 %v406_v13 }
  0x9f   : > { %3198 = vmatmul.mubr.bf16.gmra.mrb[56].mxu1 %v406_v13  ;;  %3153 = vmatprep.mubr.bf16.mxu0 %v407_v15  ;;  %v3402_v13 = vpack.c.bf16 %v1746_v63, %v1745_v58  ;;  %v1751_v58 = vld [vmem:[%s4899_s4 + $0x70] sm:$0xff]  ;;  %v1752_v63 = vld [vmem:[%s4899_s4 + $0x78] sm:$0xff] }
  0xa0   : > { %3201 = vmatprep.mubr.bf16.mxu1 %v407_v15  ;;  %v3411_v29 = vpack.c.bf16 %v1752_v63, %v1751_v58 }
  0xa1   : > { %3403 = vmatpush3.bf16.msra.mxu1 %v3402_v13 }
  0xa2   : > { %3404 = vmatprep.subr.bf16.mxu1 %v4906_v34 }
  0xa5   : > { %3406 = vmatpush3.bf16.msra.mxu1 %v3405_v35 }
  0xa6   : > { %3154 = vmatmul.mubr.bf16.gmra.mrb[60].mxu0 %v408_v18  ;;  %3407 = vmatprep.subr.bf16.mxu1 %v4906_v34 }
  0xa7   : > { %3202 = vmatmul.mubr.bf16.gmra.mrb[60].mxu1 %v408_v18 }
  0xa8   : > { %3285 = vmatprep.mubr.msk.f32.mxu1 %vm3538_vm0, %v4908_v39 }
  0xa9   : > { %3409 = vmatpush3.bf16.msra.mxu1 %v3408_v47 }
  0xaa   : > { %3410 = vmatprep.subr.bf16.mxu1 %v4906_v34 }
  0xad   : > { %3412 = vmatpush3.bf16.msra.mxu1 %v3411_v29 }
  0xae   : > { %3288 = vmatprep.subr.mxu1 %v4908_v39 }
 0x101   : > { %v3947_v55 = vpop.f32.mrb[0].mxu0 }
 0x102   : > { %v3949_v56 = vpop.f32.mrb[0].mxu1  ;;  %v3951_v57 = vpop.f32.mrb[1].mxu0 }
 0x103   : > { %v3961_v5 = vpop.f32.mrb[1].mxu1  ;;  %v3963_v6 = vpop.f32.mrb[2].mxu0 }
 0x104   : > { %v3967_v18 = vpop.f32.mrb[2].mxu1  ;;  %v3969_v14 = vpop.f32.mrb[3].mxu0 }
 0x105   : > { %v3973_v22 = vpop.f32.mrb[3].mxu1 }
 0x109   : > { %v3987_v33 = vpop.f32.mrb[4].mxu0 }
 0x10a   : > { %v3994_v42 = vpop.f32.mrb[4].mxu1  ;;  %v3996_v43 = vpop.f32.mrb[5].mxu0 }
 0x10b   : > { %v4000_v45 = vpop.f32.mrb[5].mxu1  ;;  %v4002_v46 = vpop.f32.mrb[6].mxu0 }
 0x10c   : > { %v4006_v53 = vpop.f32.mrb[6].mxu1  ;;  %v4008_v54 = vpop.f32.mrb[7].mxu0 }
 0x10d   : > { %v4019_v26 = vpop.f32.mrb[7].mxu1 }
 0x111   : > { %v4024_v35 = vpop.f32.mrb[8].mxu0 }
 0x112   : > { %v4026_v36 = vpop.f32.mrb[8].mxu1  ;;  %v4028_v48 = vpop.f32.mrb[9].mxu0 }
 0x113   : > { %v4032_v25 = vpop.f32.mrb[9].mxu1  ;;  %v4034_v13 = vpop.f32.mrb[10].mxu0 }
 0x114   : > { %v4038_v58 = vpop.f32.mrb[10].mxu1  ;;  %v4040_v63 = vpop.f32.mrb[11].mxu0 }
 0x115   : > { %v4045_v28 = vpop.f32.mrb[11].mxu1 }
 0x119   : > { %v4049_v21 = vpop.f32.mrb[12].mxu0 }
 0x11a   : > { %v4051_v29 = vpop.f32.mrb[12].mxu1  ;;  %v4053_v15 = vpop.f32.mrb[13].mxu0 }
 0x11b   : > { %v4057_v0 = vpop.f32.mrb[13].mxu1  ;;  %v4059_v39 = vpop.f32.mrb[14].mxu0 }
 0x11c   : > { %v4063_v10 = vpop.f32.mrb[14].mxu1  ;;  %v4065_v17 = vpop.f32.mrb[15].mxu0 }
 0x11d   : > { %v4069_v9 = vpop.f32.mrb[15].mxu1 }
 0x121   : > { %v4073_v47 = vpop.f32.mrb[16].mxu0 }
 0x122   : > { %v4075_v7 = vpop.f32.mrb[16].mxu1  ;;  %v4077_v4 = vpop.f32.mrb[17].mxu0 }
 0x123   : > { %4976 = vst [vmem:[#allocation20_spill] sm:$0xff] %v4077_v4  ;;  %v4081_v8 = vpop.f32.mrb[17].mxu1  ;;  %v4083_v3 = vpop.f32.mrb[18].mxu0 }
 0x124   : > { %4977 = vst [vmem:[#allocation21_spill] sm:$0xff] %v4081_v8  ;;  %4978 = vst [vmem:[#allocation22_spill] sm:$0xff] %v4083_v3  ;;  %v4087_v1 = vpop.f32.mrb[18].mxu1  ;;  %v4089_v62 = vpop.f32.mrb[19].mxu0  ;;  %v5005_v3 = vmax.f32 %v3947_v55, %v3949_v56  ;;  %v5006_v8 = vmax.f32 %v3951_v57, %v3961_v5  ;;  %v5008_v57 = vmax.f32 %v3969_v14, %v3973_v22 }
 0x125   : > { %4979 = vst [vmem:[#allocation23_spill] sm:$0xff] %v4087_v1  ;;  %4980 = vst [vmem:[#allocation24_spill] sm:$0xff] %v4089_v62  ;;  %v4093_v2 = vpop.f32.mrb[19].mxu1 }
 0x126   : > { %4981 = vst [vmem:[#allocation25_spill] sm:$0xff] %v4093_v2 }
 0x129   : > { %v4097_v34 = vpop.f32.mrb[20].mxu0 }
 0x12a   : > { %4982 = vst [vmem:[#allocation26_spill] sm:$0xff] %v4097_v34  ;;  %v4099_v59 = vpop.f32.mrb[20].mxu1  ;;  %v4101_v52 = vpop.f32.mrb[21].mxu0 }
 0x12b   : > { %4983 = vst [vmem:[#allocation27_spill] sm:$0xff] %v4099_v59  ;;  %4984 = vst [vmem:[#allocation28_spill] sm:$0xff] %v4101_v52  ;;  %v4105_v60 = vpop.f32.mrb[21].mxu1  ;;  %v4107_v51 = vpop.f32.mrb[22].mxu0 }
 0x12c   : > { %4985 = vst [vmem:[#allocation29_spill] sm:$0xff] %v4105_v60  ;;  %4986 = vst [vmem:[#allocation30_spill] sm:$0xff] %v4107_v51  ;;  %v4111_v49 = vpop.f32.mrb[22].mxu1  ;;  %v4113_v1 = vpop.f32.mrb[23].mxu0 }
 0x12d   : > { %4987 = vst [vmem:[#allocation31_spill] sm:$0xff] %v4111_v49  ;;  %4988 = vst [vmem:[#allocation32_spill] sm:$0xff] %v4113_v1  ;;  %v4117_v2 = vpop.f32.mrb[23].mxu1  ;;  %v4956_v1 = vlaneseq }
 0x12e   : > { %4989 = vst [vmem:[#allocation33_spill] sm:$0xff] %v4117_v2 }
 0x131   : > { %v4121_v44 = vpop.f32.mrb[24].mxu0 }
 0x132   : > { %4990 = vst [vmem:[#allocation34_spill] sm:$0xff] %v4121_v44  ;;  %v4123_v59 = vpop.f32.mrb[24].mxu1  ;;  %v4125_v34 = vpop.f32.mrb[25].mxu0 }
 0x133   : > { %4991 = vst [vmem:[#allocation35_spill] sm:$0xff] %v4123_v59  ;;  %4992 = vst [vmem:[#allocation36_spill] sm:$0xff] %v4125_v34  ;;  %v4129_v60 = vpop.f32.mrb[25].mxu1  ;;  %v4131_v52 = vpop.f32.mrb[26].mxu0 }
 0x134   : > { %4993 = vst [vmem:[#allocation37_spill] sm:$0xff] %v4129_v60  ;;  %4994 = vst [vmem:[#allocation38_spill] sm:$0xff] %v4131_v52  ;;  %v4135_v49 = vpop.f32.mrb[26].mxu1  ;;  %v4137_v51 = vpop.f32.mrb[27].mxu0 }
 0x135   : > { %4995 = vst [vmem:[#allocation39_spill] sm:$0xff] %v4135_v49  ;;  %4996 = vst [vmem:[#allocation40_spill] sm:$0xff] %v4137_v51  ;;  %v4141_v2 = vpop.f32.mrb[27].mxu1 }
 0x136   : > { %4997 = vst [vmem:[#allocation41_spill] sm:$0xff] %v4141_v2 }
 0x139   : > { %v4145_v16 = vpop.f32.mrb[28].mxu0 }
 0x13a   : > { %4998 = vst [vmem:[#allocation42_spill] sm:$0xff] %v4145_v16  ;;  %v4147_v59 = vpop.f32.mrb[28].mxu1  ;;  %v4149_v44 = vpop.f32.mrb[29].mxu0 }
 0x13b   : > { %4999 = vst [vmem:[#allocation43_spill] sm:$0xff] %v4147_v59  ;;  %5000 = vst [vmem:[#allocation44_spill] sm:$0xff] %v4149_v44  ;;  %v4153_v60 = vpop.f32.mrb[29].mxu1  ;;  %v4155_v34 = vpop.f32.mrb[30].mxu0  ;;  %v1409_v59 = vand.u32 127, %v4956_v1  ;;  %v5007_v1 = vmax.f32 %v3963_v6, %v3967_v18 }
 0x13c   : > { %5001 = vst [vmem:[#allocation45_spill] sm:$0xff] %v4153_v60  ;;  %5002 = vst [vmem:[#allocation46_spill] sm:$0xff] %v4155_v34  ;;  %v4159_v49 = vpop.f32.mrb[30].mxu1  ;;  %v4161_v52 = vpop.f32.mrb[31].mxu0 }
 0x13d   : > { %5003 = vst [vmem:[#allocation47_spill] sm:$0xff] %v4159_v49  ;;  %v4165_v51 = vpop.f32.mrb[31].mxu1  ;;  %v1414_v34 = vand.u32 31, %v1409_v59 }
 0x13e   : > { %5004 = vst [vmem:[#allocation48_spill] sm:$0xff] %v4165_v51 }
 0x13f   : > { %vm4189_vm1 = vcmp.lt.s32.totalorder %v1414_v34, 16 }
 0x141   : > { %v3127_v16 = vpop.f32.mrb[32].mxu0 }
 0x142   : > { %v1120_v62 = vmax.f32 %v5005_v3, %v3127_v16  ;;  %v3175_v60 = vpop.f32.mrb[32].mxu1  ;;  %v991_v44 = vpop.f32.mrb[33].mxu0 }
 0x143   : > { %v1118_v4 = vmax.f32 %v5006_v8, %v991_v44  ;;  %v1249_v41 = vpop.f32.mrb[33].mxu1  ;;  %v3128_v2 = vpop.f32.mrb[34].mxu0 }
 0x144   : > { %v1378_v49 = vmax.f32 %v1120_v62, %v3175_v60  ;;  %v1121_v55 = vmax.f32 %v5007_v1, %v3128_v2  ;;  %v3176_v3 = vpop.f32.mrb[34].mxu1  ;;  %v994_v16 = vpop.f32.mrb[35].mxu0 }
 0x145   : > { %v1376_v56 = vmax.f32 %v1118_v4, %v1249_v41  ;;  %v1119_v8 = vmax.f32 %v5008_v57, %v994_v16  ;;  %v1252_v5 = vpop.f32.mrb[35].mxu1 }
 0x146   : > { %v1379_v44 = vmax.f32 %v1121_v55, %v3176_v3  ;;  %v1432_v59 = vadd.f32 %v4179_v61, %v1378_v49  ;;  %v5011_v49 = vmax.f32 %v3987_v33, %v3994_v42  ;;  %v5012_v33 = vmax.f32 %v3996_v43, %v4000_v45 }
 0x147   : > { %v1430_v60 = vadd.f32 %v4179_v61, %v1376_v56  ;;  %v1377_v62 = vmax.f32 %v1119_v8, %v1252_v5  ;;  %v5013_v56 = vmax.f32 %v4002_v46, %v4006_v53  ;;  %v5014_v45 = vmax.f32 %v4008_v54, %v4019_v26 }
 0x148   : > { %v1433_v1 = vadd.f32 %v4179_v61, %v1379_v44  ;;  %v4206_v34 = vsel %vm4189_vm1, %v3677_v19, %v1432_v59 }
 0x149   : > { %v1431_v2 = vadd.f32 %v4179_v61, %v1377_v62  ;;  %v3131_v41 = vpop.f32.mrb[36].mxu0  ;;  %v4211_v22 = vsel %vm4189_vm1, %v3650_v11, %v1430_v60 }
 0x14a   : > { %v4198_v4 = vsel %vm4189_vm1, %v3680_v20, %v1433_v1  ;;  %v1124_v6 = vmax.f32 %v5011_v49, %v3131_v41  ;;  %v3179_v18 = vpop.f32.mrb[36].mxu1  ;;  %v1007_v14 = vpop.f32.mrb[37].mxu0 }
 0x14b   : > { %v4216_v20 = vsel %vm4189_vm1, %v3653_v12, %v1431_v2  ;;  %v1122_v42 = vmax.f32 %v5012_v33, %v1007_v14  ;;  %v1265_v55 = vpop.f32.mrb[37].mxu1  ;;  %v3132_v3 = vpop.f32.mrb[38].mxu0  ;;  %v1497_v5 = vpack.c.bf16 %v4198_v4, %v4206_v34 }
 0x14c   : > { %v1754_v19 = vadd.f32 %v4216_v20, %v4211_v22  ;;  %v1382_v16 = vmax.f32 %v1124_v6, %v3179_v18  ;;  %v1125_v11 = vmax.f32 %v5013_v56, %v3132_v3  ;;  %v3180_v57 = vpop.f32.mrb[38].mxu1  ;;  %v1010_v8 = vpop.f32.mrb[39].mxu0  ;;  %v1496_v12 = vpack.c.bf16 %v4216_v20, %v4211_v22 }
 0x14d   : > { %v1380_v43 = vmax.f32 %v1122_v42, %v1265_v55  ;;  %v1123_v44 = vmax.f32 %v5014_v45, %v1010_v8  ;;  %v1268_v59 = vpop.f32.mrb[39].mxu1  ;;  %v5015_v18 = vmax.f32 %v4024_v35, %v4026_v36  ;;  %v5016_v3 = vmax.f32 %v4028_v48, %v4032_v25 }
 0x14e   : > { %v1755_v60 = vadd.f32 %v1754_v19, %v4206_v34  ;;  %v1383_v62 = vmax.f32 %v1125_v11, %v3180_v57  ;;  %3221 = vmatprep.mubr.bf16.mxu0 %v1496_v12  ;;  %v1436_v41 = vadd.f32 %v4179_v61, %v1382_v16  ;;  %v5017_v11 = vmax.f32 %v4034_v13, %v4038_v58 }
 0x14f   : > { %v1434_v46 = vadd.f32 %v4179_v61, %v1380_v43  ;;  %v1381_v53 = vmax.f32 %v1123_v44, %v1268_v59  ;;  %3222 = vmatmul.mubr.bf16.vlgmr.msra.gmra.mrb[64].mxu0 %v1497_v5  ;;  %v5018_v25 = vmax.f32 %v4040_v63, %v4045_v28 }
 0x150   : > { %v1756_v1 = vadd.f32 %v1755_v60, %v4198_v4  ;;  %v1437_v2 = vadd.f32 %v4179_v61, %v1383_v62 }
 0x151   : > { %v4241_v54 = vsel %vm4189_vm1, %v3689_v23, %v1434_v46  ;;  %v1435_v26 = vadd.f32 %v4179_v61, %v1381_v53  ;;  %v3135_v49 = vpop.f32.mrb[40].mxu0 }
 0x152   : > { %v1757_v6 = vadd.f32 %v1756_v1, %v4241_v54  ;;  %v1128_v14 = vmax.f32 %v5015_v18, %v3135_v49  ;;  %v3183_v33 = vpop.f32.mrb[40].mxu1  ;;  %v1023_v42 = vpop.f32.mrb[41].mxu0  ;;  %v4251_v55 = vsel %vm4189_vm1, %v3714_v30, %v1437_v2  ;;  %v5019_v1 = vmax.f32 %v4049_v21, %v4051_v29 }
 0x153   : > { %v4256_v23 = vsel %vm4189_vm1, %v3692_v24, %v1435_v26  ;;  %v1126_v19 = vmax.f32 %v5016_v3, %v1023_v42  ;;  %v1281_v16 = vpop.f32.mrb[41].mxu1  ;;  %v3136_v56 = vpop.f32.mrb[42].mxu0  ;;  %v4268_v24 = vsel %vm4189_vm1, %v3703_v27, %v1436_v41  ;;  %v5021_v42 = vmax.f32 %v4059_v39, %v4063_v10 }
 0x154   : > { %v1758_v35 = vadd.f32 %v1757_v6, %v4256_v23  ;;  %v1386_v36 = vmax.f32 %v1128_v14, %v3183_v33  ;;  %v1129_v57 = vmax.f32 %v5017_v11, %v3136_v56  ;;  %v3184_v30 = vpop.f32.mrb[42].mxu1  ;;  %v1026_v8 = vpop.f32.mrb[43].mxu0  ;;  %v1498_v43 = vpack.c.bf16 %v4256_v23, %v4241_v54 }
 0x155   : > { %v1384_v12 = vmax.f32 %v1126_v19, %v1281_v16  ;;  %v1127_v48 = vmax.f32 %v5018_v25, %v1026_v8  ;;  %v1284_v5 = vpop.f32.mrb[43].mxu1  ;;  %v1499_v58 = vpack.c.bf16 %v4251_v55, %v4268_v24  ;;  %v5020_v6 = vmax.f32 %v4053_v15, %v4057_v0 }
 0x156   : > { %v1759_v45 = vadd.f32 %v1758_v35, %v4268_v24  ;;  %v1387_v13 = vmax.f32 %v1129_v57, %v3184_v30  ;;  %3225 = vmatprep.mubr.bf16.mxu0 %v1498_v43  ;;  %v1440_v28 = vadd.f32 %v4179_v61, %v1386_v36  ;;  %v5022_v0 = vmax.f32 %v4065_v17, %v4069_v9 }
 0x157   : > { %v1438_v44 = vadd.f32 %v4179_v61, %v1384_v12  ;;  %v1385_v59 = vmax.f32 %v1127_v48, %v1284_v5  ;;  %3226 = vmatmul.mubr.bf16.gmra.mrb[68].mxu0 %v1499_v58  ;;  %v5023_v48 = vmax.f32 %v4073_v47, %v4075_v7  ;;  %v5024_v58 = vld [vmem:[#allocation2_spill] sm:$0xff] }
 0x158   : > { %v1760_v27 = vadd.f32 %v1759_v45, %v4251_v55  ;;  %v1441_v60 = vadd.f32 %v4179_v61, %v1387_v13 }
 0x159   : > { %v4285_v63 = vsel %vm4189_vm1, %v3718_v31, %v1438_v44  ;;  %v1439_v62 = vadd.f32 %v4179_v61, %v1385_v59  ;;  %v3139_v46 = vpop.f32.mrb[44].mxu0  ;;  %v5025_v44 = vld [vmem:[#allocation20_spill] sm:$0xff]  ;;  %v5026_v59 = vld [vmem:[#allocation21_spill] sm:$0xff] }
 0x15a   : > { %v1761_v53 = vadd.f32 %v1760_v27, %v4285_v63  ;;  %v1132_v2 = vmax.f32 %v5019_v1, %v3139_v46  ;;  %v3187_v41 = vpop.f32.mrb[44].mxu1  ;;  %v1039_v26 = vpop.f32.mrb[45].mxu0  ;;  %v4295_v49 = vsel %vm4189_vm1, %v3742_v38, %v1441_v60  ;;  %v5027_v27 = vmax.f32 %v5025_v44, %v5026_v59  ;;  %v5028_v46 = vld [vmem:[#allocation22_spill] sm:$0xff]  ;;  %v5041_v44 = vld [vmem:[#allocation28_spill] sm:$0xff]  ;;  %v5042_v59 = vld [vmem:[#allocation29_spill] sm:$0xff] }
 0x15b   : > { %v4300_v31 = vsel %vm4189_vm1, %v3721_v32, %v1439_v62  ;;  %v1130_v18 = vmax.f32 %v5020_v6, %v1039_v26  ;;  %v1297_v14 = vpop.f32.mrb[45].mxu1  ;;  %v3140_v33 = vpop.f32.mrb[46].mxu0  ;;  %v4312_v32 = vsel %vm4189_vm1, %v3739_v37, %v1440_v28  ;;  %v5031_v26 = vld [vmem:[#allocation3_spill] sm:$0xff] }
 0x15c   : > { %v1762_v21 = vadd.f32 %v1761_v53, %v4300_v31  ;;  %v1390_v29 = vmax.f32 %v1132_v2, %v3187_v41  ;;  %v1133_v3 = vmax.f32 %v5021_v42, %v3140_v33  ;;  %v3188_v38 = vpop.f32.mrb[46].mxu1  ;;  %v1042_v19 = vpop.f32.mrb[47].mxu0  ;;  %v1500_v35 = vpack.c.bf16 %v4300_v31, %v4285_v63  ;;  %v5029_v53 = vld [vmem:[#allocation23_spill] sm:$0xff]  ;;  %v5033_v33 = vld [vmem:[#allocation25_spill] sm:$0xff] }
 0x15d   : > { %v1388_v16 = vmax.f32 %v1130_v18, %v1297_v14  ;;  %v1131_v15 = vmax.f32 %v5022_v0, %v1042_v19  ;;  %v1300_v56 = vpop.f32.mrb[47].mxu1  ;;  %v1501_v39 = vpack.c.bf16 %v4295_v49, %v4312_v32  ;;  %v5030_v1 = vmax.f32 %v5028_v46, %v5029_v53  ;;  %v5032_v14 = vld [vmem:[#allocation24_spill] sm:$0xff]  ;;  %v5044_v46 = vld [vmem:[#allocation30_spill] sm:$0xff]  ;;  %v5045_v53 = vld [vmem:[#allocation31_spill] sm:$0xff] }
 0x15e   : > { %v1763_v36 = vadd.f32 %v1762_v21, %v4312_v32  ;;  %v1391_v10 = vmax.f32 %v1133_v3, %v3188_v38  ;;  %3229 = vmatprep.mubr.bf16.mxu0 %v1500_v35  ;;  %v1444_v9 = vadd.f32 %v4179_v61, %v1390_v29  ;;  %v5034_v21 = vmax.f32 %v5032_v14, %v5033_v33  ;;  %v5048_v33 = vld [vmem:[#allocation32_spill] sm:$0xff] }
 0x15f   : > { %v1442_v11 = vadd.f32 %v4179_v61, %v1388_v16  ;;  %v1389_v57 = vmax.f32 %v1131_v15, %v1300_v56  ;;  %3230 = vmatmul.mubr.bf16.gmra.mrb[72].mxu0 %v1501_v39 }
 0x160   : > { %v1764_v37 = vadd.f32 %v1763_v36, %v4295_v49  ;;  %v1445_v30 = vadd.f32 %v4179_v61, %v1391_v10  ;;  %v4356_v6 = vsel %vm4189_vm1, %v5031_v26, %v1444_v9  ;;  %v5035_v10 = vld [vmem:[#allocation4_spill] sm:$0xff]  ;;  %v5037_v9 = vld [vmem:[#allocation27_spill] sm:$0xff]  ;;  %v5047_v26 = vld [vmem:[#allocation6_spill] sm:$0xff] }
 0x161   : > { %v4329_v17 = vsel %vm4189_vm1, %v3749_v40, %v1442_v11  ;;  %v1443_v8 = vadd.f32 %v4179_v61, %v1389_v57  ;;  %v3143_v12 = vpop.f32.mrb[48].mxu0 }
 0x162   : > { %v1765_v25 = vadd.f32 %v1764_v37, %v4329_v17  ;;  %v1136_v5 = vmax.f32 %v5023_v48, %v3143_v12  ;;  %v3191_v43 = vpop.f32.mrb[48].mxu1  ;;  %v1055_v45 = vpop.f32.mrb[49].mxu0  ;;  %v4339_v13 = vsel %vm4189_vm1, %v3787_v50, %v1445_v30  ;;  %v5036_v30 = vld [vmem:[#allocation26_spill] sm:$0xff] }
 0x163   : > { %v4344_v40 = vsel %vm4189_vm1, %v5024_v58, %v1443_v8  ;;  %v1134_v60 = vmax.f32 %v5027_v27, %v1055_v45  ;;  %v1313_v28 = vpop.f32.mrb[49].mxu1  ;;  %v3144_v62 = vpop.f32.mrb[50].mxu0  ;;  %v1503_v16 = vpack.c.bf16 %v4339_v13, %v4356_v6  ;;  %v5038_v8 = vmax.f32 %v5036_v30, %v5037_v9  ;;  %v5040_v45 = vld [vmem:[#allocation5_spill] sm:$0xff]  ;;  %v5051_v30 = vld [vmem:[#allocation8_spill] sm:$0xff] }
 0x164   : > { %v1766_v7 = vadd.f32 %v1765_v25, %v4344_v40  ;;  %v1394_v47 = vmax.f32 %v1136_v5, %v3191_v43  ;;  %v1137_v2 = vmax.f32 %v5030_v1, %v3144_v62  ;;  %v3192_v50 = vpop.f32.mrb[50].mxu1  ;;  %v1058_v41 = vpop.f32.mrb[51].mxu0  ;;  %v1502_v3 = vpack.c.bf16 %v4344_v40, %v4329_v17  ;;  %v5039_v5 = vld [vmem:[#allocation7_spill] sm:$0xff] }
 0x165   : > { %v1392_v18 = vmax.f32 %v1134_v60, %v1313_v28  ;;  %v1135_v29 = vmax.f32 %v5034_v21, %v1058_v41  ;;  %v1316_v42 = vpop.f32.mrb[51].mxu1  ;;  %v5043_v27 = vmax.f32 %v5041_v44, %v5042_v59  ;;  %v5046_v1 = vmax.f32 %v5044_v46, %v5045_v53  ;;  %v5049_v21 = vld [vmem:[#allocation33_spill] sm:$0xff]  ;;  %v5053_v44 = vld [vmem:[#allocation35_spill] sm:$0xff] }
 0x166   : > { %v1767_v38 = vadd.f32 %v1766_v7, %v4356_v6  ;;  %v1395_v19 = vmax.f32 %v1137_v2, %v3192_v50  ;;  %3233 = vmatprep.mubr.bf16.mxu0 %v1502_v3  ;;  %v1448_v36 = vadd.f32 %v4179_v61, %v1394_v47  ;;  %v5056_v46 = vld [vmem:[#allocation9_spill] sm:$0xff] }
 0x167   : > { %v1446_v0 = vadd.f32 %v4179_v61, %v1392_v18  ;;  %v1393_v15 = vmax.f32 %v1135_v29, %v1316_v42  ;;  %3234 = vmatmul.mubr.bf16.gmra.mrb[76].mxu0 %v1503_v16  ;;  %v5050_v29 = vmax.f32 %v5048_v33, %v5049_v21 }
 0x168   : > { %v1768_v56 = vadd.f32 %v1767_v38, %v4339_v13  ;;  %v1449_v35 = vadd.f32 %v4179_v61, %v1395_v19  ;;  %v4400_v18 = vsel %vm4189_vm1, %v5047_v26, %v1448_v36  ;;  %v1792_v36 = vmax.f32 %v4211_v22, %v4241_v54 }
 0x169   : > { %v4373_v39 = vsel %vm4189_vm1, %v5035_v10, %v1446_v0  ;;  %v1447_v11 = vadd.f32 %v4179_v61, %v1393_v15  ;;  %v3147_v57 = vpop.f32.mrb[52].mxu0 }
 0x16a   : > { %v1769_v37 = vadd.f32 %v1768_v56, %v4373_v39  ;;  %v1140_v12 = vmax.f32 %v5038_v8, %v3147_v57  ;;  %v3195_v25 = vpop.f32.mrb[52].mxu1  ;;  %v1071_v48 = vpop.f32.mrb[53].mxu0  ;;  %v4383_v43 = vsel %vm4189_vm1, %v5039_v5, %v1449_v35  ;;  %v1794_v35 = vmax.f32 %v4206_v34, %v4268_v24 }
 0x16b   : > { %v4388_v58 = vsel %vm4189_vm1, %v5040_v45, %v1447_v11  ;;  %v1138_v60 = vmax.f32 %v5043_v27, %v1071_v48  ;;  %v1329_v28 = vpop.f32.mrb[53].mxu1  ;;  %v3148_v62 = vpop.f32.mrb[54].mxu0  ;;  %v1505_v0 = vpack.c.bf16 %v4383_v43, %v4400_v18  ;;  %v1795_v57 = vmax.f32 %v4198_v4, %v4251_v55  ;;  %v5052_v45 = vld [vmem:[#allocation34_spill] sm:$0xff] }
 0x16c   : > { %v1770_v7 = vadd.f32 %v1769_v37, %v4388_v58  ;;  %v1398_v47 = vmax.f32 %v1140_v12, %v3195_v25  ;;  %v1141_v2 = vmax.f32 %v5046_v1, %v3148_v62  ;;  %v3196_v50 = vpop.f32.mrb[54].mxu1  ;;  %v1074_v41 = vpop.f32.mrb[55].mxu0  ;;  %v1504_v38 = vpack.c.bf16 %v4388_v58, %v4373_v39  ;;  %v5057_v1 = vld [vmem:[#allocation36_spill] sm:$0xff] }
 0x16d   : > { %v1396_v14 = vmax.f32 %v1138_v60, %v1329_v28  ;;  %v1139_v42 = vmax.f32 %v5050_v29, %v1074_v41  ;;  %v1332_v3 = vpop.f32.mrb[55].mxu1  ;;  %v1793_v25 = vmax.f32 %v4216_v20, %v4256_v23  ;;  %v1798_v48 = vmax.f32 %v1794_v35, %v4312_v32 }
 0x16e   : > { %v1771_v19 = vadd.f32 %v1770_v7, %v4400_v18  ;;  %v1399_v16 = vmax.f32 %v1141_v2, %v3196_v50  ;;  %3237 = vmatprep.mubr.bf16.mxu0 %v1504_v38  ;;  %v1452_v37 = vadd.f32 %v4179_v61, %v1398_v47  ;;  %v5054_v59 = vmax.f32 %v5052_v45, %v5053_v44  ;;  %v5055_v7 = vld [vmem:[#allocation11_spill] sm:$0xff]  ;;  %v5058_v2 = vld [vmem:[#allocation37_spill] sm:$0xff] }
 0x16f   : > { %v1450_v15 = vadd.f32 %v4179_v61, %v1396_v14  ;;  %v1397_v56 = vmax.f32 %v1139_v42, %v1332_v3  ;;  %3238 = vmatmul.mubr.bf16.gmra.mrb[80].mxu0 %v1505_v0  ;;  %v1796_v62 = vmax.f32 %v1792_v36, %v4285_v63  ;;  %v5059_v50 = vmax.f32 %v5057_v1, %v5058_v2  ;;  %v5060_v42 = vld [vmem:[#allocation38_spill] sm:$0xff]  ;;  %v5061_v3 = vld [vmem:[#allocation39_spill] sm:$0xff]  ;;  %v5064_v36 = vld [vmem:[#allocation40_spill] sm:$0xff] }
 0x170   : > { %v1772_v10 = vadd.f32 %v1771_v19, %v4383_v43  ;;  %v1453_v11 = vadd.f32 %v4179_v61, %v1399_v16  ;;  %v1799_v33 = vmax.f32 %v1795_v57, %v4295_v49  ;;  %v5062_v38 = vmax.f32 %v5060_v42, %v5061_v3  ;;  %v5069_v42 = vld [vmem:[#allocation43_spill] sm:$0xff] }
 0x171   : > { %v4423_v9 = vsel %vm4189_vm1, %v5051_v30, %v1450_v15  ;;  %v1451_v8 = vadd.f32 %v4179_v61, %v1397_v56  ;;  %v3151_v12 = vpop.f32.mrb[56].mxu0  ;;  %v5063_v15 = vld [vmem:[#allocation10_spill] sm:$0xff] }
 0x172   : > { %v1773_v5 = vadd.f32 %v1772_v10, %v4423_v9  ;;  %v1144_v27 = vmax.f32 %v5054_v59, %v3151_v12  ;;  %v3199_v60 = vpop.f32.mrb[56].mxu1  ;;  %v1087_v28 = vpop.f32.mrb[57].mxu0  ;;  %v4437_v47 = vsel %vm4189_vm1, %v5055_v7, %v1453_v11  ;;  %v4455_v56 = vsel %vm4189_vm1, %v5063_v15, %v1452_v37  ;;  %v5065_v10 = vld [vmem:[#allocation41_spill] sm:$0xff] }
 0x173   : > { %v4442_v53 = vsel %vm4189_vm1, %v5056_v46, %v1451_v8  ;;  %v1142_v41 = vmax.f32 %v5059_v50, %v1087_v28  ;;  %v1345_v26 = vpop.f32.mrb[57].mxu1  ;;  %v3152_v14 = vpop.f32.mrb[58].mxu0  ;;  %v5066_v11 = vmax.f32 %v5064_v36, %v5065_v10  ;;  %v1797_v12 = vmax.f32 %v1793_v25, %v4300_v31  ;;  %v5073_v10 = vld [vmem:[#allocation44_spill] sm:$0xff] }
 0x174   : > { %v1774_v21 = vadd.f32 %v1773_v5, %v4442_v53  ;;  %v1402_v29 = vmax.f32 %v1144_v27, %v3199_v60  ;;  %v1145_v19 = vmax.f32 %v5062_v38, %v3152_v14  ;;  %v3200_v16 = vpop.f32.mrb[58].mxu1  ;;  %v1090_v0 = vpop.f32.mrb[59].mxu0  ;;  %v1506_v8 = vpack.c.bf16 %v4442_v53, %v4423_v9 }
 0x175   : > { %v1400_v35 = vmax.f32 %v1142_v41, %v1345_v26  ;;  %v1143_v30 = vmax.f32 %v5066_v11, %v1090_v0  ;;  %v1348_v57 = vpop.f32.mrb[59].mxu1  ;;  %v1507_v44 = vpack.c.bf16 %v4437_v47, %v4455_v56  ;;  %v1802_v37 = vmax.f32 %v1798_v48, %v4356_v6  ;;  %v5067_v48 = vld [vmem:[#allocation12_spill] sm:$0xff]  ;;  %v5071_v0 = vld [vmem:[#allocation15_spill] sm:$0xff]  ;;  %v5074_v11 = vld [vmem:[#allocation45_spill] sm:$0xff] }
 0x176   : > { %v1775_v5 = vadd.f32 %v1774_v21, %v4455_v56  ;;  %v1403_v45 = vmax.f32 %v1145_v19, %v3200_v16  ;;  %v1800_v59 = vmax.f32 %v1796_v62, %v4329_v17  ;;  %3241 = vmatprep.mubr.bf16.mxu0 %v1506_v8  ;;  %v1803_v28 = vmax.f32 %v1799_v33, %v4339_v13  ;;  %v5068_v21 = vld [vmem:[#allocation42_spill] sm:$0xff] }
 0x177   : > { %v1454_v27 = vadd.f32 %v4179_v61, %v1400_v35  ;;  %v1401_v60 = vmax.f32 %v1143_v30, %v1348_v57  ;;  %v1801_v7 = vmax.f32 %v1797_v12, %v4344_v40  ;;  %3242 = vmatmul.mubr.bf16.gmra.mrb[84].mxu0 %v1507_v44  ;;  %v1806_v1 = vmax.f32 %v1802_v37, %v4400_v18  ;;  %v5072_v35 = vld [vmem:[#allocation13_spill] sm:$0xff]  ;;  %v5076_v37 = vld [vmem:[#allocation46_spill] sm:$0xff] }
 0x178   : > { %v1776_v25 = vadd.f32 %v1775_v5, %v4437_v47  ;;  %v1457_v46 = vadd.f32 %v4179_v61, %v1403_v45  ;;  %v1456_v2 = vadd.f32 %v4179_v61, %v1402_v29  ;;  %v1804_v26 = vmax.f32 %v1800_v59, %v4373_v39  ;;  %v5077_v59 = vld [vmem:[#allocation47_spill] sm:$0xff] }
 0x179   : > { %v4478_v62 = vsel %vm4189_vm1, %v5067_v48, %v1454_v27  ;;  %v1455_v50 = vadd.f32 %v4179_v61, %v1401_v60  ;;  %v3155_v41 = vpop.f32.mrb[60].mxu0  ;;  %v1807_v14 = vmax.f32 %v1803_v28, %v4383_v43  ;;  %v5070_v3 = vmax.f32 %v5068_v21, %v5069_v42 }
 0x17a   : > { %v1777_v33 = vadd.f32 %v1776_v25, %v4478_v62  ;;  %v3203_v19 = vpop.f32.mrb[60].mxu1  ;;  %v1103_v29 = vpop.f32.mrb[61].mxu0  ;;  %v1805_v16 = vmax.f32 %v1801_v7, %v4388_v58  ;;  %v4491_v15 = vsel %vm4189_vm1, %v5071_v0, %v1457_v46  ;;  %v5075_v30 = vmax.f32 %v5073_v10, %v5074_v11  ;;  %v5079_v25 = vld [vmem:[#allocation14_spill] sm:$0xff] }
 0x17b   : > { %v1148_v38 = vmax.f32 %v5070_v3, %v3155_v41  ;;  %v4496_v36 = vsel %vm4189_vm1, %v5072_v35, %v1455_v50  ;;  %v1361_v8 = vpop.f32.mrb[61].mxu1  ;;  %v3156_v12 = vpop.f32.mrb[62].mxu0  ;;  %v1810_v5 = vmax.f32 %v1806_v1, %v4455_v56  ;;  %v5078_v27 = vmax.f32 %v5076_v37, %v5077_v59  ;;  %v5080_v50 = vld [vmem:[#allocation48_spill] sm:$0xff]  ;;  %v5082_v10 = vld [vmem:[#allocation18_spill] sm:$0xff]  ;;  %v5084_v59 = vld [vmem:[#allocation19_spill] sm:$0xff] }
 0x17c   : > { %v1146_v57 = vmax.f32 %v5075_v30, %v1103_v29  ;;  %v1778_v45 = vadd.f32 %v1777_v33, %v4496_v36  ;;  %v3204_v28 = vpop.f32.mrb[62].mxu1  ;;  %v1106_v7 = vpop.f32.mrb[63].mxu0  ;;  %v4509_v46 = vsel %vm4189_vm1, %v5079_v25, %v1456_v2  ;;  %v5081_v41 = vmax.f32 %v4161_v52, %v5080_v50 }
 0x17d   : > { %v1406_v44 = vmax.f32 %v1148_v38, %v3203_v19  ;;  %v1149_v60 = vmax.f32 %v5078_v27, %v3156_v12  ;;  %v1364_v1 = vpop.f32.mrb[63].mxu1  ;;  %v1508_v33 = vpack.c.bf16 %v4496_v36, %v4478_v62  ;;  %v1509_v19 = vpack.c.bf16 %v4491_v15, %v4509_v46 }
 0x17e   : > { %v1404_v48 = vmax.f32 %v1146_v57, %v1361_v8  ;;  %v1147_v21 = vmax.f32 %v5081_v41, %v1106_v7  ;;  %v1779_v42 = vadd.f32 %v1778_v45, %v4509_v46  ;;  %v1808_v2 = vmax.f32 %v1804_v26, %v4423_v9  ;;  %v5083_v8 = vld [vmem:[#allocation16_spill] sm:$0xff] }
 0x17f   : > { %v1460_v3 = vadd.f32 %v4179_v61, %v1406_v44  ;;  %v1407_v38 = vmax.f32 %v1149_v60, %v3204_v28  ;;  %v1811_v29 = vmax.f32 %v1807_v14, %v4437_v47  ;;  %3245 = vmatprep.mubr.bf16.mxu0 %v1508_v33  ;;  %v1809_v35 = vmax.f32 %v1805_v16, %v4442_v53  ;;  %v5085_v28 = vld [vmem:[#allocation17_spill] sm:$0xff] }
 0x180   : > { %v1458_v0 = vadd.f32 %v4179_v61, %v1404_v48  ;;  %v1405_v52 = vmax.f32 %v1147_v21, %v1364_v1  ;;  %v1780_v30 = vadd.f32 %v1779_v42, %v4491_v15  ;;  %3246 = vmatmul.mubr.bf16.gmra.mrb[88].mxu0 %v1509_v19  ;;  %v1814_v26 = vmax.f32 %v1810_v5, %v4509_v46 }
 0x181   : > { %v4527_v11 = vsel %vm4189_vm1, %v5082_v10, %v1460_v3  ;;  %v1461_v57 = vadd.f32 %v4179_v61, %v1407_v38  ;;  %v1815_v14 = vmax.f32 %v1811_v29, %v4491_v15  ;;  %v1812_v45 = vmax.f32 %v1808_v2, %v4478_v62 }
 0x182   : > { %v4536_v12 = vsel %vm4189_vm1, %v5083_v8, %v1458_v0  ;;  %v1459_v16 = vadd.f32 %v4179_v61, %v1405_v52  ;;  %v1813_v44 = vmax.f32 %v1809_v35, %v4496_v36  ;;  %v1818_v5 = vmax.f32 %v1814_v26, %v4527_v11 }
 0x183   : > { %v1781_v37 = vadd.f32 %v1780_v30, %v4536_v12  ;;  %v4545_v27 = vsel %vm4189_vm1, %v5084_v59, %v1461_v57  ;;  %v1816_v61 = vmax.f32 %v1812_v45, %v4536_v12  ;;  %v1753_v45 = vld [vmem:[%s4900_s5] sm:$0xff] }
 0x184   : > { %v1819_v60 = vmax.f32 %v1815_v14, %v4545_v27  ;;  %v4552_v7 = vsel %vm4189_vm1, %v5085_v28, %v1459_v16  ;;  %v1511_v33 = vpack.c.bf16 %v4545_v27, %v4527_v11  ;;  %v5086_v16 = vmov 0.0  }
 0x185   : > { %v1782_v25 = vadd.f32 %v1781_v37, %v4552_v7  ;;  %v1817_v48 = vmax.f32 %v1813_v44, %v4552_v7  ;;  %v1510_v50 = vpack.c.bf16 %v4552_v7, %v4536_v12  ;;  %v5087_v44 = vmov 0.0|0.0  }
 0x186   : > { %v1821_v41 = vmax.f32 %v1818_v5, %v1819_v60 }
 0x187   : > { %v1783_v21 = vadd.f32 %v1782_v25, %v4527_v11  ;;  %v1820_v1 = vmax.f32 %v1816_v61, %v1817_v48  ;;  %3249 = vmatprep.mubr.bf16.mxu0 %v1510_v50 }
 0x188   : > { %3250 = vmatmul.mubr.bf16.gmra.mrb[92].mxu0 %v1511_v33 }
 0x189   : > { %v1784_v51 = vadd.f32 %v1783_v21, %v4545_v27  ;;  %v1822_v42 = vmax.f32 %v1820_v1, %v1821_v41 }
 0x18b   : > { %v1785_v3 = vrot.slane %v1784_v51, 4  ;;  %v1823_v38 = vrot.slane %v1822_v42, 4 }
 0x18d   : > { %v1786_v19 = vadd.f32 %v1785_v3, %v1784_v51  ;;  %v1824_v2 = vmax.f32 %v1822_v42, %v1823_v38 }
 0x18f   : > { %v1787_v29 = vrot.slane %v1786_v19, 2  ;;  %v1825_v0 = vrot.slane %v1824_v2, 2 }
 0x191   : > { %v1788_v52 = vadd.f32 %v1787_v29, %v1786_v19  ;;  %v1826_v35 = vmax.f32 %v1824_v2, %v1825_v0 }
 0x193   : > { %v1789_v10 = vrot.slane %v1788_v52, 1  ;;  %v1827_v30 = vrot.slane %v1826_v35, 1 }
 0x195   : > { %v1790_v57 = vadd.f32 %v1789_v10, %v1788_v52  ;;  %v1828_v14 = vmax.f32 %v1826_v35, %v1827_v30 }
 0x197   : > { %v1791_v26 = vmul.f32 0.00390625, %v1790_v57 }
 0x199   : > { %v1830_v8 = vsel %vm1829_vm2, %v1791_v26, %v1828_v14 }
 0x19a   : > { %3286 = vmatmul.mubr.f32.vlgmr.msra.gmra.mrb[64].mxu1 %v1830_v8 }
 0x19b   : > { %3290 = vmatprep.mubr.msk.f32.mxu1 %vm3538_vm0, %v5086_v16  ;;  %3289 = vmatpush3.msra.mxu1 %v1753_v45 }
 0x19c   : > { %3413 = vmatprep.subr.bf16.mxu1 %v5087_v44 }
 0x222   : > { %v3223_v37 = vpop.f32.mrb[64].mxu0 }
 0x223   : > { %v1610_v59 = vpop.f32.mrb[65].mxu0  ;;  %v1995_v48 = vsel %vm1991_vm3, %v3223_v37, 0.0  ;;  %v2064_v33 = vsel %vm1991_vm3, %v3223_v37, -inf }
 0x224   : > { %v3224_v5 = vpop.f32.mrb[66].mxu0  ;;  %v1992_v28 = vsel %vm1991_vm3, %v1610_v59, 0.0  ;;  %v2062_v3 = vsel %vm1991_vm3, %v1610_v59, -inf }
 0x225   : > { %v1613_v60 = vpop.f32.mrb[67].mxu0  ;;  %v1997_v41 = vsel %vm1991_vm3, %v3224_v5, 0.0  ;;  %v2065_v0 = vsel %vm1991_vm3, %v3224_v5, -inf }
 0x226   : > { %v1993_v61 = vsel %vm1991_vm3, %v1613_v60, 0.0  ;;  %v2063_v57 = vsel %vm1991_vm3, %v1613_v60, -inf }
 0x227   : > { %v1994_v25 = vadd.f32 %v1993_v61, %v1992_v28 }
 0x229   : > { %v1996_v50 = vadd.f32 %v1995_v48, %v1994_v25 }
 0x22a   : > { %v3227_v21 = vpop.f32.mrb[68].mxu0 }
 0x22b   : > { %v1998_v1 = vadd.f32 %v1997_v41, %v1996_v50  ;;  %v2070_v51 = vsel %vm1991_vm3, %v3227_v21, -inf  ;;  %v1626_v42 = vpop.f32.mrb[69].mxu0  ;;  %v2003_v59 = vsel %vm1991_vm3, %v3227_v21, 0.0 }
 0x22c   : > { %v2071_v38 = vmax.f32 %v2064_v33, %v2070_v51  ;;  %v1999_v19 = vsel %vm1991_vm3, %v1626_v42, 0.0  ;;  %v2066_v2 = vsel %vm1991_vm3, %v1626_v42, -inf  ;;  %v3228_v29 = vpop.f32.mrb[70].mxu0 }
 0x22d   : > { %v2000_v52 = vadd.f32 %v1999_v19, %v1998_v1  ;;  %v2067_v35 = vmax.f32 %v2062_v3, %v2066_v2  ;;  %v2072_v10 = vsel %vm1991_vm3, %v3228_v29, -inf  ;;  %v1629_v30 = vpop.f32.mrb[71].mxu0  ;;  %v2005_v61 = vsel %vm1991_vm3, %v3228_v29, 0.0 }
 0x22e   : > { %v2073_v26 = vmax.f32 %v2065_v0, %v2072_v10  ;;  %v2001_v14 = vsel %vm1991_vm3, %v1629_v30, 0.0  ;;  %v2068_v8 = vsel %vm1991_vm3, %v1629_v30, -inf }
 0x22f   : > { %v2002_v45 = vadd.f32 %v2001_v14, %v2000_v52  ;;  %v2069_v37 = vmax.f32 %v2063_v57, %v2068_v8 }
 0x231   : > { %v2004_v28 = vadd.f32 %v2003_v59, %v2002_v45 }
 0x232   : > { %v3231_v5 = vpop.f32.mrb[72].mxu0 }
 0x233   : > { %v2078_v25 = vsel %vm1991_vm3, %v3231_v5, -inf  ;;  %v1642_v48 = vpop.f32.mrb[73].mxu0  ;;  %v2006_v50 = vadd.f32 %v2005_v61, %v2004_v28  ;;  %v2011_v10 = vsel %vm1991_vm3, %v3231_v5, 0.0 }
 0x234   : > { %v2079_v41 = vmax.f32 %v2071_v38, %v2078_v25  ;;  %v2007_v60 = vsel %vm1991_vm3, %v1642_v48, 0.0  ;;  %v2074_v1 = vsel %vm1991_vm3, %v1642_v48, -inf  ;;  %v3232_v33 = vpop.f32.mrb[74].mxu0 }
 0x235   : > { %v2008_v51 = vadd.f32 %v2007_v60, %v2006_v50  ;;  %v2075_v42 = vmax.f32 %v2067_v35, %v2074_v1  ;;  %v2080_v3 = vsel %vm1991_vm3, %v3232_v33, -inf  ;;  %v1645_v19 = vpop.f32.mrb[75].mxu0  ;;  %v2013_v30 = vsel %vm1991_vm3, %v3232_v33, 0.0 }
 0x236   : > { %v2081_v21 = vmax.f32 %v2073_v26, %v2080_v3  ;;  %v2009_v2 = vsel %vm1991_vm3, %v1645_v19, 0.0  ;;  %v2076_v29 = vsel %vm1991_vm3, %v1645_v19, -inf }
 0x237   : > { %v2010_v0 = vadd.f32 %v2009_v2, %v2008_v51  ;;  %v2077_v52 = vmax.f32 %v2069_v37, %v2076_v29 }
 0x239   : > { %v2012_v38 = vadd.f32 %v2011_v10, %v2010_v0 }
 0x23a   : > { %v3235_v57 = vpop.f32.mrb[76].mxu0 }
 0x23b   : > { %v2086_v14 = vsel %vm1991_vm3, %v3235_v57, -inf  ;;  %v1658_v8 = vpop.f32.mrb[77].mxu0  ;;  %v2014_v35 = vadd.f32 %v2013_v30, %v2012_v38  ;;  %v2019_v51 = vsel %vm1991_vm3, %v3235_v57, 0.0 }
 0x23c   : > { %v2087_v45 = vmax.f32 %v2079_v41, %v2086_v14  ;;  %v2015_v59 = vsel %vm1991_vm3, %v1658_v8, 0.0  ;;  %v2082_v26 = vsel %vm1991_vm3, %v1658_v8, -inf  ;;  %v3236_v28 = vpop.f32.mrb[78].mxu0 }
 0x23d   : > { %v2016_v61 = vadd.f32 %v2015_v59, %v2014_v35  ;;  %v2083_v25 = vmax.f32 %v2075_v42, %v2082_v26  ;;  %v2088_v37 = vsel %vm1991_vm3, %v3236_v28, -inf  ;;  %v1661_v48 = vpop.f32.mrb[79].mxu0  ;;  %v2021_v3 = vsel %vm1991_vm3, %v3236_v28, 0.0 }
 0x23e   : > { %v2089_v5 = vmax.f32 %v2081_v21, %v2088_v37  ;;  %v2017_v50 = vsel %vm1991_vm3, %v1661_v48, 0.0  ;;  %v2084_v60 = vsel %vm1991_vm3, %v1661_v48, -inf }
 0x23f   : > { %v2018_v1 = vadd.f32 %v2017_v50, %v2016_v61  ;;  %v2085_v33 = vmax.f32 %v2077_v52, %v2084_v60 }
 0x241   : > { %v2020_v41 = vadd.f32 %v2019_v51, %v2018_v1 }
 0x242   : > { %v3239_v19 = vpop.f32.mrb[80].mxu0 }
 0x243   : > { %v2094_v2 = vsel %vm1991_vm3, %v3239_v19, -inf  ;;  %v1674_v29 = vpop.f32.mrb[81].mxu0  ;;  %v2022_v42 = vadd.f32 %v2021_v3, %v2020_v41  ;;  %v2027_v61 = vsel %vm1991_vm3, %v3239_v19, 0.0 }
 0x244   : > { %v2095_v0 = vmax.f32 %v2087_v45, %v2094_v2  ;;  %v2023_v10 = vsel %vm1991_vm3, %v1674_v29, 0.0  ;;  %v2090_v21 = vsel %vm1991_vm3, %v1674_v29, -inf  ;;  %v3240_v38 = vpop.f32.mrb[82].mxu0 }
 0x245   : > { %v2024_v30 = vadd.f32 %v2023_v10, %v2022_v42  ;;  %v2091_v14 = vmax.f32 %v2083_v25, %v2090_v21  ;;  %v2096_v52 = vsel %vm1991_vm3, %v3240_v38, -inf  ;;  %v1677_v8 = vpop.f32.mrb[83].mxu0  ;;  %v2029_v37 = vsel %vm1991_vm3, %v3240_v38, 0.0 }
 0x246   : > { %v2097_v57 = vmax.f32 %v2089_v5, %v2096_v52  ;;  %v2025_v35 = vsel %vm1991_vm3, %v1677_v8, 0.0  ;;  %v2092_v59 = vsel %vm1991_vm3, %v1677_v8, -inf }
 0x247   : > { %v2026_v26 = vadd.f32 %v2025_v35, %v2024_v30  ;;  %v2093_v28 = vmax.f32 %v2085_v33, %v2092_v59 }
 0x249   : > { %v2028_v45 = vadd.f32 %v2027_v61, %v2026_v26 }
 0x24a   : > { %v3243_v48 = vpop.f32.mrb[84].mxu0 }
 0x24b   : > { %v2102_v50 = vsel %vm1991_vm3, %v3243_v48, -inf  ;;  %v1690_v60 = vpop.f32.mrb[85].mxu0  ;;  %v2030_v25 = vadd.f32 %v2029_v37, %v2028_v45  ;;  %v2035_v30 = vsel %vm1991_vm3, %v3243_v48, 0.0 }
 0x24c   : > { %v2103_v1 = vmax.f32 %v2095_v0, %v2102_v50  ;;  %v2031_v51 = vsel %vm1991_vm3, %v1690_v60, 0.0  ;;  %v2098_v5 = vsel %vm1991_vm3, %v1690_v60, -inf  ;;  %v3244_v41 = vpop.f32.mrb[86].mxu0 }
 0x24d   : > { %v2032_v3 = vadd.f32 %v2031_v51, %v2030_v25  ;;  %v2099_v2 = vmax.f32 %v2091_v14, %v2098_v5  ;;  %v2104_v33 = vsel %vm1991_vm3, %v3244_v41, -inf  ;;  %v1693_v29 = vpop.f32.mrb[87].mxu0  ;;  %v2037_v52 = vsel %vm1991_vm3, %v3244_v41, 0.0 }
 0x24e   : > { %v2105_v19 = vmax.f32 %v2097_v57, %v2104_v33  ;;  %v2033_v42 = vsel %vm1991_vm3, %v1693_v29, 0.0  ;;  %v2100_v10 = vsel %vm1991_vm3, %v1693_v29, -inf }
 0x24f   : > { %v2034_v21 = vadd.f32 %v2033_v42, %v2032_v3  ;;  %v2101_v38 = vmax.f32 %v2093_v28, %v2100_v10 }
 0x251   : > { %v2036_v0 = vadd.f32 %v2035_v30, %v2034_v21 }
 0x253   : > { %v3247_v8 = vpop.f32.mrb[88].mxu0  ;;  %v2038_v14 = vadd.f32 %v2037_v52, %v2036_v0 }
 0x254   : > { %v2110_v35 = vsel %vm1991_vm3, %v3247_v8, -inf  ;;  %v1706_v59 = vpop.f32.mrb[89].mxu0  ;;  %v2043_v3 = vsel %vm1991_vm3, %v3247_v8, 0.0 }
 0x255   : > { %v2111_v26 = vmax.f32 %v2103_v1, %v2110_v35  ;;  %v2039_v61 = vsel %vm1991_vm3, %v1706_v59, 0.0  ;;  %v2106_v57 = vsel %vm1991_vm3, %v1706_v59, -inf  ;;  %v3248_v45 = vpop.f32.mrb[90].mxu0 }
 0x256   : > { %v2040_v37 = vadd.f32 %v2039_v61, %v2038_v14  ;;  %v2107_v50 = vmax.f32 %v2099_v2, %v2106_v57  ;;  %v2112_v28 = vsel %vm1991_vm3, %v3248_v45, -inf  ;;  %v1709_v60 = vpop.f32.mrb[91].mxu0  ;;  %v2045_v33 = vsel %vm1991_vm3, %v3248_v45, 0.0 }
 0x257   : > { %v2113_v48 = vmax.f32 %v2105_v19, %v2112_v28  ;;  %v2041_v25 = vsel %vm1991_vm3, %v1709_v60, 0.0  ;;  %v2108_v51 = vsel %vm1991_vm3, %v1709_v60, -inf }
 0x258   : > { %v2042_v5 = vadd.f32 %v2041_v25, %v2040_v37  ;;  %v2109_v41 = vmax.f32 %v2101_v38, %v2108_v51 }
 0x25a   : > { %v2044_v1 = vadd.f32 %v2043_v3, %v2042_v5 }
 0x25b   : > { %v3251_v29 = vpop.f32.mrb[92].mxu0 }
 0x25c   : > { %v2118_v42 = vsel %vm1991_vm3, %v3251_v29, -inf  ;;  %v1722_v10 = vpop.f32.mrb[93].mxu0  ;;  %v2046_v2 = vadd.f32 %v2045_v33, %v2044_v1  ;;  %v2051_v37 = vsel %vm1991_vm3, %v3251_v29, 0.0 }
 0x25d   : > { %v2119_v21 = vmax.f32 %v2111_v26, %v2118_v42  ;;  %v2047_v30 = vsel %vm1991_vm3, %v1722_v10, 0.0  ;;  %v2114_v19 = vsel %vm1991_vm3, %v1722_v10, -inf  ;;  %v3252_v0 = vpop.f32.mrb[94].mxu0 }
 0x25e   : > { %v2048_v52 = vadd.f32 %v2047_v30, %v2046_v2  ;;  %v2115_v35 = vmax.f32 %v2107_v50, %v2114_v19  ;;  %v2120_v38 = vsel %vm1991_vm3, %v3252_v0, -inf  ;;  %v1725_v59 = vpop.f32.mrb[95].mxu0  ;;  %v2053_v25 = vsel %vm1991_vm3, %v3252_v0, 0.0 }
 0x25f   : > { %v2121_v8 = vmax.f32 %v2113_v48, %v2120_v38  ;;  %v2049_v14 = vsel %vm1991_vm3, %v1725_v59, 0.0  ;;  %v2116_v61 = vsel %vm1991_vm3, %v1725_v59, -inf  ;;  %v1986_v48 = vld [vmem:[%s4901_s6] sm:$0xff] }
 0x260   : > { %v2050_v57 = vadd.f32 %v2049_v14, %v2048_v52  ;;  %v2117_v45 = vmax.f32 %v2109_v41, %v2116_v61  ;;  %v1987_v41 = vld [vmem:[%s4901_s6 + $0x8] sm:$0xff]  ;;  %v1988_v52 = vld [vmem:[%s4901_s6 + $0x10] sm:$0xff] }
 0x261   : > { %v2123_v26 = vmax.f32 %v2119_v21, %v2121_v8  ;;  %v3414_v30 = vpack.c.bf16 %v1987_v41, %v1986_v48 }
 0x262   : > { %v2052_v28 = vadd.f32 %v2051_v37, %v2050_v57  ;;  %v2122_v60 = vmax.f32 %v2115_v35, %v2117_v45  ;;  %v1989_v35 = vld [vmem:[%s4901_s6 + $0x18] sm:$0xff]  ;;  %v1990_v37 = vld [vmem:[%s4902_s7] sm:$0xff] }
 0x263   : > { %v3417_v8 = vpack.c.bf16 %v1989_v35, %v1988_v52  ;;  %v2381_v52 = vld [vmem:[%s4903_s8 + $0x28] sm:$0xff] }
 0x264   : > { %v2054_v51 = vadd.f32 %v2053_v25, %v2052_v28  ;;  %v2124_v5 = vmax.f32 %v2122_v60, %v2123_v26 }
 0x266   : > { %v2055_v50 = vrot.slane %v2054_v51, 4  ;;  %v2125_v3 = vrot.slane %v2124_v5, 4 }
 0x268   : > { %v2056_v1 = vadd.f32 %v2055_v50, %v2054_v51  ;;  %v2126_v33 = vmax.f32 %v2124_v5, %v2125_v3 }
 0x26a   : > { %v2057_v29 = vrot.slane %v2056_v1, 2  ;;  %v2127_v42 = vrot.slane %v2126_v33, 2 }
 0x26c   : > { %v2058_v10 = vadd.f32 %v2057_v29, %v2056_v1  ;;  %v2128_v2 = vmax.f32 %v2126_v33, %v2127_v42  ;;  %v2376_v42 = vld [vmem:[%s4903_s8] sm:$0xff] }
 0x26d   : > { %v1897_v21 = vpop.f32.mrb[64].mxu1 }
 0x26e   : > { %v1901_v19 = vmax.f32 %v1897_v21, 0.0  ;;  %v3287_v0 = vpop.f32.mrb[65].mxu1  ;;  %v2059_v38 = vrot.slane %v2058_v10, 1  ;;  %v2129_v59 = vrot.slane %v2128_v2, 1 }
 0x26f   : > { %v2380_v0 = vld [vmem:[%s4903_s8 + $0x20] sm:$0xff] }
 0x270   : > { %3291 = vmatmul.mubr.msk.f32.vlgmr.msra.gmra.mrb[66].mxu1 %vm1902_vm4, %v1901_v19  ;;  %v2060_v14 = vadd.f32 %v2059_v38, %v2058_v10  ;;  %v2130_v57 = vmax.f32 %v2128_v2, %v2129_v59  ;;  %v2377_v10 = vld [vmem:[%s4903_s8 + $0x8] sm:$0xff]  ;;  %v2378_v2 = vld [vmem:[%s4903_s8 + $0x10] sm:$0xff]  ;;  %v3427_v35 = vpack.c.bf16 %v2381_v52, %v2380_v0  ;;  %v2383_v59 = vld [vmem:[%s4903_s8 + $0x38] sm:$0xff] }
 0x271   : > { %3415 = vmatpush3.bf16.msra.mxu1 %v3414_v30  ;;  %3301 = vmatprep.mubr.msk.f32.mxu1 %vm3538_vm0, %v5086_v16  ;;  %v3419_v21 = vpack.c.bf16 %v2377_v10, %v2376_v42  ;;  %v2379_v30 = vld [vmem:[%s4903_s8 + $0x18] sm:$0xff]  ;;  %v2382_v38 = vld [vmem:[%s4903_s8 + $0x30] sm:$0xff] }
 0x272   : > { %3416 = vmatprep.subr.bf16.mxu1 %v5087_v44  ;;  %v2061_v61 = vmul.f32 0.00390625, %v2060_v14  ;;  %v3423_v19 = vpack.c.bf16 %v2379_v30, %v2378_v2  ;;  %v2384_v14 = vld [vmem:[%s4903_s8 + $0x40] sm:$0xff]  ;;  %v2391_v42 = vld [vmem:[%s4903_s8 + $0x78] sm:$0xff] }
 0x273   : > { %3420 = vmatprep.subr.bf16.mxu0 %v3419_v21 }
 0x274   : > { %v2131_v45 = vsel %vm1829_vm2, %v2061_v61, %v2130_v57  ;;  %3422 = vmatpush3.bf16.msra.mxu0 %v3419_v21  ;;  %v2385_v61 = vld [vmem:[%s4903_s8 + $0x48] sm:$0xff] }
 0x275   : > { %3418 = vmatpush3.bf16.msra.mxu1 %v3417_v8  ;;  %3424 = vmatprep.subr.bf16.mxu0 %v3423_v19  ;;  %v3431_v8 = vpack.c.bf16 %v2383_v59, %v2382_v38  ;;  %v3435_v57 = vpack.c.bf16 %v2385_v61, %v2384_v14 }
 0x276   : > { %3304 = vmatprep.subr.mxu1 %v5086_v16 }
 0x278   : > { %3302 = vmatmul.mubr.msk.f32.vlgmr.msra.gmra.mrb[68].mxu1 %vm1991_vm3, %v2131_v45  ;;  %3426 = vmatpush3.bf16.msra.mxu0 %v3423_v19 }
 0x279   : > { %3306 = vmatprep.mubr.msk.f32.mxu1 %vm3538_vm0, %v5086_v16  ;;  %3305 = vmatpush3.msra.mxu1 %v1990_v37  ;;  %v5088_v16 = vlaneseq }
 0x27a   : > { %3451 = vmatprep.subr.bf16.mxu1 %v3419_v21  ;;  %3428 = vmatprep.subr.bf16.mxu0 %v3427_v35 }
 0x27b   : > { %v4660_v33 = vshrl.u32 %v5088_v16, 7 }
 0x27c   : > { %3430 = vmatpush3.bf16.msra.mxu0 %v3427_v35 }
 0x27d   : > { %v2306_v48 = vsub.s32 0, %v4660_v33  ;;  %3432 = vmatprep.subr.bf16.mxu0 %v3431_v8 }
 0x280   : > { %3434 = vmatpush3.bf16.msra.mxu0 %v3431_v8 }
 0x281   : > { %3436 = vmatprep.subr.bf16.mxu0 %v3435_v57 }
 0x284   : > { %3438 = vmatpush3.bf16.msra.mxu0 %v3435_v57 }
 0x343   : > { %v1972_v26 = vpop.f32.mrb[66].mxu1 }
 0x344   : > { %v1977_v28 = vrot.slane %v1972_v26, 1  ;;  %v3292_v44 = vpop.f32.mrb[67].mxu1 }
 0x346   : > { %v1979_v60 = vadd.f32 %v1977_v28, %v1972_v26 }
 0x348   : > { %v2810_v25 = vmul.f32 -1.442695, %v1979_v60  ;;  %v2386_v60 = vld [vmem:[%s4903_s8 + $0x50] sm:$0xff] }
 0x34a   : > { %3521 = vpow2.f32 %v2810_v25  ;;  %v2387_v25 = vld [vmem:[%s4903_s8 + $0x58] sm:$0xff] }
 0x34b   : > { %v2201_v51 = vpop.f32.mrb[68].mxu1 }
 0x34c   : > { %v2205_v5 = vmax.f32 %v2201_v51, 0.0  ;;  %v3303_v50 = vpop.f32.mrb[69].mxu1 }
 0x34e   : > { %3307 = vmatmul.mubr.msk.f32.vlgmr.msra.gmra.mrb[70].mxu1 %vm1902_vm4, %v2205_v5  ;;  %v3439_v5 = vpack.c.bf16 %v2387_v25, %v2386_v60 }
 0x34f   : > { %3459 = vmatpush3.bf16.msra.mxu1 %v3419_v21 }
 0x350   : > { %3452 = vmatprep.subr.bf16.mxu1 %v3423_v19  ;;  %3440 = vmatprep.subr.bf16.mxu0 %v3439_v5 }
 0x351   : > { %3442 = vmatpush3.bf16.msra.mxu0 %v3439_v5 }
 0x353   : > { %3460 = vmatpush3.bf16.msra.mxu1 %v3423_v19 }
 0x354   : > { %v3522_v3 = vpop.eup %3521  ;;  %3453 = vmatprep.subr.bf16.mxu1 %v3427_v35 }
 0x355   : > { %v1983_v1 = vadd.f32 1.0, %v3522_v3  ;;  %v2388_v3 = vld [vmem:[%s4903_s8 + $0x60] sm:$0xff] }
 0x357   : > { %3523 = vrcp.f32 %v1983_v1  ;;  %3461 = vmatpush3.bf16.msra.mxu1 %v3427_v35  ;;  %v2389_v1 = vld [vmem:[%s4903_s8 + $0x68] sm:$0xff] }
 0x358   : > { %3454 = vmatprep.subr.bf16.mxu1 %v3431_v8  ;;  %v3443_v16 = vpack.c.bf16 %v2389_v1, %v2388_v3 }
 0x35a   : > { %3444 = vmatprep.subr.bf16.mxu0 %v3443_v16 }
 0x35b   : > { %3462 = vmatpush3.bf16.msra.mxu1 %v3431_v8  ;;  %3446 = vmatpush3.bf16.msra.mxu0 %v3443_v16 }
 0x35c   : > { %3455 = vmatprep.subr.bf16.mxu1 %v3435_v57 }
 0x35f   : > { %3463 = vmatpush3.bf16.msra.mxu1 %v3435_v57 }
 0x360   : > { %3456 = vmatprep.subr.bf16.mxu1 %v3439_v5 }
 0x361   : > { %v3524_v41 = vpop.eup %3523 }
 0x362   : > { %v4665_v29 = vrot.slane %v3524_v41, %v2306_v48  ;;  %v2390_v41 = vld [vmem:[%s4903_s8 + $0x70] sm:$0xff] }
 0x363   : > { %3464 = vmatpush3.bf16.msra.mxu1 %v3439_v5  ;;  %v3447_v10 = vpack.c.bf16 %v2391_v42, %v2390_v41 }
 0x364   : > { %3457 = vmatprep.subr.bf16.mxu1 %v3443_v16 }
 0x365   : > { %3448 = vmatprep.subr.bf16.mxu0 %v3447_v10 }
 0x366   : > { %3450 = vmatpush3.bf16.msra.mxu0 %v3447_v10 }
 0x367   : > { %3465 = vmatpush3.bf16.msra.mxu1 %v3443_v16 }
 0x368   : > { %3458 = vmatprep.subr.bf16.mxu1 %v3447_v10 }
 0x36b   : > { %3466 = vmatpush3.bf16.msra.mxu1 %v3447_v10 }
 0x421   : > { %v2275_v45 = vpop.f32.mrb[70].mxu1 }
 0x422   : > { %v2280_v37 = vrot.slane %v2275_v45, 1  ;;  %v3308_v26 = vpop.f32.mrb[71].mxu1 }
 0x424   : > { %v2282_v28 = vadd.f32 %v2280_v37, %v2275_v45 }
 0x426   : > { %v2813_v44 = vmul.f32 -1.442695, %v2282_v28 }
 0x428   : > { %3525 = vpow2.f32 %v2813_v44 }
 0x432   : > { %v3526_v51 = vpop.eup %3525 }
 0x433   : > { %v2286_v50 = vadd.f32 1.0, %v3526_v51 }
 0x435   : > { %3527 = vrcp.f32 %v2286_v50 }
 0x43f   : > { %v3528_v2 = vpop.eup %3527 }
 0x440   : > { %2296 = vrot.lane.b32.xlu1 %v3528_v2, %s3540_s25  ;;  %2290 = vrot.lane.b32.xlu0 %v3528_v2, %s3541_s26 }
 0x444   : > { %2293 = vrot.lane.b32.xlu0 %v3528_v2, %s3542_s27 }
 0x4b2   : > { %v2291_v21 = vpop.permute.xlu0 %2290  ;;  %v2297_v0 = vpop.permute.xlu1 %2296 }
 0x4b3   : > { %v2299_v30 = vsel %vm1991_vm3, %v3528_v2, %v2291_v21 }
 0x4b6   : > { %v2294_v19 = vpop.permute.xlu0 %2293 }
 0x4b7   : > { %v2301_v52 = vsel %vm2300_vm5, %v2299_v30, %v2294_v19 }
 0x4b8   : > { %v2303_v35 = vsel %vm2302_vm6, %v2301_v52, %v2297_v0 }
 0x4b9   : > { %v4718_v38 = vrot.slane %v2303_v35, %v2306_v48 }
 0x4bb   : > { %v2309_v59 = vadd.f32 %v4718_v38, %v4216_v20  ;;  %v2308_v8 = vadd.f32 %v4718_v38, %v4211_v22  ;;  %v2320_v14 = vadd.f32 %v4718_v38, %v4329_v17  ;;  %v2321_v61 = vadd.f32 %v4718_v38, %v4344_v40 }
 0x4bc   : > { %v2310_v57 = vadd.f32 %v4718_v38, %v4206_v34  ;;  %v2322_v33 = vadd.f32 %v4718_v38, %v4356_v6  ;;  %v2311_v48 = vadd.f32 %v4718_v38, %v4198_v4  ;;  %v2323_v20 = vadd.f32 %v4718_v38, %v4339_v13 }
 0x4bd   : > { %v2344_v22 = vmul.f32 %v4665_v29, %v2308_v8  ;;  %v2356_v45 = vmul.f32 %v4665_v29, %v2320_v14  ;;  %v2345_v17 = vmul.f32 %v4665_v29, %v2309_v59  ;;  %v2357_v40 = vmul.f32 %v4665_v29, %v2321_v61 }
 0x4be   : > { %v2346_v37 = vmul.f32 %v4665_v29, %v2310_v57  ;;  %v2358_v34 = vmul.f32 %v4665_v29, %v2322_v33  ;;  %v2347_v6 = vmul.f32 %v4665_v29, %v2311_v48  ;;  %v2359_v26 = vmul.f32 %v4665_v29, %v2323_v20 }
 0x4bf   : > { %3341 = vmatprep.mubr.f32.mxu0 %v2344_v22  ;;  %3359 = vmatprep.mubr.f32.mxu1 %v2356_v45  ;;  %v2312_v4 = vadd.f32 %v4718_v38, %v4241_v54  ;;  %v2324_v13 = vadd.f32 %v4718_v38, %v4373_v39  ;;  %v2313_v28 = vadd.f32 %v4718_v38, %v4256_v23 }
 0x4c0   : > { %3342 = vmatmul.mubr.f32.vlgmr.msra.gmra.mrb[96].mxu0 %v2345_v17  ;;  %3360 = vmatmul.mubr.f32.vlgmr.msra.gmra.mrb[72].mxu1 %v2357_v40  ;;  %v2325_v44 = vadd.f32 %v4718_v38, %v4388_v58  ;;  %v2314_v60 = vadd.f32 %v4718_v38, %v4268_v24  ;;  %v2326_v25 = vadd.f32 %v4718_v38, %v4400_v18 }
 0x4c1   : > { %3344 = vmatprep.mubr.f32.mxu0 %v2346_v37  ;;  %3362 = vmatprep.mubr.f32.mxu1 %v2358_v34  ;;  %v2348_v54 = vmul.f32 %v4665_v29, %v2312_v4  ;;  %v2360_v39 = vmul.f32 %v4665_v29, %v2324_v13  ;;  %v2349_v51 = vmul.f32 %v4665_v29, %v2313_v28 }
 0x4c2   : > { %v2361_v23 = vmul.f32 %v4665_v29, %v2325_v44  ;;  %v2350_v5 = vmul.f32 %v4665_v29, %v2314_v60  ;;  %v2362_v58 = vmul.f32 %v4665_v29, %v2326_v25  ;;  %v2315_v24 = vadd.f32 %v4718_v38, %v4251_v55 }
 0x4c3   : > { %v2327_v18 = vadd.f32 %v4718_v38, %v4383_v43  ;;  %v2316_v50 = vadd.f32 %v4718_v38, %v4285_v63  ;;  %v2328_v3 = vadd.f32 %v4718_v38, %v4423_v9  ;;  %v2317_v1 = vadd.f32 %v4718_v38, %v4300_v31 }
 0x4c4   : > { %3345 = vmatmul.mubr.f32.gmra.mrb[98].mxu0 %v2347_v6  ;;  %3363 = vmatmul.mubr.f32.gmra.mrb[74].mxu1 %v2359_v26  ;;  %v2351_v16 = vmul.f32 %v4665_v29, %v2315_v24  ;;  %v2329_v41 = vadd.f32 %v4718_v38, %v4442_v53  ;;  %v2318_v55 = vadd.f32 %v4718_v38, %v4312_v32 }
 0x4c5   : > { %3347 = vmatprep.mubr.f32.mxu0 %v2348_v54  ;;  %3365 = vmatprep.mubr.f32.mxu1 %v2360_v39  ;;  %v2363_v63 = vmul.f32 %v4665_v29, %v2327_v18  ;;  %v2352_v43 = vmul.f32 %v4665_v29, %v2316_v50  ;;  %v2364_v9 = vmul.f32 %v4665_v29, %v2328_v3 }
 0x4c6   : > { %v2353_v31 = vmul.f32 %v4665_v29, %v2317_v1  ;;  %v2365_v42 = vmul.f32 %v4665_v29, %v2329_v41  ;;  %v2354_v10 = vmul.f32 %v4665_v29, %v2318_v55  ;;  %v2330_v53 = vadd.f32 %v4718_v38, %v4455_v56 }
 0x4c7   : > { %v2319_v32 = vadd.f32 %v4718_v38, %v4295_v49  ;;  %v2331_v2 = vadd.f32 %v4718_v38, %v4437_v47  ;;  %v2332_v21 = vadd.f32 %v4718_v38, %v4478_v62  ;;  %v2333_v30 = vadd.f32 %v4718_v38, %v4496_v36 }
 0x4c8   : > { %3348 = vmatmul.mubr.f32.gmra.mrb[100].mxu0 %v2349_v51  ;;  %3366 = vmatmul.mubr.f32.gmra.mrb[76].mxu1 %v2361_v23  ;;  %v2366_v19 = vmul.f32 %v4665_v29, %v2330_v53  ;;  %v2334_v0 = vadd.f32 %v4718_v38, %v4509_v46  ;;  %v2335_v56 = vadd.f32 %v4718_v38, %v4491_v15 }
 0x4c9   : > { %3350 = vmatprep.mubr.f32.mxu0 %v2350_v5  ;;  %3368 = vmatprep.mubr.f32.mxu1 %v2362_v58  ;;  %v2355_v49 = vmul.f32 %v4665_v29, %v2319_v32  ;;  %v2367_v47 = vmul.f32 %v4665_v29, %v2331_v2  ;;  %v2368_v62 = vmul.f32 %v4665_v29, %v2332_v21 }
 0x4ca   : > { %v2369_v36 = vmul.f32 %v4665_v29, %v2333_v30  ;;  %v2370_v52 = vmul.f32 %v4665_v29, %v2334_v0  ;;  %v2371_v35 = vmul.f32 %v4665_v29, %v2335_v56  ;;  %v2336_v46 = vadd.f32 %v4718_v38, %v4536_v12 }
 0x4cb   : > { %v2337_v15 = vadd.f32 %v4718_v38, %v4552_v7  ;;  %v2338_v59 = vadd.f32 %v4718_v38, %v4527_v11  ;;  %v2339_v8 = vadd.f32 %v4718_v38, %v4545_v27  ;;  %v4819_v11 = vld [vmem:[%s4904_s9] ss:$0 sm:$0xff] }
 0x4cc   : > { %3351 = vmatmul.mubr.f32.gmra.mrb[102].mxu0 %v2351_v16  ;;  %3369 = vmatmul.mubr.f32.gmra.mrb[78].mxu1 %v2363_v63  ;;  %v2372_v14 = vmul.f32 %v4665_v29, %v2336_v46 }
 0x4cd   : > { %3353 = vmatprep.mubr.f32.mxu0 %v2352_v43  ;;  %3371 = vmatprep.mubr.f32.mxu1 %v2364_v9  ;;  %v2373_v61 = vmul.f32 %v4665_v29, %v2337_v15  ;;  %v2374_v57 = vmul.f32 %v4665_v29, %v2338_v59  ;;  %v2375_v12 = vmul.f32 %v4665_v29, %v2339_v8 }
 0x4d0   : > { %3354 = vmatmul.mubr.f32.gmra.mrb[104].mxu0 %v2353_v31  ;;  %3372 = vmatmul.mubr.f32.gmra.mrb[80].mxu1 %v2365_v42 }
 0x4d1   : > { %3356 = vmatprep.mubr.f32.mxu0 %v2354_v10  ;;  %3374 = vmatprep.mubr.f32.mxu1 %v2366_v19 }
 0x4d4   : > { %3357 = vmatmul.mubr.f32.gmra.mrb[106].mxu0 %v2355_v49  ;;  %3375 = vmatmul.mubr.f32.gmra.mrb[82].mxu1 %v2367_v47 }
 0x4d5   : > { %3377 = vmatprep.mubr.f32.mxu1 %v2368_v62 }
 0x4d8   : > { %3378 = vmatmul.mubr.f32.gmra.mrb[84].mxu1 %v2369_v36 }
 0x4d9   : > { %3380 = vmatprep.mubr.f32.mxu1 %v2370_v52 }
 0x4dc   : > { %3381 = vmatmul.mubr.f32.gmra.mrb[86].mxu1 %v2371_v35 }
 0x4dd   : > { %3383 = vmatprep.mubr.f32.mxu1 %v2372_v14 }
 0x4e0   : > { %3384 = vmatmul.mubr.f32.gmra.mrb[88].mxu1 %v2373_v61 }
 0x4e1   : > { %3386 = vmatprep.mubr.f32.mxu1 %v2374_v57 }
 0x4e4   : > { %3387 = vmatmul.mubr.f32.gmra.mrb[90].mxu1 %v2375_v12 }
 0x593   : > { %v3343_v27 = vpop.f32.mrb[96].mxu0  ;;  %v3361_v7 = vpop.f32.mrb[72].mxu1 }
 0x594   : > { %v2471_v29 = vadd.f32 %v3343_v27, %v4819_v11  ;;  %v2531_v38 = vadd.f32 %v3361_v7, %v4819_v11  ;;  %v2465_v33 = vpop.f32.mrb[97].mxu0  ;;  %v2525_v48 = vpop.f32.mrb[73].mxu1 }
 0x595   : > { %v2466_v20 = vadd.f32 %v4819_v11, %v2465_v33  ;;  %v2526_v22 = vadd.f32 %v4819_v11, %v2525_v48 }
 0x596   : > { %2625 = vst [vmem:[%s4826_s15 + $0x8] sm:$0xff] %v2471_v29  ;;  %2637 = vst [vmem:[%s4826_s15 + $0x68] sm:$0xff] %v2531_v38 }
 0x597   : > { %2624 = vst [vmem:[%s4826_s15] sm:$0xff] %v2466_v20  ;;  %2636 = vst [vmem:[%s4826_s15 + $0x60] sm:$0xff] %v2526_v22  ;;  %v3346_v45 = vpop.f32.mrb[98].mxu0  ;;  %v3364_v17 = vpop.f32.mrb[74].mxu1 }
 0x598   : > { %v2481_v40 = vadd.f32 %v3346_v45, %v4819_v11  ;;  %v2541_v37 = vadd.f32 %v3364_v17, %v4819_v11  ;;  %v2475_v34 = vpop.f32.mrb[99].mxu0  ;;  %v2535_v6 = vpop.f32.mrb[75].mxu1 }
 0x599   : > { %v2476_v26 = vadd.f32 %v4819_v11, %v2475_v34  ;;  %v2536_v4 = vadd.f32 %v4819_v11, %v2535_v6 }
 0x59a   : > { %2627 = vst [vmem:[%s4826_s15 + $0x18] sm:$0xff] %v2481_v40  ;;  %2639 = vst [vmem:[%s4826_s15 + $0x78] sm:$0xff] %v2541_v37 }
 0x59b   : > { %2626 = vst [vmem:[%s4826_s15 + $0x10] sm:$0xff] %v2476_v26  ;;  %2638 = vst [vmem:[%s4826_s15 + $0x70] sm:$0xff] %v2536_v4  ;;  %v3349_v13 = vpop.f32.mrb[100].mxu0  ;;  %v3367_v28 = vpop.f32.mrb[76].mxu1 }
 0x59c   : > { %v2491_v44 = vadd.f32 %v3349_v13, %v4819_v11  ;;  %v2551_v60 = vadd.f32 %v3367_v28, %v4819_v11  ;;  %v2485_v25 = vpop.f32.mrb[101].mxu0  ;;  %v2545_v54 = vpop.f32.mrb[77].mxu1 }
 0x59d   : > { %v2486_v39 = vadd.f32 %v4819_v11, %v2485_v25  ;;  %v2546_v51 = vadd.f32 %v4819_v11, %v2545_v54 }
 0x59e   : > { %2629 = vst [vmem:[%s4826_s15 + $0x28] sm:$0xff] %v2491_v44  ;;  %2641 = vst [vmem:[%s4826_s15 + $0x88] sm:$0xff] %v2551_v60 }
 0x59f   : > { %2628 = vst [vmem:[%s4826_s15 + $0x20] sm:$0xff] %v2486_v39  ;;  %2640 = vst [vmem:[%s4826_s15 + $0x80] sm:$0xff] %v2546_v51  ;;  %v3352_v23 = vpop.f32.mrb[102].mxu0  ;;  %v3370_v5 = vpop.f32.mrb[78].mxu1 }
 0x5a0   : > { %v2501_v58 = vadd.f32 %v3352_v23, %v4819_v11  ;;  %v2561_v24 = vadd.f32 %v3370_v5, %v4819_v11  ;;  %v2495_v18 = vpop.f32.mrb[103].mxu0  ;;  %v2555_v50 = vpop.f32.mrb[79].mxu1 }
 0x5a1   : > { %v2496_v3 = vadd.f32 %v4819_v11, %v2495_v18  ;;  %v2556_v1 = vadd.f32 %v4819_v11, %v2555_v50 }
 0x5a2   : > { %2631 = vst [vmem:[%s4826_s15 + $0x38] sm:$0xff] %v2501_v58  ;;  %2643 = vst [vmem:[%s4826_s15 + $0x98] sm:$0xff] %v2561_v24 }
 0x5a3   : > { %2630 = vst [vmem:[%s4826_s15 + $0x30] sm:$0xff] %v2496_v3  ;;  %2642 = vst [vmem:[%s4826_s15 + $0x90] sm:$0xff] %v2556_v1  ;;  %v3355_v16 = vpop.f32.mrb[104].mxu0  ;;  %v3373_v41 = vpop.f32.mrb[80].mxu1 }
 0x5a4   : > { %v2511_v55 = vadd.f32 %v3355_v16, %v4819_v11  ;;  %v2571_v63 = vadd.f32 %v3373_v41, %v4819_v11  ;;  %v2505_v43 = vpop.f32.mrb[105].mxu0  ;;  %v2565_v9 = vpop.f32.mrb[81].mxu1 }
 0x5a5   : > { %v2506_v31 = vadd.f32 %v4819_v11, %v2505_v43  ;;  %v2566_v42 = vadd.f32 %v4819_v11, %v2565_v9 }
 0x5a6   : > { %2633 = vst [vmem:[%s4826_s15 + $0x48] sm:$0xff] %v2511_v55  ;;  %2645 = vst [vmem:[%s4826_s15 + $0xa8] sm:$0xff] %v2571_v63 }
 0x5a7   : > { %2632 = vst [vmem:[%s4826_s15 + $0x40] sm:$0xff] %v2506_v31  ;;  %2644 = vst [vmem:[%s4826_s15 + $0xa0] sm:$0xff] %v2566_v42  ;;  %v3358_v10 = vpop.f32.mrb[106].mxu0  ;;  %v3376_v53 = vpop.f32.mrb[82].mxu1 }
 0x5a8   : > { %v2521_v32 = vadd.f32 %v3358_v10, %v4819_v11  ;;  %v2581_v2 = vadd.f32 %v3376_v53, %v4819_v11  ;;  %v2515_v21 = vpop.f32.mrb[107].mxu0  ;;  %v2575_v30 = vpop.f32.mrb[83].mxu1 }
 0x5a9   : > { %v2516_v19 = vadd.f32 %v4819_v11, %v2515_v21  ;;  %v2576_v0 = vadd.f32 %v4819_v11, %v2575_v30 }
 0x5aa   : > { %2635 = vst [vmem:[%s4826_s15 + $0x58] sm:$0xff] %v2521_v32  ;;  %2647 = vst [vmem:[%s4826_s15 + $0xb8] sm:$0xff] %v2581_v2 }
 0x5ab   : > { %2634 = vst [vmem:[%s4826_s15 + $0x50] sm:$0xff] %v2516_v19  ;;  %2646 = vst [vmem:[%s4826_s15 + $0xb0] sm:$0xff] %v2576_v0  ;;  %v3379_v56 = vpop.f32.mrb[84].mxu1 }
 0x5ac   : > { %v2591_v49 = vadd.f32 %v3379_v56, %v4819_v11  ;;  %v2585_v47 = vpop.f32.mrb[85].mxu1 }
 0x5ad   : > { %v2586_v62 = vadd.f32 %v4819_v11, %v2585_v47 }
 0x5ae   : > { %2649 = vst [vmem:[%s4826_s15 + $0xc8] sm:$0xff] %v2591_v49 }
 0x5af   : > { %2648 = vst [vmem:[%s4826_s15 + $0xc0] sm:$0xff] %v2586_v62  ;;  %v3382_v36 = vpop.f32.mrb[86].mxu1 }
 0x5b0   : > { %v2601_v52 = vadd.f32 %v3382_v36, %v4819_v11  ;;  %v2595_v35 = vpop.f32.mrb[87].mxu1 }
 0x5b1   : > { %v2596_v46 = vadd.f32 %v4819_v11, %v2595_v35 }
 0x5b2   : > { %2651 = vst [vmem:[%s4826_s15 + $0xd8] sm:$0xff] %v2601_v52 }
 0x5b3   : > { %2650 = vst [vmem:[%s4826_s15 + $0xd0] sm:$0xff] %v2596_v46  ;;  %v3385_v15 = vpop.f32.mrb[88].mxu1 }
 0x5b4   : > { %v2611_v59 = vadd.f32 %v3385_v15, %v4819_v11  ;;  %v2605_v8 = vpop.f32.mrb[89].mxu1 }
 0x5b5   : > { %v2606_v14 = vadd.f32 %v4819_v11, %v2605_v8 }
 0x5b6   : > { %2653 = vst [vmem:[%s4826_s15 + $0xe8] sm:$0xff] %v2611_v59 }
 0x5b7   : > { %2652 = vst [vmem:[%s4826_s15 + $0xe0] sm:$0xff] %v2606_v14  ;;  %v3388_v61 = vpop.f32.mrb[90].mxu1 }
 0x5b8   : > { %v2621_v57 = vadd.f32 %v3388_v61, %v4819_v11  ;;  %v2615_v12 = vpop.f32.mrb[91].mxu1 }
 0x5b9   : > { %v2616_v27 = vadd.f32 %v4819_v11, %v2615_v12 }
 0x5ba   : > { %2655 = vst [vmem:[%s4826_s15 + $0xf8] sm:$0xff] %v2621_v57 }
 0x5bb   : > { %2654 = vst [vmem:[%s4826_s15 + $0xf0] sm:$0xff] %v2616_v27 }
 0x5bc PF: > { %s20_s13 = sadd.s32 1, %s3535_s13  }
 0x5bd   : > { %p17_p4 = scmp.ge.s32.totalorder %s20_s13, 4  }
 0x5bf   :  { %19 = sbr.rel (!%p17_p4) target bundleno = 1 (0x1), region = 93 }

</bundles_post_ra>
